<compile_context>
chip_gen: v7x
topology: tpu7x:2x2x1
jax: 0.10.0
libtpu: 0.0.40
codegen_flags: <defaults>
</compile_context>

<pallas_src>
import functools

import jax
import jax.numpy as jnp
from jax.experimental import pallas as pl
from jax.experimental.pallas import tpu as pltpu

_VMEM_LIMIT = 32 * 1024 * 1024   # explicit scoped-VMEM budget (fits v5e..v7x)
_EPS = 1e-5                      # PyTorch BatchNorm2d default
_ALPHA = 0.2                     # LeakyReLU slope


def _round_up(x, m):
    return ((x + m - 1) // m) * m


def _tiles_for(m, k):
    """Pick (TILE_M, M_padded, TILE_K). K is always a multiple of 128 here."""
    tm = 256 if m >= 256 else _round_up(m, 8)
    m_pad = _round_up(m, tm)
    if k % 512 == 0:
        tk = 512
    elif k % 256 == 0:
        tk = 256
    else:
        tk = 128
    assert k % tk == 0, (k, tk)
    return tm, m_pad, tk


# ----------------------------------------------------------------------------
# Pallas kernels
# ----------------------------------------------------------------------------
def _gemm_bn_stats_kernel(x_ref, w_ref, y_ref, stats_ref):
    """Tiled GEMM; accumulates f32 Y in the resident output block and emits
    per-M-tile per-channel (sum, sum_sq) at the last K step."""
    k = pl.program_id(1)

    @pl.when(k == 0)
    def _():
        y_ref[...] = jnp.zeros_like(y_ref)

    y_ref[...] += jnp.dot(x_ref[...], w_ref[...],
                          preferred_element_type=jnp.float32)

    @pl.when(k == pl.num_programs(1) - 1)
    def _():
        y = y_ref[...]
        s = jnp.sum(y, axis=0, keepdims=True)          # (1, N)
        sq = jnp.sum(y * y, axis=0, keepdims=True)     # (1, N)  single pass
        stats_ref[...] = jnp.concatenate([s, sq], axis=0)[None]   # (1, 2, N)


def _gemm_act_kernel(x_ref, w_ref, o_ref, acc_ref, *, act, alpha):
    """Tiled GEMM with f32 accumulator scratch + fused activation epilogue."""
    k = pl.program_id(1)

    @pl.when(k == 0)
    def _():
        acc_ref[...] = jnp.zeros_like(acc_ref)

    acc_ref[...] += jnp.dot(x_ref[...], w_ref[...],
                            preferred_element_type=jnp.float32)

    @pl.when(k == pl.num_programs(1) - 1)
    def _():
        y = acc_ref[...]
        if act == "leaky":
            y = jnp.where(y > 0, y, alpha * y)
        elif act == "sigmoid":
            y = pl.reciprocal(1.0 + jnp.exp(-y), approx=True)
        o_ref[...] = y.astype(o_ref.dtype)


def _bn_act_kernel(y_ref, scale_ref, shift_ref, o_ref, *, alpha):
    """Per-channel affine (folded BatchNorm) + LeakyReLU."""
    y = y_ref[...] * scale_ref[...] + shift_ref[...]
    o_ref[...] = jnp.where(y > 0, y, alpha * y).astype(o_ref.dtype)


# ----------------------------------------------------------------------------
# pallas_call wrappers
# ----------------------------------------------------------------------------
def _matmul_bn_stats(x_mat, w_mat, tm, tk):
    m_pad, k_dim = x_mat.shape
    n_pad = w_mat.shape[1]
    gm, gk = m_pad // tm, k_dim // tk
    return pl.pallas_call(
        _gemm_bn_stats_kernel,
        out_shape=(jax.ShapeDtypeStruct((m_pad, n_pad), jnp.float32),
                   jax.ShapeDtypeStruct((gm, 2, n_pad), jnp.float32)),
        grid=(gm, gk),
        in_specs=[pl.BlockSpec((tm, tk), lambda i, k: (i, k)),
                  pl.BlockSpec((tk, n_pad), lambda i, k: (k, 0))],
        out_specs=(pl.BlockSpec((tm, n_pad), lambda i, k: (i, 0)),
                   pl.BlockSpec((1, 2, n_pad), lambda i, k: (i, 0, 0))),
        compiler_params=pltpu.CompilerParams(
            dimension_semantics=("parallel", "arbitrary"),
            vmem_limit_bytes=_VMEM_LIMIT),
    )(x_mat, w_mat)


def _matmul_act(x_mat, w_mat, tm, tk, act, out_dtype):
    m_pad, k_dim = x_mat.shape
    n_pad = w_mat.shape[1]
    gm, gk = m_pad // tm, k_dim // tk
    kernel = functools.partial(_gemm_act_kernel, act=act, alpha=_ALPHA)
    return pl.pallas_call(
        kernel,
        out_shape=jax.ShapeDtypeStruct((m_pad, n_pad), out_dtype),
        grid=(gm, gk),
        in_specs=[pl.BlockSpec((tm, tk), lambda i, k: (i, k)),
                  pl.BlockSpec((tk, n_pad), lambda i, k: (k, 0))],
        out_specs=pl.BlockSpec((tm, n_pad), lambda i, k: (i, 0)),
        scratch_shapes=[pltpu.VMEM((tm, n_pad), jnp.float32)],
        compiler_params=pltpu.CompilerParams(
            dimension_semantics=("parallel", "arbitrary"),
            vmem_limit_bytes=_VMEM_LIMIT),
    )(x_mat, w_mat)


def _bn_act(y, scale, shift, tm, out_dtype):
    m_pad, n_pad = y.shape
    gm = m_pad // tm
    kernel = functools.partial(_bn_act_kernel, alpha=_ALPHA)
    return pl.pallas_call(
        kernel,
        out_shape=jax.ShapeDtypeStruct((m_pad, n_pad), out_dtype),
        grid=(gm,),
        in_specs=[pl.BlockSpec((tm, n_pad), lambda i: (i, 0)),
                  pl.BlockSpec((1, n_pad), lambda i: (0, 0)),
                  pl.BlockSpec((1, n_pad), lambda i: (0, 0))],
        out_specs=pl.BlockSpec((tm, n_pad), lambda i: (i, 0)),
        compiler_params=pltpu.CompilerParams(
            dimension_semantics=("parallel",),
            vmem_limit_bytes=_VMEM_LIMIT),
    )(y, scale, shift)


# ----------------------------------------------------------------------------
# Plain-JAX glue: im2col (NHWC) + layer plumbing
# ----------------------------------------------------------------------------
def _im2col_nhwc(x, kh, kw, stride, pad):
    # TODO(synk): fuse im2col into the GEMM kernel via strided index_map loads
    # to avoid materializing the duplicated patch matrix in HBM.
    b, h, w, c = x.shape
    xp = jnp.pad(x, ((0, 0), (pad, pad), (pad, pad), (0, 0)))
    hout = (h + 2 * pad - kh) // stride + 1
    wout = (w + 2 * pad - kw) // stride + 1
    cols = []
    for i in range(kh):
        for j in range(kw):
            cols.append(xp[:, i:i + stride * hout:stride,
                           j:j + stride * wout:stride, :])
    p = jnp.stack(cols, axis=3)                 # (b, hout, wout, kh*kw, c)
    return p.reshape(b * hout * wout, kh * kw * c), hout, wout


def conv_block(h, weight, gamma, beta, stride, pad, use_bn, act,
               out_dtype=jnp.bfloat16):
    """h: NHWC (B, H, W, Cin_padded) bf16; weight: OIHW (Cout, Cin, kh, kw)."""
    b, _, _, cp = h.shape
    cout, cin, kh, kw = weight.shape
    n_pad = _round_up(cout, 128)

    # Zero-pad Cin -> cp (matches padded activation channels; padded rows of
    # the weight are zero so padded input channels never contribute) and
    # Cout -> n_pad (lane-dense output); reorder to (kh, kw, Cin, Cout) to
    # match im2col column order; cast to bf16 for the MXU.
    w = jnp.pad(weight.astype(jnp.float32),
                ((0, n_pad - cout), (0, cp - cin), (0, 0), (0, 0)))
    w_mat = w.transpose(2, 3, 1, 0).reshape(kh * kw * cp, n_pad)
    w_mat = w_mat.astype(jnp.bfloat16)

    x_mat, hout, wout = _im2col_nhwc(h, kh, kw, stride, pad)   # bf16 (M, K)
    m = b * hout * wout
    k_dim = kh * kw * cp
    tm, m_pad, tk = _tiles_for(m, k_dim)
    if m_pad != m:
        # Zero rows: contribute 0 to BN sums, so stats over the true M stay exact.
        x_mat = jnp.pad(x_mat, ((0, m_pad - m), (0, 0)))

    if use_bn:
        y, stats = _matmul_bn_stats(x_mat, w_mat, tm, tk)
        sums = jnp.sum(stats, axis=0)                        # (2, n_pad) f32
        mean = sums[0] / m
        var = jnp.maximum(sums[1] / m - mean * mean, 0.0)    # biased 1/M var
        rstd = jax.lax.rsqrt(var + _EPS)
        g = jnp.pad(gamma.astype(jnp.float32), (0, n_pad - cout))
        bb = jnp.pad(beta.astype(jnp.float32), (0, n_pad - cout))
        scale = (g * rstd).reshape(1, n_pad)
        shift = (bb - mean * g * rstd).reshape(1, n_pad)
        out = _bn_act(y, scale, shift, tm, out_dtype)
    else:
        out = _matmul_act(x_mat, w_mat, tm, tk, act, out_dtype)

    return out[:m].reshape(b, hout, wout, n_pad)


def discriminator_forward(x, params):
    (w1, w2, g2, b2, w3, g3, b3, w4, g4, b4, w5) = params
    # Single NCHW -> NHWC layout change; pad RGB 3 -> 8 channels so layer-1
    # K = 4*4*8 = 128 is (8,128)-aligned. Activations stay bf16 NHWC.
    h = jnp.transpose(x, (0, 2, 3, 1))
    h = jnp.pad(h, ((0, 0), (0, 0), (0, 0), (0, 8 - h.shape[3])))
    h = h.astype(jnp.bfloat16)

    h = conv_block(h, w1, None, None, 2, 1, False, "leaky")
    h = conv_block(h, w2, g2, b2, 2, 1, True, "leaky")
    h = conv_block(h, w3, g3, b3, 2, 1, True, "leaky")
    h = conv_block(h, w4, g4, b4, 2, 1, True, "leaky")
    h = conv_block(h, w5, None, None, 1, 0, False, "sigmoid",
                   out_dtype=jnp.float32)
    # h: (B, 1, 1, 128); the real output channel is column 0. Return NCHW.
    return jnp.transpose(h[:, :, :, :1], (0, 3, 1, 2))


def init_params(key, ndf):
    ks = jax.random.split(key, 5)

    def w(k, cout, cin):
        return (0.02 * jax.random.normal(k, (cout, cin, 4, 4))).astype(jnp.float32)

    w1 = w(ks[0], ndf, 3)
    w2 = w(ks[1], ndf * 2, ndf)
    w3 = w(ks[2], ndf * 4, ndf * 2)
    w4 = w(ks[3], ndf * 8, ndf * 4)
    w5 = w(ks[4], 1, ndf * 8)
    # BatchNorm2d default init: weight=1, bias=0
    g2, b2 = jnp.ones((ndf * 2,), jnp.float32), jnp.zeros((ndf * 2,), jnp.float32)
    g3, b3 = jnp.ones((ndf * 4,), jnp.float32), jnp.zeros((ndf * 4,), jnp.float32)
    g4, b4 = jnp.ones((ndf * 8,), jnp.float32), jnp.zeros((ndf * 8,), jnp.float32)
    return (w1, w2, g2, b2, w3, g3, b3, w4, g4, b4, w5)


# ----------------------------------------------------------------------------
# Pure-JAX reference (lax.conv, f32) for the correctness check
# ----------------------------------------------------------------------------
def reference_forward(x, params, eps=_EPS):
    (w1, w2, g2, b2, w3, g3, b3, w4, g4, b4, w5) = params

    def conv(h, w, stride, pad):
        return jax.lax.conv_general_dilated(
            h, w, (stride, stride), [(pad, pad), (pad, pad)],
            dimension_numbers=("NCHW", "OIHW", "NCHW"))

    def bn(y, g, b):
        mean = jnp.mean(y, axis=(0, 2, 3), keepdims=True)
        var = jnp.mean((y - mean) ** 2, axis=(0, 2, 3), keepdims=True)
        return ((y - mean) * jax.lax.rsqrt(var + eps)
                * g.reshape(1, -1, 1, 1) + b.reshape(1, -1, 1, 1))

    def lrelu(y):
        return jnp.where(y > 0, y, _ALPHA * y)

    h = lrelu(conv(x, w1, 2, 1))
    h = lrelu(bn(conv(h, w2, 2, 1), g2, b2))
    h = lrelu(bn(conv(h, w3, 2, 1), g3, b3))
    h = lrelu(bn(conv(h, w4, 2, 1), g4, b4))
    h = jax.nn.sigmoid(conv(h, w5, 1, 0))
    return h


if __name__ == "__main__":
    ndf = 8                       # small ndf for the demo (module default is 64)
    B = 2
    key = jax.random.PRNGKey(0)
    k_x, k_p = jax.random.split(key)
    # DCGAN discriminator expects 3x64x64 inputs (64 -> 32 -> 16 -> 8 -> 4 -> 1)
    x = jax.random.normal(k_x, (B, 3, 64, 64), dtype=jnp.float32)
    params = init_params(k_p, ndf)

    out = jax.block_until_ready(jax.jit(discriminator_forward)(x, params))
    assert out.shape == (B, 1, 1, 1), out.shape

    ref = jax.block_until_ready(reference_forward(x, params))
    # bf16 MXU operands -> slightly looser tolerance than the f32 reference.
    assert jnp.allclose(out, ref, atol=2e-2, rtol=2e-2), (out, ref)

    print("KERNEL_OK")
</pallas_src>

<mosaic_0001>
module attributes {stable_mosaic.version = 11 : i64} {
  func.func @_gemm_act_kernel(%arg0: i32, %arg1: i32, %arg2: memref<256x128xbf16, #tpu.memory_space<vmem>>, %arg3: memref<128x128xbf16, #tpu.memory_space<vmem>>, %arg4: memref<256x128xbf16, #tpu.memory_space<vmem>>, %arg5: memref<256x128xf32, #tpu.memory_space<vmem>>) attributes {dimension_semantics = [#tpu.dimension_semantics<parallel>, #tpu.dimension_semantics<arbitrary>], iteration_bounds = array<i64: 8, 1>, scalar_prefetch = 0 : i64, scratch_operands = 1 : i64, tpu.core_type = #tpu.core_type<tc>, window_params = [{transform_indices = @transform_0, window_bounds = array<i64: 256, 128>}, {transform_indices = @transform_1, window_bounds = array<i64: 128, 128>}, {transform_indices = @transform_2, window_bounds = array<i64: 256, 128>}]} {
    %c0_i32 = arith.constant 0 : i32
    %0 = arith.cmpi eq, %arg1, %c0_i32 : i32
    %1 = arith.extui %0 : i1 to i32
    %c0_i32_0 = arith.constant 0 : i32
    %2 = arith.cmpi ne, %1, %c0_i32_0 : i32
    scf.if %2 {
      %cst_10 = arith.constant 0.000000e+00 : f32
      %12 = vector.broadcast %cst_10 : f32 to vector<256x128xf32>
      %c0_11 = arith.constant 0 : index
      %c0_12 = arith.constant 0 : index
      %13 = vector.load %arg5[%c0_11, %c0_12] : memref<256x128xf32, #tpu.memory_space<vmem>>, vector<256x128xf32>
      tpu.vector_store %arg5[%c0_11, %c0_12], %12 {strides = array<i32>} : memref<256x128xf32, #tpu.memory_space<vmem>>, vector<256x128xf32>,
    } else {
    }
    %c0 = arith.constant 0 : index
    %c0_1 = arith.constant 0 : index
    %3 = vector.load %arg5[%c0, %c0_1] : memref<256x128xf32, #tpu.memory_space<vmem>>, vector<256x128xf32>
    %c0_2 = arith.constant 0 : index
    %c0_3 = arith.constant 0 : index
    %4 = vector.load %arg2[%c0_2, %c0_3] : memref<256x128xbf16, #tpu.memory_space<vmem>>, vector<256x128xbf16>
    %c0_4 = arith.constant 0 : index
    %c0_5 = arith.constant 0 : index
    %5 = vector.load %arg3[%c0_4, %c0_5] : memref<128x128xbf16, #tpu.memory_space<vmem>>, vector<128x128xbf16>
    %cst = arith.constant dense<0.000000e+00> : vector<256x128xf32>
    %6 = tpu.matmul %4, %5, %cst {dimension_numbers = #tpu.dot_dimension_numbers<[1], [0], [0], [1], [0, 0, 1, 1], [], []>} : vector<256x128xbf16>, vector<128x128xbf16>, vector<256x128xf32> -> vector<256x128xf32>
    %7 = arith.addf %3, %6 : vector<256x128xf32>
    %c0_6 = arith.constant 0 : index
    %c0_7 = arith.constant 0 : index
    %8 = vector.load %arg5[%c0_6, %c0_7] : memref<256x128xf32, #tpu.memory_space<vmem>>, vector<256x128xf32>
    tpu.vector_store %arg5[%c0_6, %c0_7], %7 {strides = array<i32>} : memref<256x128xf32, #tpu.memory_space<vmem>>, vector<256x128xf32>,
    %c0_i32_8 = arith.constant 0 : i32
    %9 = arith.cmpi eq, %arg1, %c0_i32_8 : i32
    %10 = arith.extui %9 : i1 to i32
    %c0_i32_9 = arith.constant 0 : i32
    %11 = arith.cmpi ne, %10, %c0_i32_9 : i32
    scf.if %11 {
      %c0_10 = arith.constant 0 : index
      %c0_11 = arith.constant 0 : index
      %12 = vector.load %arg5[%c0_10, %c0_11] : memref<256x128xf32, #tpu.memory_space<vmem>>, vector<256x128xf32>
      %cst_12 = arith.constant 0.000000e+00 : f32
      %13 = vector.broadcast %cst_12 : f32 to vector<256x128xf32>
      %14 = arith.cmpf ogt, %12, %13 : vector<256x128xf32>
      %cst_13 = arith.constant 2.000000e-01 : f32
      %15 = vector.broadcast %cst_13 : f32 to vector<256x128xf32>
      %16 = arith.mulf %15, %12 : vector<256x128xf32>
      %17 = arith.select %14, %12, %16 : vector<256x128xi1>, vector<256x128xf32>
      %18 = arith.truncf %17 : vector<256x128xf32> to vector<256x128xbf16>
      %c0_14 = arith.constant 0 : index
      %c0_15 = arith.constant 0 : index
      %19 = vector.load %arg4[%c0_14, %c0_15] : memref<256x128xbf16, #tpu.memory_space<vmem>>, vector<256x128xbf16>
      tpu.vector_store %arg4[%c0_14, %c0_15], %18 {strides = array<i32>} : memref<256x128xbf16, #tpu.memory_space<vmem>>, vector<256x128xbf16>,
    } else {
    }
    return
  }
  func.func @transform_0(%arg0: i32, %arg1: i32) -> (i32, i32) {
    %c0_i32 = arith.constant 0 : i32
    return %arg0, %arg1 : i32, i32
  }
  func.func @transform_1(%arg0: i32, %arg1: i32) -> (i32, i32) {
    %c0_i32 = arith.constant 0 : i32
    %c0_i32_0 = arith.constant 0 : i32
    return %arg1, %c0_i32 : i32, i32
  }
  func.func @transform_2(%arg0: i32, %arg1: i32) -> (i32, i32) {
    %c0_i32 = arith.constant 0 : i32
    %c0_i32_0 = arith.constant 0 : i32
    return %arg0, %c0_i32 : i32, i32
  }
}

module attributes {stable_mosaic.version = 11 : i64} {
  func.func @_gemm_bn_stats_kernel(%arg0: i32, %arg1: i32, %arg2: memref<256x512xbf16, #tpu.memory_space<vmem>>, %arg3: memref<512x128xbf16, #tpu.memory_space<vmem>>, %arg4: memref<256x128xf32, #tpu.memory_space<vmem>>, %arg5: memref<1x2x128xf32, #tpu.memory_space<vmem>>) attributes {dimension_semantics = [#tpu.dimension_semantics<parallel>, #tpu.dimension_semantics<arbitrary>], iteration_bounds = array<i64: 2, 4>, scalar_prefetch = 0 : i64, scratch_operands = 0 : i64, tpu.core_type = #tpu.core_type<tc>, window_params = [{transform_indices = @transform_0, window_bounds = array<i64: 256, 512>}, {transform_indices = @transform_1, window_bounds = array<i64: 512, 128>}, {transform_indices = @transform_2, window_bounds = array<i64: 256, 128>}, {transform_indices = @transform_3, window_bounds = array<i64: 1, 2, 128>}]} {
    %c0_i32 = arith.constant 0 : i32
    %0 = arith.cmpi eq, %arg1, %c0_i32 : i32
    %1 = arith.extui %0 : i1 to i32
    %c0_i32_0 = arith.constant 0 : i32
    %2 = arith.cmpi ne, %1, %c0_i32_0 : i32
    scf.if %2 {
      %cst_9 = arith.constant 0.000000e+00 : f32
      %12 = vector.broadcast %cst_9 : f32 to vector<256x128xf32>
      %c0_10 = arith.constant 0 : index
      %c0_11 = arith.constant 0 : index
      %13 = vector.load %arg4[%c0_10, %c0_11] : memref<256x128xf32, #tpu.memory_space<vmem>>, vector<256x128xf32>
      tpu.vector_store %arg4[%c0_10, %c0_11], %12 {strides = array<i32>} : memref<256x128xf32, #tpu.memory_space<vmem>>, vector<256x128xf32>,
    } else {
    }
    %c0 = arith.constant 0 : index
    %c0_1 = arith.constant 0 : index
    %3 = vector.load %arg4[%c0, %c0_1] : memref<256x128xf32, #tpu.memory_space<vmem>>, vector<256x128xf32>
    %c0_2 = arith.constant 0 : index
    %c0_3 = arith.constant 0 : index
    %4 = vector.load %arg2[%c0_2, %c0_3] : memref<256x512xbf16, #tpu.memory_space<vmem>>, vector<256x512xbf16>
    %c0_4 = arith.constant 0 : index
    %c0_5 = arith.constant 0 : index
    %5 = vector.load %arg3[%c0_4, %c0_5] : memref<512x128xbf16, #tpu.memory_space<vmem>>, vector<512x128xbf16>
    %cst = arith.constant dense<0.000000e+00> : vector<256x128xf32>
    %6 = tpu.matmul %4, %5, %cst {dimension_numbers = #tpu.dot_dimension_numbers<[1], [0], [0], [1], [0, 0, 1, 1], [], []>} : vector<256x512xbf16>, vector<512x128xbf16>, vector<256x128xf32> -> vector<256x128xf32>
    %7 = arith.addf %3, %6 : vector<256x128xf32>
    %c0_6 = arith.constant 0 : index
    %c0_7 = arith.constant 0 : index
    %8 = vector.load %arg4[%c0_6, %c0_7] : memref<256x128xf32, #tpu.memory_space<vmem>>, vector<256x128xf32>
    tpu.vector_store %arg4[%c0_6, %c0_7], %7 {strides = array<i32>} : memref<256x128xf32, #tpu.memory_space<vmem>>, vector<256x128xf32>,
    %c3_i32 = arith.constant 3 : i32
    %9 = arith.cmpi eq, %arg1, %c3_i32 : i32
    %10 = arith.extui %9 : i1 to i32
    %c0_i32_8 = arith.constant 0 : i32
    %11 = arith.cmpi ne, %10, %c0_i32_8 : i32
    scf.if %11 {
      %c0_9 = arith.constant 0 : index
      %c0_10 = arith.constant 0 : index
      %12 = vector.load %arg4[%c0_9, %c0_10] : memref<256x128xf32, #tpu.memory_space<vmem>>, vector<256x128xf32>
      %cst_11 = arith.constant dense<0.000000e+00> : vector<128xf32>
      %13 = vector.multi_reduction <add>, %12, %cst_11 [0] : vector<256x128xf32> to vector<128xf32>
      %14 = vector.shape_cast %13 : vector<128xf32> to vector<1x128xf32>
      %15 = arith.mulf %12, %12 : vector<256x128xf32>
      %cst_12 = arith.constant dense<0.000000e+00> : vector<128xf32>
      %16 = vector.multi_reduction <add>, %15, %cst_12 [0] : vector<256x128xf32> to vector<128xf32>
      %17 = vector.shape_cast %16 : vector<128xf32> to vector<1x128xf32>
      %18 = tpu.concatenate %14, %17 in 0 : vector<1x128xf32>, vector<1x128xf32> -> vector<2x128xf32>
      %19 = vector.shape_cast %18 : vector<2x128xf32> to vector<1x2x128xf32>
      %c0_13 = arith.constant 0 : index
      %c0_14 = arith.constant 0 : index
      %c0_15 = arith.constant 0 : index
      %20 = vector.load %arg5[%c0_13, %c0_14, %c0_15] : memref<1x2x128xf32, #tpu.memory_space<vmem>>, vector<1x2x128xf32>
      tpu.vector_store %arg5[%c0_13, %c0_14, %c0_15], %19 {strides = array<i32>} : memref<1x2x128xf32, #tpu.memory_space<vmem>>, vector<1x2x128xf32>,
    } else {
    }
    return
  }
  func.func @transform_0(%arg0: i32, %arg1: i32) -> (i32, i32) {
    %c0_i32 = arith.constant 0 : i32
    return %arg0, %arg1 : i32, i32
  }
  func.func @transform_1(%arg0: i32, %arg1: i32) -> (i32, i32) {
    %c0_i32 = arith.constant 0 : i32
    %c0_i32_0 = arith.constant 0 : i32
    return %arg1, %c0_i32 : i32, i32
  }
  func.func @transform_2(%arg0: i32, %arg1: i32) -> (i32, i32) {
    %c0_i32 = arith.constant 0 : i32
    %c0_i32_0 = arith.constant 0 : i32
    return %arg0, %c0_i32 : i32, i32
  }
  func.func @transform_3(%arg0: i32, %arg1: i32) -> (i32, i32, i32) {
    %c0_i32 = arith.constant 0 : i32
    %c0_i32_0 = arith.constant 0 : i32
    %c0_i32_1 = arith.constant 0 : i32
    return %arg0, %c0_i32, %c0_i32_0 : i32, i32, i32
  }
}

module attributes {stable_mosaic.version = 11 : i64} {
  func.func @_bn_act_kernel(%arg0: i32, %arg1: memref<256x128xf32, #tpu.memory_space<vmem>>, %arg2: memref<1x128xf32, #tpu.memory_space<vmem>>, %arg3: memref<1x128xf32, #tpu.memory_space<vmem>>, %arg4: memref<256x128xbf16, #tpu.memory_space<vmem>>) attributes {dimension_semantics = [#tpu.dimension_semantics<parallel>], iteration_bounds = array<i64: 2>, scalar_prefetch = 0 : i64, scratch_operands = 0 : i64, tpu.core_type = #tpu.core_type<tc>, window_params = [{transform_indices = @transform_0, window_bounds = array<i64: 256, 128>}, {pipeline_mode = #tpu.pipeline_mode<synchronous>, transform_indices = @transform_1, window_bounds = array<i64: 1, 128>}, {pipeline_mode = #tpu.pipeline_mode<synchronous>, transform_indices = @transform_2, window_bounds = array<i64: 1, 128>}, {transform_indices = @transform_3, window_bounds = array<i64: 256, 128>}]} {
    %c0 = arith.constant 0 : index
    %c0_0 = arith.constant 0 : index
    %0 = vector.load %arg1[%c0, %c0_0] : memref<256x128xf32, #tpu.memory_space<vmem>>, vector<256x128xf32>
    %c0_1 = arith.constant 0 : index
    %c0_2 = arith.constant 0 : index
    %1 = vector.load %arg2[%c0_1, %c0_2] : memref<1x128xf32, #tpu.memory_space<vmem>>, vector<1x128xf32>
    %2 = vector.broadcast %1 : vector<1x128xf32> to vector<256x128xf32>
    %3 = arith.mulf %0, %2 : vector<256x128xf32>
    %c0_3 = arith.constant 0 : index
    %c0_4 = arith.constant 0 : index
    %4 = vector.load %arg3[%c0_3, %c0_4] : memref<1x128xf32, #tpu.memory_space<vmem>>, vector<1x128xf32>
    %5 = vector.broadcast %4 : vector<1x128xf32> to vector<256x128xf32>
    %6 = arith.addf %3, %5 : vector<256x128xf32>
    %cst = arith.constant 0.000000e+00 : f32
    %7 = vector.broadcast %cst : f32 to vector<256x128xf32>
    %8 = arith.cmpf ogt, %6, %7 : vector<256x128xf32>
    %cst_5 = arith.constant 2.000000e-01 : f32
    %9 = vector.broadcast %cst_5 : f32 to vector<256x128xf32>
    %10 = arith.mulf %9, %6 : vector<256x128xf32>
    %11 = arith.select %8, %6, %10 : vector<256x128xi1>, vector<256x128xf32>
    %12 = arith.truncf %11 : vector<256x128xf32> to vector<256x128xbf16>
    %c0_6 = arith.constant 0 : index
    %c0_7 = arith.constant 0 : index
    %13 = vector.load %arg4[%c0_6, %c0_7] : memref<256x128xbf16, #tpu.memory_space<vmem>>, vector<256x128xbf16>
    tpu.vector_store %arg4[%c0_6, %c0_7], %12 {strides = array<i32>} : memref<256x128xbf16, #tpu.memory_space<vmem>>, vector<256x128xbf16>,
    return
  }
  func.func @transform_0(%arg0: i32) -> (i32, i32) {
    %c0_i32 = arith.constant 0 : i32
    %c0_i32_0 = arith.constant 0 : i32
    return %arg0, %c0_i32 : i32, i32
  }
  func.func @transform_1(%arg0: i32) -> (i32, i32) {
    %c0_i32 = arith.constant 0 : i32
    %c0_i32_0 = arith.constant 0 : i32
    %c0_i32_1 = arith.constant 0 : i32
    return %c0_i32, %c0_i32_0 : i32, i32
  }
  func.func @transform_2(%arg0: i32) -> (i32, i32) {
    %c0_i32 = arith.constant 0 : i32
    %c0_i32_0 = arith.constant 0 : i32
    %c0_i32_1 = arith.constant 0 : i32
    return %c0_i32, %c0_i32_0 : i32, i32
  }
  func.func @transform_3(%arg0: i32) -> (i32, i32) {
    %c0_i32 = arith.constant 0 : i32
    %c0_i32_0 = arith.constant 0 : i32
    return %arg0, %c0_i32 : i32, i32
  }
}

module attributes {stable_mosaic.version = 11 : i64} {
  func.func @_gemm_bn_stats_kernel(%arg0: i32, %arg1: i32, %arg2: memref<128x512xbf16, #tpu.memory_space<vmem>>, %arg3: memref<512x128xbf16, #tpu.memory_space<vmem>>, %arg4: memref<128x128xf32, #tpu.memory_space<vmem>>, %arg5: memref<1x2x128xf32, #tpu.memory_space<vmem>>) attributes {dimension_semantics = [#tpu.dimension_semantics<parallel>, #tpu.dimension_semantics<arbitrary>], iteration_bounds = array<i64: 1, 4>, scalar_prefetch = 0 : i64, scratch_operands = 0 : i64, tpu.core_type = #tpu.core_type<tc>, window_params = [{transform_indices = @transform_0, window_bounds = array<i64: 128, 512>}, {transform_indices = @transform_1, window_bounds = array<i64: 512, 128>}, {transform_indices = @transform_2, window_bounds = array<i64: 128, 128>}, {transform_indices = @transform_3, window_bounds = array<i64: 1, 2, 128>}]} {
    %c0_i32 = arith.constant 0 : i32
    %0 = arith.cmpi eq, %arg1, %c0_i32 : i32
    %1 = arith.extui %0 : i1 to i32
    %c0_i32_0 = arith.constant 0 : i32
    %2 = arith.cmpi ne, %1, %c0_i32_0 : i32
    scf.if %2 {
      %cst_9 = arith.constant 0.000000e+00 : f32
      %12 = vector.broadcast %cst_9 : f32 to vector<128x128xf32>
      %c0_10 = arith.constant 0 : index
      %c0_11 = arith.constant 0 : index
      %13 = vector.load %arg4[%c0_10, %c0_11] : memref<128x128xf32, #tpu.memory_space<vmem>>, vector<128x128xf32>
      tpu.vector_store %arg4[%c0_10, %c0_11], %12 {strides = array<i32>} : memref<128x128xf32, #tpu.memory_space<vmem>>, vector<128x128xf32>,
    } else {
    }
    %c0 = arith.constant 0 : index
    %c0_1 = arith.constant 0 : index
    %3 = vector.load %arg4[%c0, %c0_1] : memref<128x128xf32, #tpu.memory_space<vmem>>, vector<128x128xf32>
    %c0_2 = arith.constant 0 : index
    %c0_3 = arith.constant 0 : index
    %4 = vector.load %arg2[%c0_2, %c0_3] : memref<128x512xbf16, #tpu.memory_space<vmem>>, vector<128x512xbf16>
    %c0_4 = arith.constant 0 : index
    %c0_5 = arith.constant 0 : index
    %5 = vector.load %arg3[%c0_4, %c0_5] : memref<512x128xbf16, #tpu.memory_space<vmem>>, vector<512x128xbf16>
    %cst = arith.constant dense<0.000000e+00> : vector<128x128xf32>
    %6 = tpu.matmul %4, %5, %cst {dimension_numbers = #tpu.dot_dimension_numbers<[1], [0], [0], [1], [0, 0, 1, 1], [], []>} : vector<128x512xbf16>, vector<512x128xbf16>, vector<128x128xf32> -> vector<128x128xf32>
    %7 = arith.addf %3, %6 : vector<128x128xf32>
    %c0_6 = arith.constant 0 : index
    %c0_7 = arith.constant 0 : index
    %8 = vector.load %arg4[%c0_6, %c0_7] : memref<128x128xf32, #tpu.memory_space<vmem>>, vector<128x128xf32>
    tpu.vector_store %arg4[%c0_6, %c0_7], %7 {strides = array<i32>} : memref<128x128xf32, #tpu.memory_space<vmem>>, vector<128x128xf32>,
    %c3_i32 = arith.constant 3 : i32
    %9 = arith.cmpi eq, %arg1, %c3_i32 : i32
    %10 = arith.extui %9 : i1 to i32
    %c0_i32_8 = arith.constant 0 : i32
    %11 = arith.cmpi ne, %10, %c0_i32_8 : i32
    scf.if %11 {
      %c0_9 = arith.constant 0 : index
      %c0_10 = arith.constant 0 : index
      %12 = vector.load %arg4[%c0_9, %c0_10] : memref<128x128xf32, #tpu.memory_space<vmem>>, vector<128x128xf32>
      %cst_11 = arith.constant dense<0.000000e+00> : vector<128xf32>
      %13 = vector.multi_reduction <add>, %12, %cst_11 [0] : vector<128x128xf32> to vector<128xf32>
      %14 = vector.shape_cast %13 : vector<128xf32> to vector<1x128xf32>
      %15 = arith.mulf %12, %12 : vector<128x128xf32>
      %cst_12 = arith.constant dense<0.000000e+00> : vector<128xf32>
      %16 = vector.multi_reduction <add>, %15, %cst_12 [0] : vector<128x128xf32> to vector<128xf32>
      %17 = vector.shape_cast %16 : vector<128xf32> to vector<1x128xf32>
      %18 = tpu.concatenate %14, %17 in 0 : vector<1x128xf32>, vector<1x128xf32> -> vector<2x128xf32>
      %19 = vector.shape_cast %18 : vector<2x128xf32> to vector<1x2x128xf32>
      %c0_13 = arith.constant 0 : index
      %c0_14 = arith.constant 0 : index
      %c0_15 = arith.constant 0 : index
      %20 = vector.load %arg5[%c0_13, %c0_14, %c0_15] : memref<1x2x128xf32, #tpu.memory_space<vmem>>, vector<1x2x128xf32>
      tpu.vector_store %arg5[%c0_13, %c0_14, %c0_15], %19 {strides = array<i32>} : memref<1x2x128xf32, #tpu.memory_space<vmem>>, vector<1x2x128xf32>,
    } else {
    }
    return
  }
  func.func @transform_0(%arg0: i32, %arg1: i32) -> (i32, i32) {
    %c0_i32 = arith.constant 0 : i32
    return %arg0, %arg1 : i32, i32
  }
  func.func @transform_1(%arg0: i32, %arg1: i32) -> (i32, i32) {
    %c0_i32 = arith.constant 0 : i32
    %c0_i32_0 = arith.constant 0 : i32
    return %arg1, %c0_i32 : i32, i32
  }
  func.func @transform_2(%arg0: i32, %arg1: i32) -> (i32, i32) {
    %c0_i32 = arith.constant 0 : i32
    %c0_i32_0 = arith.constant 0 : i32
    return %arg0, %c0_i32 : i32, i32
  }
  func.func @transform_3(%arg0: i32, %arg1: i32) -> (i32, i32, i32) {
    %c0_i32 = arith.constant 0 : i32
    %c0_i32_0 = arith.constant 0 : i32
    %c0_i32_1 = arith.constant 0 : i32
    return %arg0, %c0_i32, %c0_i32_0 : i32, i32, i32
  }
}

module attributes {stable_mosaic.version = 11 : i64} {
  func.func @_bn_act_kernel(%arg0: i32, %arg1: memref<128x128xf32, #tpu.memory_space<vmem>>, %arg2: memref<1x128xf32, #tpu.memory_space<vmem>>, %arg3: memref<1x128xf32, #tpu.memory_space<vmem>>, %arg4: memref<128x128xbf16, #tpu.memory_space<vmem>>) attributes {dimension_semantics = [#tpu.dimension_semantics<parallel>], iteration_bounds = array<i64: 1>, scalar_prefetch = 0 : i64, scratch_operands = 0 : i64, tpu.core_type = #tpu.core_type<tc>, window_params = [{transform_indices = @transform_0, window_bounds = array<i64: 128, 128>}, {pipeline_mode = #tpu.pipeline_mode<synchronous>, transform_indices = @transform_1, window_bounds = array<i64: 1, 128>}, {pipeline_mode = #tpu.pipeline_mode<synchronous>, transform_indices = @transform_2, window_bounds = array<i64: 1, 128>}, {transform_indices = @transform_3, window_bounds = array<i64: 128, 128>}]} {
    %c0 = arith.constant 0 : index
    %c0_0 = arith.constant 0 : index
    %0 = vector.load %arg1[%c0, %c0_0] : memref<128x128xf32, #tpu.memory_space<vmem>>, vector<128x128xf32>
    %c0_1 = arith.constant 0 : index
    %c0_2 = arith.constant 0 : index
    %1 = vector.load %arg2[%c0_1, %c0_2] : memref<1x128xf32, #tpu.memory_space<vmem>>, vector<1x128xf32>
    %2 = vector.broadcast %1 : vector<1x128xf32> to vector<128x128xf32>
    %3 = arith.mulf %0, %2 : vector<128x128xf32>
    %c0_3 = arith.constant 0 : index
    %c0_4 = arith.constant 0 : index
    %4 = vector.load %arg3[%c0_3, %c0_4] : memref<1x128xf32, #tpu.memory_space<vmem>>, vector<1x128xf32>
    %5 = vector.broadcast %4 : vector<1x128xf32> to vector<128x128xf32>
    %6 = arith.addf %3, %5 : vector<128x128xf32>
    %cst = arith.constant 0.000000e+00 : f32
    %7 = vector.broadcast %cst : f32 to vector<128x128xf32>
    %8 = arith.cmpf ogt, %6, %7 : vector<128x128xf32>
    %cst_5 = arith.constant 2.000000e-01 : f32
    %9 = vector.broadcast %cst_5 : f32 to vector<128x128xf32>
    %10 = arith.mulf %9, %6 : vector<128x128xf32>
    %11 = arith.select %8, %6, %10 : vector<128x128xi1>, vector<128x128xf32>
    %12 = arith.truncf %11 : vector<128x128xf32> to vector<128x128xbf16>
    %c0_6 = arith.constant 0 : index
    %c0_7 = arith.constant 0 : index
    %13 = vector.load %arg4[%c0_6, %c0_7] : memref<128x128xbf16, #tpu.memory_space<vmem>>, vector<128x128xbf16>
    tpu.vector_store %arg4[%c0_6, %c0_7], %12 {strides = array<i32>} : memref<128x128xbf16, #tpu.memory_space<vmem>>, vector<128x128xbf16>,
    return
  }
  func.func @transform_0(%arg0: i32) -> (i32, i32) {
    %c0_i32 = arith.constant 0 : i32
    %c0_i32_0 = arith.constant 0 : i32
    return %arg0, %c0_i32 : i32, i32
  }
  func.func @transform_1(%arg0: i32) -> (i32, i32) {
    %c0_i32 = arith.constant 0 : i32
    %c0_i32_0 = arith.constant 0 : i32
    %c0_i32_1 = arith.constant 0 : i32
    return %c0_i32, %c0_i32_0 : i32, i32
  }
  func.func @transform_2(%arg0: i32) -> (i32, i32) {
    %c0_i32 = arith.constant 0 : i32
    %c0_i32_0 = arith.constant 0 : i32
    %c0_i32_1 = arith.constant 0 : i32
    return %c0_i32, %c0_i32_0 : i32, i32
  }
  func.func @transform_3(%arg0: i32) -> (i32, i32) {
    %c0_i32 = arith.constant 0 : i32
    %c0_i32_0 = arith.constant 0 : i32
    return %arg0, %c0_i32 : i32, i32
  }
}

module attributes {stable_mosaic.version = 11 : i64} {
  func.func @_gemm_bn_stats_kernel(%arg0: i32, %arg1: i32, %arg2: memref<32x512xbf16, #tpu.memory_space<vmem>>, %arg3: memref<512x128xbf16, #tpu.memory_space<vmem>>, %arg4: memref<32x128xf32, #tpu.memory_space<vmem>>, %arg5: memref<1x2x128xf32, #tpu.memory_space<vmem>>) attributes {dimension_semantics = [#tpu.dimension_semantics<parallel>, #tpu.dimension_semantics<arbitrary>], iteration_bounds = array<i64: 1, 4>, scalar_prefetch = 0 : i64, scratch_operands = 0 : i64, tpu.core_type = #tpu.core_type<tc>, window_params = [{transform_indices = @transform_0, window_bounds = array<i64: 32, 512>}, {transform_indices = @transform_1, window_bounds = array<i64: 512, 128>}, {transform_indices = @transform_2, window_bounds = array<i64: 32, 128>}, {transform_indices = @transform_3, window_bounds = array<i64: 1, 2, 128>}]} {
    %c0_i32 = arith.constant 0 : i32
    %0 = arith.cmpi eq, %arg1, %c0_i32 : i32
    %1 = arith.extui %0 : i1 to i32
    %c0_i32_0 = arith.constant 0 : i32
    %2 = arith.cmpi ne, %1, %c0_i32_0 : i32
    scf.if %2 {
      %cst_9 = arith.constant 0.000000e+00 : f32
      %12 = vector.broadcast %cst_9 : f32 to vector<32x128xf32>
      %c0_10 = arith.constant 0 : index
      %c0_11 = arith.constant 0 : index
      %13 = vector.load %arg4[%c0_10, %c0_11] : memref<32x128xf32, #tpu.memory_space<vmem>>, vector<32x128xf32>
      tpu.vector_store %arg4[%c0_10, %c0_11], %12 {strides = array<i32>} : memref<32x128xf32, #tpu.memory_space<vmem>>, vector<32x128xf32>,
    } else {
    }
    %c0 = arith.constant 0 : index
    %c0_1 = arith.constant 0 : index
    %3 = vector.load %arg4[%c0, %c0_1] : memref<32x128xf32, #tpu.memory_space<vmem>>, vector<32x128xf32>
    %c0_2 = arith.constant 0 : index
    %c0_3 = arith.constant 0 : index
    %4 = vector.load %arg2[%c0_2, %c0_3] : memref<32x512xbf16, #tpu.memory_space<vmem>>, vector<32x512xbf16>
    %c0_4 = arith.constant 0 : index
    %c0_5 = arith.constant 0 : index
    %5 = vector.load %arg3[%c0_4, %c0_5] : memref<512x128xbf16, #tpu.memory_space<vmem>>, vector<512x128xbf16>
    %cst = arith.constant dense<0.000000e+00> : vector<32x128xf32>
    %6 = tpu.matmul %4, %5, %cst {dimension_numbers = #tpu.dot_dimension_numbers<[1], [0], [0], [1], [0, 0, 1, 1], [], []>} : vector<32x512xbf16>, vector<512x128xbf16>, vector<32x128xf32> -> vector<32x128xf32>
    %7 = arith.addf %3, %6 : vector<32x128xf32>
    %c0_6 = arith.constant 0 : index
    %c0_7 = arith.constant 0 : index
    %8 = vector.load %arg4[%c0_6, %c0_7] : memref<32x128xf32, #tpu.memory_space<vmem>>, vector<32x128xf32>
    tpu.vector_store %arg4[%c0_6, %c0_7], %7 {strides = array<i32>} : memref<32x128xf32, #tpu.memory_space<vmem>>, vector<32x128xf32>,
    %c3_i32 = arith.constant 3 : i32
    %9 = arith.cmpi eq, %arg1, %c3_i32 : i32
    %10 = arith.extui %9 : i1 to i32
    %c0_i32_8 = arith.constant 0 : i32
    %11 = arith.cmpi ne, %10, %c0_i32_8 : i32
    scf.if %11 {
      %c0_9 = arith.constant 0 : index
      %c0_10 = arith.constant 0 : index
      %12 = vector.load %arg4[%c0_9, %c0_10] : memref<32x128xf32, #tpu.memory_space<vmem>>, vector<32x128xf32>
      %cst_11 = arith.constant dense<0.000000e+00> : vector<128xf32>
      %13 = vector.multi_reduction <add>, %12, %cst_11 [0] : vector<32x128xf32> to vector<128xf32>
      %14 = vector.shape_cast %13 : vector<128xf32> to vector<1x128xf32>
      %15 = arith.mulf %12, %12 : vector<32x128xf32>
      %cst_12 = arith.constant dense<0.000000e+00> : vector<128xf32>
      %16 = vector.multi_reduction <add>, %15, %cst_12 [0] : vector<32x128xf32> to vector<128xf32>
      %17 = vector.shape_cast %16 : vector<128xf32> to vector<1x128xf32>
      %18 = tpu.concatenate %14, %17 in 0 : vector<1x128xf32>, vector<1x128xf32> -> vector<2x128xf32>
      %19 = vector.shape_cast %18 : vector<2x128xf32> to vector<1x2x128xf32>
      %c0_13 = arith.constant 0 : index
      %c0_14 = arith.constant 0 : index
      %c0_15 = arith.constant 0 : index
      %20 = vector.load %arg5[%c0_13, %c0_14, %c0_15] : memref<1x2x128xf32, #tpu.memory_space<vmem>>, vector<1x2x128xf32>
      tpu.vector_store %arg5[%c0_13, %c0_14, %c0_15], %19 {strides = array<i32>} : memref<1x2x128xf32, #tpu.memory_space<vmem>>, vector<1x2x128xf32>,
    } else {
    }
    return
  }
  func.func @transform_0(%arg0: i32, %arg1: i32) -> (i32, i32) {
    %c0_i32 = arith.constant 0 : i32
    return %arg0, %arg1 : i32, i32
  }
  func.func @transform_1(%arg0: i32, %arg1: i32) -> (i32, i32) {
    %c0_i32 = arith.constant 0 : i32
    %c0_i32_0 = arith.constant 0 : i32
    return %arg1, %c0_i32 : i32, i32
  }
  func.func @transform_2(%arg0: i32, %arg1: i32) -> (i32, i32) {
    %c0_i32 = arith.constant 0 : i32
    %c0_i32_0 = arith.constant 0 : i32
    return %arg0, %c0_i32 : i32, i32
  }
  func.func @transform_3(%arg0: i32, %arg1: i32) -> (i32, i32, i32) {
    %c0_i32 = arith.constant 0 : i32
    %c0_i32_0 = arith.constant 0 : i32
    %c0_i32_1 = arith.constant 0 : i32
    return %arg0, %c0_i32, %c0_i32_0 : i32, i32, i32
  }
}

module attributes {stable_mosaic.version = 11 : i64} {
  func.func @_bn_act_kernel(%arg0: i32, %arg1: memref<32x128xf32, #tpu.memory_space<vmem>>, %arg2: memref<1x128xf32, #tpu.memory_space<vmem>>, %arg3: memref<1x128xf32, #tpu.memory_space<vmem>>, %arg4: memref<32x128xbf16, #tpu.memory_space<vmem>>) attributes {dimension_semantics = [#tpu.dimension_semantics<parallel>], iteration_bounds = array<i64: 1>, scalar_prefetch = 0 : i64, scratch_operands = 0 : i64, tpu.core_type = #tpu.core_type<tc>, window_params = [{transform_indices = @transform_0, window_bounds = array<i64: 32, 128>}, {pipeline_mode = #tpu.pipeline_mode<synchronous>, transform_indices = @transform_1, window_bounds = array<i64: 1, 128>}, {pipeline_mode = #tpu.pipeline_mode<synchronous>, transform_indices = @transform_2, window_bounds = array<i64: 1, 128>}, {transform_indices = @transform_3, window_bounds = array<i64: 32, 128>}]} {
    %c0 = arith.constant 0 : index
    %c0_0 = arith.constant 0 : index
    %0 = vector.load %arg1[%c0, %c0_0] : memref<32x128xf32, #tpu.memory_space<vmem>>, vector<32x128xf32>
    %c0_1 = arith.constant 0 : index
    %c0_2 = arith.constant 0 : index
    %1 = vector.load %arg2[%c0_1, %c0_2] : memref<1x128xf32, #tpu.memory_space<vmem>>, vector<1x128xf32>
    %2 = vector.broadcast %1 : vector<1x128xf32> to vector<32x128xf32>
    %3 = arith.mulf %0, %2 : vector<32x128xf32>
    %c0_3 = arith.constant 0 : index
    %c0_4 = arith.constant 0 : index
    %4 = vector.load %arg3[%c0_3, %c0_4] : memref<1x128xf32, #tpu.memory_space<vmem>>, vector<1x128xf32>
    %5 = vector.broadcast %4 : vector<1x128xf32> to vector<32x128xf32>
    %6 = arith.addf %3, %5 : vector<32x128xf32>
    %cst = arith.constant 0.000000e+00 : f32
    %7 = vector.broadcast %cst : f32 to vector<32x128xf32>
    %8 = arith.cmpf ogt, %6, %7 : vector<32x128xf32>
    %cst_5 = arith.constant 2.000000e-01 : f32
    %9 = vector.broadcast %cst_5 : f32 to vector<32x128xf32>
    %10 = arith.mulf %9, %6 : vector<32x128xf32>
    %11 = arith.select %8, %6, %10 : vector<32x128xi1>, vector<32x128xf32>
    %12 = arith.truncf %11 : vector<32x128xf32> to vector<32x128xbf16>
    %c0_6 = arith.constant 0 : index
    %c0_7 = arith.constant 0 : index
    %13 = vector.load %arg4[%c0_6, %c0_7] : memref<32x128xbf16, #tpu.memory_space<vmem>>, vector<32x128xbf16>
    tpu.vector_store %arg4[%c0_6, %c0_7], %12 {strides = array<i32>} : memref<32x128xbf16, #tpu.memory_space<vmem>>, vector<32x128xbf16>,
    return
  }
  func.func @transform_0(%arg0: i32) -> (i32, i32) {
    %c0_i32 = arith.constant 0 : i32
    %c0_i32_0 = arith.constant 0 : i32
    return %arg0, %c0_i32 : i32, i32
  }
  func.func @transform_1(%arg0: i32) -> (i32, i32) {
    %c0_i32 = arith.constant 0 : i32
    %c0_i32_0 = arith.constant 0 : i32
    %c0_i32_1 = arith.constant 0 : i32
    return %c0_i32, %c0_i32_0 : i32, i32
  }
  func.func @transform_2(%arg0: i32) -> (i32, i32) {
    %c0_i32 = arith.constant 0 : i32
    %c0_i32_0 = arith.constant 0 : i32
    %c0_i32_1 = arith.constant 0 : i32
    return %c0_i32, %c0_i32_0 : i32, i32
  }
  func.func @transform_3(%arg0: i32) -> (i32, i32) {
    %c0_i32 = arith.constant 0 : i32
    %c0_i32_0 = arith.constant 0 : i32
    return %arg0, %c0_i32 : i32, i32
  }
}

module attributes {stable_mosaic.version = 11 : i64} {
  func.func @_gemm_act_kernel(%arg0: i32, %arg1: i32, %arg2: memref<8x512xbf16, #tpu.memory_space<vmem>>, %arg3: memref<512x128xbf16, #tpu.memory_space<vmem>>, %arg4: memref<8x128xf32, #tpu.memory_space<vmem>>, %arg5: memref<8x128xf32, #tpu.memory_space<vmem>>) attributes {dimension_semantics = [#tpu.dimension_semantics<parallel>, #tpu.dimension_semantics<arbitrary>], iteration_bounds = array<i64: 1, 4>, scalar_prefetch = 0 : i64, scratch_operands = 1 : i64, tpu.core_type = #tpu.core_type<tc>, window_params = [{transform_indices = @transform_0, window_bounds = array<i64: 8, 512>}, {transform_indices = @transform_1, window_bounds = array<i64: 512, 128>}, {transform_indices = @transform_2, window_bounds = array<i64: 8, 128>}]} {
    %c0_i32 = arith.constant 0 : i32
    %0 = arith.cmpi eq, %arg1, %c0_i32 : i32
    %1 = arith.extui %0 : i1 to i32
    %c0_i32_0 = arith.constant 0 : i32
    %2 = arith.cmpi ne, %1, %c0_i32_0 : i32
    scf.if %2 {
      %cst_9 = arith.constant 0.000000e+00 : f32
      %12 = vector.broadcast %cst_9 : f32 to vector<8x128xf32>
      %c0_10 = arith.constant 0 : index
      %c0_11 = arith.constant 0 : index
      %13 = vector.load %arg5[%c0_10, %c0_11] : memref<8x128xf32, #tpu.memory_space<vmem>>, vector<8x128xf32>
      tpu.vector_store %arg5[%c0_10, %c0_11], %12 {strides = array<i32>} : memref<8x128xf32, #tpu.memory_space<vmem>>, vector<8x128xf32>,
    } else {
    }
    %c0 = arith.constant 0 : index
    %c0_1 = arith.constant 0 : index
    %3 = vector.load %arg5[%c0, %c0_1] : memref<8x128xf32, #tpu.memory_space<vmem>>, vector<8x128xf32>
    %c0_2 = arith.constant 0 : index
    %c0_3 = arith.constant 0 : index
    %4 = vector.load %arg2[%c0_2, %c0_3] : memref<8x512xbf16, #tpu.memory_space<vmem>>, vector<8x512xbf16>
    %c0_4 = arith.constant 0 : index
    %c0_5 = arith.constant 0 : index
    %5 = vector.load %arg3[%c0_4, %c0_5] : memref<512x128xbf16, #tpu.memory_space<vmem>>, vector<512x128xbf16>
    %cst = arith.constant dense<0.000000e+00> : vector<8x128xf32>
    %6 = tpu.matmul %4, %5, %cst {dimension_numbers = #tpu.dot_dimension_numbers<[1], [0], [0], [1], [0, 0, 1, 1], [], []>} : vector<8x512xbf16>, vector<512x128xbf16>, vector<8x128xf32> -> vector<8x128xf32>
    %7 = arith.addf %3, %6 : vector<8x128xf32>
    %c0_6 = arith.constant 0 : index
    %c0_7 = arith.constant 0 : index
    %8 = vector.load %arg5[%c0_6, %c0_7] : memref<8x128xf32, #tpu.memory_space<vmem>>, vector<8x128xf32>
    tpu.vector_store %arg5[%c0_6, %c0_7], %7 {strides = array<i32>} : memref<8x128xf32, #tpu.memory_space<vmem>>, vector<8x128xf32>,
    %c3_i32 = arith.constant 3 : i32
    %9 = arith.cmpi eq, %arg1, %c3_i32 : i32
    %10 = arith.extui %9 : i1 to i32
    %c0_i32_8 = arith.constant 0 : i32
    %11 = arith.cmpi ne, %10, %c0_i32_8 : i32
    scf.if %11 {
      %c0_9 = arith.constant 0 : index
      %c0_10 = arith.constant 0 : index
      %12 = vector.load %arg5[%c0_9, %c0_10] : memref<8x128xf32, #tpu.memory_space<vmem>>, vector<8x128xf32>
      %cst_11 = arith.constant 0.000000e+00 : f32
      %13 = vector.broadcast %cst_11 : f32 to vector<8x128xf32>
      %14 = arith.subf %13, %12 : vector<8x128xf32>
      %15 = math.exp %14 : vector<8x128xf32>
      %cst_12 = arith.constant 1.000000e+00 : f32
      %16 = vector.broadcast %cst_12 : f32 to vector<8x128xf32>
      %17 = arith.addf %16, %15 : vector<8x128xf32>
      %18 = tpu.reciprocal %17 {approx = true} : vector<8x128xf32> -> vector<8x128xf32>
      %c0_13 = arith.constant 0 : index
      %c0_14 = arith.constant 0 : index
      %19 = vector.load %arg4[%c0_13, %c0_14] : memref<8x128xf32, #tpu.memory_space<vmem>>, vector<8x128xf32>
      tpu.vector_store %arg4[%c0_13, %c0_14], %18 {strides = array<i32>} : memref<8x128xf32, #tpu.memory_space<vmem>>, vector<8x128xf32>,
    } else {
    }
    return
  }
  func.func @transform_0(%arg0: i32, %arg1: i32) -> (i32, i32) {
    %c0_i32 = arith.constant 0 : i32
    return %arg0, %arg1 : i32, i32
  }
  func.func @transform_1(%arg0: i32, %arg1: i32) -> (i32, i32) {
    %c0_i32 = arith.constant 0 : i32
    %c0_i32_0 = arith.constant 0 : i32
    return %arg1, %c0_i32 : i32, i32
  }
  func.func @transform_2(%arg0: i32, %arg1: i32) -> (i32, i32) {
    %c0_i32 = arith.constant 0 : i32
    %c0_i32_0 = arith.constant 0 : i32
    return %arg0, %c0_i32 : i32, i32
  }
}

</mosaic_0001>

<bundles_post_ra>
// kernel: discriminator_forward.8
= control target key start
LH: loop header
LB: loop body
LE: loop exit
PB: predicated region body
PF: predicated region fallthrough
CT: control target
= control target key end

     0   :  { %s1422_s9 = smov 0   ;;  %s1424_s10 = smov 0   ;;  %s1525_s0 = inlined_call_operand.vmem [shape: bf16[2048,128], index: 0, kind: input, shape index: {}]   ;;  %s1526_s1 = inlined_call_operand.vmem [shape: bf16[128,128], index: 1, kind: input, shape index: {}]   ;;  %s1527_s2 = inlined_call_operand.vmem [shape: bf16[2048,128], index: 2, kind: output, shape index: {}]  }
   0x1   :  { %s1426_s11 = smov 0  }
   0x2 LB: > { %s24_s12 = sadd.s32 1, %s1401_s10  ;;  %p1057_p0 = scmp.ge.s32.totalorder %s1405_s11, 1  ;;  %s1405_s11 = sphi %s1426_s11, %s12_s11   ;;  %s1401_s10 = sphi %s1424_s10, %s1529_s10   ;;  %s1397_s9 = sphi %s1422_s9, %s1528_s9  }
   0x3   : > { %p26_p1 = scmp.ge.s32.totalorder %s24_s12, 8  ;;  %p141_p2 = scmp.lt.s32.totalorder %s1405_s11, 9 }
   0x5   : > { %s1531_s12 = smov (%p26_p1, %s24_s12), 0  ;;  %p142_p3 = pnand %p1057_p0, %p141_p2 }
   0x6   : > { %v1359_v0 = vld [vmem:[%s1526_s1] sm:$0xff] (!%p142_p3)   ;;  %s1058_s15 = sshll.u32 (!%p142_p3), %s1397_s9, 5  ;;  %v1360_v1 = vld [vmem:[%s1526_s1 + $0x8] sm:$0xff] (!%p142_p3)   ;;  %v1361_v2 = vld [vmem:[%s1526_s1 + $0x10] sm:$0xff] (!%p142_p3)  }
   0x7   : > { %145 = sbr.rel (%p142_p3) target bundleno = 286 (0x11e), region = 28  ;;  %p172_p4 = scmp.lt.s32.totalorder (!%p142_p3), %s1058_s15, 255  ;;  %1271 = vmatprep.subr.bf16.mxu0 (!%p142_p3), %v1359_v0  ;;  %1319 = vmatprep.subr.bf16.mxu1 (!%p142_p3), %v1359_v0  ;;  %v1362_v3 = vld [vmem:[%s1526_s1 + $0x18] sm:$0xff] (!%p142_p3)   ;;  %v1363_v6 = vld [vmem:[%s1526_s1 + $0x20] sm:$0xff] (!%p142_p3)   ;;  %v1364_v7 = vld [vmem:[%s1526_s1 + $0x28] sm:$0xff] (!%p142_p3)  }
   0x8   : > { %1272 = vmatpush3.bf16.msra.mxu0 (!%p142_p3), %v1359_v0  ;;  %1327 = vmatpush3.bf16.msra.mxu1 (!%p142_p3), %v1359_v0  ;;  %v1365_v8 = vld [vmem:[%s1526_s1 + $0x30] sm:$0xff] (!%p142_p3)   ;;  %v1366_v9 = vld [vmem:[%s1526_s1 + $0x38] sm:$0xff] (!%p142_p3)  }
   0x9   : > { %1273 = vmatprep.subr.bf16.mxu0 (!%p142_p3), %v1360_v1  ;;  %1320 = vmatprep.subr.bf16.mxu1 (!%p142_p3), %v1360_v1 }
   0xc   : > { %1274 = vmatpush3.bf16.msra.mxu0 (!%p142_p3), %v1360_v1  ;;  %1328 = vmatpush3.bf16.msra.mxu1 (!%p142_p3), %v1360_v1 }
   0xd   : > { %1275 = vmatprep.subr.bf16.mxu0 (!%p142_p3), %v1361_v2  ;;  %1321 = vmatprep.subr.bf16.mxu1 (!%p142_p3), %v1361_v2 }
   0xe   : > { %s1533_s15 = smov (!%p172_p4, %s1058_s15), 255 }
   0xf   : > { %s1059_s20 = sshll.u32 %s1533_s15, 2 }
  0x10   : > { %s1457_s23 = scalar_lea.vmem %s1525_s0, %s1059_s20  ;;  %1276 = vmatpush3.bf16.msra.mxu0 %v1361_v2  ;;  %1329 = vmatpush3.bf16.msra.mxu1 %v1361_v2  ;;  %s1495_s8 = scalar_lea.vmem %s1527_s2, %s1059_s20 }
  0x11   : > { %v1367_v4 = vld [vmem:[%s1457_s23] sm:$0xff]   ;;  %1277 = vmatprep.subr.bf16.mxu0 %v1362_v3  ;;  %1322 = vmatprep.subr.bf16.mxu1 %v1362_v3  ;;  %v1369_v10 = vld [vmem:[%s1457_s23 + $0x8] sm:$0xff]   ;;  %v1371_v12 = vld [vmem:[%s1457_s23 + $0x10] sm:$0xff]  }
  0x12   : > { %v1368_v5 = vld [vmem:[%s1457_s23 + $0x40] sm:$0xff]   ;;  %1287 = vmatprep.mubr.bf16.mxu0 %v1367_v4  ;;  %v1370_v11 = vld [vmem:[%s1457_s23 + $0x48] sm:$0xff]   ;;  %v1372_v13 = vld [vmem:[%s1457_s23 + $0x50] sm:$0xff]  }
  0x13   : > { %1303 = vmatprep.mubr.bf16.mxu1 %v1368_v5  ;;  %v1373_v14 = vld [vmem:[%s1457_s23 + $0x18] sm:$0xff]   ;;  %v1375_v16 = vld [vmem:[%s1457_s23 + $0x20] sm:$0xff]   ;;  %v1377_v18 = vld [vmem:[%s1457_s23 + $0x28] sm:$0xff]  }
  0x14   : > { %1278 = vmatpush3.bf16.msra.mxu0 %v1362_v3  ;;  %1330 = vmatpush3.bf16.msra.mxu1 %v1362_v3  ;;  %v1374_v15 = vld [vmem:[%s1457_s23 + $0x58] sm:$0xff]   ;;  %v1376_v17 = vld [vmem:[%s1457_s23 + $0x60] sm:$0xff]   ;;  %v1378_v19 = vld [vmem:[%s1457_s23 + $0x68] sm:$0xff]  }
  0x15   : > { %1279 = vmatprep.subr.bf16.mxu0 %v1363_v6  ;;  %1323 = vmatprep.subr.bf16.mxu1 %v1363_v6  ;;  %v1379_v20 = vld [vmem:[%s1457_s23 + $0x30] sm:$0xff]   ;;  %v1381_v22 = vld [vmem:[%s1457_s23 + $0x38] sm:$0xff]  }
  0x16   : > { %v1380_v21 = vld [vmem:[%s1457_s23 + $0x70] sm:$0xff]   ;;  %v1382_v23 = vld [vmem:[%s1457_s23 + $0x78] sm:$0xff]  }
  0x18   : > { %1280 = vmatpush3.bf16.msra.mxu0 %v1363_v6  ;;  %1331 = vmatpush3.bf16.msra.mxu1 %v1363_v6 }
  0x19   : > { %1281 = vmatprep.subr.bf16.mxu0 %v1364_v7  ;;  %1324 = vmatprep.subr.bf16.mxu1 %v1364_v7 }
  0x1c   : > { %1282 = vmatpush3.bf16.msra.mxu0 %v1364_v7  ;;  %1332 = vmatpush3.bf16.msra.mxu1 %v1364_v7 }
  0x1d   : > { %1283 = vmatprep.subr.bf16.mxu0 %v1365_v8  ;;  %1325 = vmatprep.subr.bf16.mxu1 %v1365_v8 }
  0x20   : > { %1284 = vmatpush3.bf16.msra.mxu0 %v1365_v8  ;;  %1333 = vmatpush3.bf16.msra.mxu1 %v1365_v8 }
  0x21   : > { %1285 = vmatprep.subr.bf16.mxu0 %v1366_v9  ;;  %1326 = vmatprep.subr.bf16.mxu1 %v1366_v9 }
  0x24   : > { %1286 = vmatpush3.bf16.msra.mxu0 %v1366_v9  ;;  %1334 = vmatpush3.bf16.msra.mxu1 %v1366_v9 }
  0x27   : > { %1288 = vmatmul.mubr.bf16.vlgmr.msra.gmra.mrb[0].mxu0 %v1369_v10  ;;  %1304 = vmatmul.mubr.bf16.vlgmr.msra.gmra.mrb[0].mxu1 %v1370_v11 }
  0x28   : > { %1291 = vmatprep.mubr.bf16.mxu0 %v1371_v12  ;;  %1307 = vmatprep.mubr.bf16.mxu1 %v1372_v13 }
  0x2f   : > { %1292 = vmatmul.mubr.bf16.gmra.mrb[4].mxu0 %v1373_v14  ;;  %1308 = vmatmul.mubr.bf16.gmra.mrb[4].mxu1 %v1374_v15 }
  0x30   : > { %1295 = vmatprep.mubr.bf16.mxu0 %v1375_v16  ;;  %1311 = vmatprep.mubr.bf16.mxu1 %v1376_v17 }
  0x37   : > { %1296 = vmatmul.mubr.bf16.gmra.mrb[8].mxu0 %v1377_v18  ;;  %1312 = vmatmul.mubr.bf16.gmra.mrb[8].mxu1 %v1378_v19 }
  0x38   : > { %1299 = vmatprep.mubr.bf16.mxu0 %v1379_v20  ;;  %1315 = vmatprep.mubr.bf16.mxu1 %v1380_v21 }
  0x3f   : > { %1300 = vmatmul.mubr.bf16.gmra.mrb[12].mxu0 %v1381_v22  ;;  %1316 = vmatmul.mubr.bf16.gmra.mrb[12].mxu1 %v1382_v23 }
  0xfa   : > { %v1289_v24 = vpop.f32.mrb[0].mxu0  ;;  %v1305_v25 = vpop.f32.mrb[0].mxu1 }
  0xfb   : > { %vm715_vm0 = vcmp.gt.f32.partialorder %v1289_v24, 0.0  ;;  %v747_v26 = vmul.f32 0.2, %v1289_v24  ;;  %v763_v27 = vmul.f32 0.2, %v1305_v25  ;;  %vm731_vm1 = vcmp.gt.f32.partialorder %v1305_v25, 0.0 }
  0xfc   : > { %v487_v28 = vpop.f32.mrb[1].mxu0  ;;  %v551_v29 = vpop.f32.mrb[1].mxu1 }
  0xfd   : > { %v745_v30 = vmul.f32 0.2, %v487_v28  ;;  %v1290_v31 = vpop.f32.mrb[2].mxu0  ;;  %v1306_v32 = vpop.f32.mrb[2].mxu1  ;;  %v779_v33 = vsel %vm715_vm0, %v1289_v24, %v747_v26  ;;  %v761_v34 = vmul.f32 0.2, %v551_v29  ;;  %v795_v36 = vsel %vm731_vm1, %v1305_v25, %v763_v27 }
  0xfe   : > { %vm716_vm2 = vcmp.gt.f32.partialorder %v1290_v31, 0.0  ;;  %v748_v35 = vmul.f32 0.2, %v1290_v31  ;;  %vm713_vm3 = vcmp.gt.f32.partialorder %v487_v28, 0.0  ;;  %vm732_vm4 = vcmp.gt.f32.partialorder %v1306_v32, 0.0  ;;  %v490_v38 = vpop.f32.mrb[3].mxu0 }
  0xff   : > { %v764_v37 = vmul.f32 0.2, %v1306_v32  ;;  %v554_v39 = vpop.f32.mrb[3].mxu1  ;;  %vm729_vm5 = vcmp.gt.f32.partialorder %v551_v29, 0.0  ;;  %vm714_vm6 = vcmp.gt.f32.partialorder %v490_v38, 0.0  ;;  %v777_v45 = vsel %vm713_vm3, %v487_v28, %v745_v30 }
 0x100   : > { %v780_v40 = vsel %vm716_vm2, %v1290_v31, %v748_v35  ;;  %v746_v41 = vmul.f32 0.2, %v490_v38  ;;  %vm730_vm7 = vcmp.gt.f32.partialorder %v554_v39, 0.0  ;;  %v762_v44 = vmul.f32 0.2, %v554_v39 }
 0x101   : > { %v1160_v42 = vpack.c.bf16 %v780_v40, %v779_v33  ;;  %v796_v43 = vsel %vm732_vm4, %v1306_v32, %v764_v37  ;;  %v793_v50 = vsel %vm729_vm5, %v551_v29, %v761_v34 }
 0x102   : > { %v1200_v46 = vpack.c.bf16 %v796_v43, %v795_v36  ;;  %v778_v47 = vsel %vm714_vm6, %v490_v38, %v746_v41  ;;  %v1293_v48 = vpop.f32.mrb[4].mxu0  ;;  %v1309_v49 = vpop.f32.mrb[4].mxu1  ;;  %v794_v52 = vsel %vm730_vm7, %v554_v39, %v762_v44 }
 0x103   : > { %1232 = vst [vmem:[%s1495_s8 + $0x8] sm:$0xff] %v1160_v42   ;;  %v1155_v51 = vpack.c.bf16 %v778_v47, %v777_v45  ;;  %v751_v53 = vmul.f32 0.2, %v1293_v48  ;;  %v503_v54 = vpop.f32.mrb[5].mxu0  ;;  %v567_v55 = vpop.f32.mrb[5].mxu1  ;;  %v1195_v56 = vpack.c.bf16 %v794_v52, %v793_v50  ;;  %vm719_vm8 = vcmp.gt.f32.partialorder %v1293_v48, 0.0 }
 0x104   : > { %1240 = vst [vmem:[%s1495_s8 + $0x48] sm:$0xff] %v1200_v46   ;;  %v767_v57 = vmul.f32 0.2, %v1309_v49  ;;  %v1294_v58 = vpop.f32.mrb[6].mxu0  ;;  %v1310_v59 = vpop.f32.mrb[6].mxu1  ;;  %vm735_vm9 = vcmp.gt.f32.partialorder %v1309_v49, 0.0 }
 0x105   : > { %1156 = vst [vmem:[%s1495_s8] sm:$0xff] %v1155_v51   ;;  %v749_v60 = vmul.f32 0.2, %v503_v54  ;;  %v765_v61 = vmul.f32 0.2, %v567_v55  ;;  %v506_v62 = vpop.f32.mrb[7].mxu0  ;;  %1239 = vst [vmem:[%s1495_s8 + $0x40] sm:$0xff] %v1195_v56   ;;  %v783_v1 = vsel %vm719_vm8, %v1293_v48, %v751_v53 }
 0x106   : > { %vm717_vm10 = vcmp.gt.f32.partialorder %v503_v54, 0.0  ;;  %vm720_vm11 = vcmp.gt.f32.partialorder %v1294_v58, 0.0  ;;  %v752_v63 = vmul.f32 0.2, %v1294_v58  ;;  %vm736_vm12 = vcmp.gt.f32.partialorder %v1310_v59, 0.0  ;;  %v570_v0 = vpop.f32.mrb[7].mxu1 }
 0x107   : > { %vm733_vm13 = vcmp.gt.f32.partialorder %v567_v55, 0.0  ;;  %v768_v2 = vmul.f32 0.2, %v1310_v59  ;;  %vm718_vm14 = vcmp.gt.f32.partialorder %v506_v62, 0.0  ;;  %v750_v4 = vmul.f32 0.2, %v506_v62 }
 0x108   : > { %v784_v3 = vsel %vm720_vm11, %v1294_v58, %v752_v63  ;;  %vm734_vm15 = vcmp.gt.f32.partialorder %v570_v0, 0.0  ;;  %v766_v5 = vmul.f32 0.2, %v570_v0  ;;  %v799_v6 = vsel %vm735_vm9, %v1309_v49, %v767_v57 }
 0x109   : > { %v781_v7 = vsel %vm717_vm10, %v503_v54, %v749_v60  ;;  %v1170_v8 = vpack.c.bf16 %v784_v3, %v783_v1  ;;  %v800_v9 = vsel %vm736_vm12, %v1310_v59, %v768_v2  ;;  %v797_v10 = vsel %vm733_vm13, %v567_v55, %v765_v61 }
 0x10a   : > { %v1210_v11 = vpack.c.bf16 %v800_v9, %v799_v6  ;;  %v782_v12 = vsel %vm718_vm14, %v506_v62, %v750_v4  ;;  %v798_v13 = vsel %vm734_vm15, %v570_v0, %v766_v5  ;;  %v1297_v14 = vpop.f32.mrb[8].mxu0  ;;  %v1313_v15 = vpop.f32.mrb[8].mxu1 }
 0x10b   : > { %1234 = vst [vmem:[%s1495_s8 + $0x18] sm:$0xff] %v1170_v8   ;;  %v1165_v16 = vpack.c.bf16 %v782_v12, %v781_v7  ;;  %v1205_v17 = vpack.c.bf16 %v798_v13, %v797_v10  ;;  %vm723_vm0 = vcmp.gt.f32.partialorder %v1297_v14, 0.0  ;;  %v755_v18 = vmul.f32 0.2, %v1297_v14  ;;  %v519_v19 = vpop.f32.mrb[9].mxu0  ;;  %v583_v20 = vpop.f32.mrb[9].mxu1 }
 0x10c   : > { %1242 = vst [vmem:[%s1495_s8 + $0x58] sm:$0xff] %v1210_v11   ;;  %vm739_vm1 = vcmp.gt.f32.partialorder %v1313_v15, 0.0  ;;  %v771_v21 = vmul.f32 0.2, %v1313_v15  ;;  %v753_v22 = vmul.f32 0.2, %v519_v19 }
 0x10d   : > { %1233 = vst [vmem:[%s1495_s8 + $0x10] sm:$0xff] %v1165_v16   ;;  %1241 = vst [vmem:[%s1495_s8 + $0x50] sm:$0xff] %v1205_v17   ;;  %v769_v23 = vmul.f32 0.2, %v583_v20  ;;  %v1298_v24 = vpop.f32.mrb[10].mxu0  ;;  %v1314_v25 = vpop.f32.mrb[10].mxu1  ;;  %v787_v26 = vsel %vm723_vm0, %v1297_v14, %v755_v18 }
 0x10e   : > { %vm721_vm2 = vcmp.gt.f32.partialorder %v519_v19, 0.0  ;;  %vm724_vm3 = vcmp.gt.f32.partialorder %v1298_v24, 0.0  ;;  %v756_v27 = vmul.f32 0.2, %v1298_v24  ;;  %v522_v28 = vpop.f32.mrb[11].mxu0  ;;  %v586_v29 = vpop.f32.mrb[11].mxu1  ;;  %v803_v34 = vsel %vm739_vm1, %v1313_v15, %v771_v21 }
 0x10f   : > { %vm737_vm4 = vcmp.gt.f32.partialorder %v583_v20, 0.0  ;;  %vm740_vm5 = vcmp.gt.f32.partialorder %v1314_v25, 0.0  ;;  %v772_v30 = vmul.f32 0.2, %v1314_v25  ;;  %vm722_vm6 = vcmp.gt.f32.partialorder %v522_v28, 0.0 }
 0x110   : > { %v788_v31 = vsel %vm724_vm3, %v1298_v24, %v756_v27  ;;  %v754_v32 = vmul.f32 0.2, %v522_v28  ;;  %vm738_vm7 = vcmp.gt.f32.partialorder %v586_v29, 0.0  ;;  %v770_v33 = vmul.f32 0.2, %v586_v29 }
 0x111   : > { %v785_v35 = vsel %vm721_vm2, %v519_v19, %v753_v22  ;;  %v1180_v36 = vpack.c.bf16 %v788_v31, %v787_v26  ;;  %v804_v37 = vsel %vm740_vm5, %v1314_v25, %v772_v30  ;;  %v801_v38 = vsel %vm737_vm4, %v583_v20, %v769_v23 }
 0x112   : > { %v1220_v39 = vpack.c.bf16 %v804_v37, %v803_v34  ;;  %v786_v40 = vsel %vm722_vm6, %v522_v28, %v754_v32  ;;  %v802_v41 = vsel %vm738_vm7, %v586_v29, %v770_v33  ;;  %v1301_v42 = vpop.f32.mrb[12].mxu0  ;;  %v1317_v43 = vpop.f32.mrb[12].mxu1 }
 0x113   : > { %1236 = vst [vmem:[%s1495_s8 + $0x28] sm:$0xff] %v1180_v36   ;;  %v1175_v44 = vpack.c.bf16 %v786_v40, %v785_v35  ;;  %v1215_v45 = vpack.c.bf16 %v802_v41, %v801_v38  ;;  %vm727_vm8 = vcmp.gt.f32.partialorder %v1301_v42, 0.0  ;;  %v759_v46 = vmul.f32 0.2, %v1301_v42  ;;  %v535_v47 = vpop.f32.mrb[13].mxu0  ;;  %v599_v48 = vpop.f32.mrb[13].mxu1 }
 0x114   : > { %1244 = vst [vmem:[%s1495_s8 + $0x68] sm:$0xff] %v1220_v39   ;;  %vm743_vm9 = vcmp.gt.f32.partialorder %v1317_v43, 0.0  ;;  %v775_v49 = vmul.f32 0.2, %v1317_v43  ;;  %v757_v50 = vmul.f32 0.2, %v535_v47 }
 0x115   : > { %1235 = vst [vmem:[%s1495_s8 + $0x20] sm:$0xff] %v1175_v44   ;;  %1243 = vst [vmem:[%s1495_s8 + $0x60] sm:$0xff] %v1215_v45   ;;  %v773_v51 = vmul.f32 0.2, %v599_v48  ;;  %v1302_v52 = vpop.f32.mrb[14].mxu0  ;;  %v1318_v53 = vpop.f32.mrb[14].mxu1  ;;  %v791_v54 = vsel %vm727_vm8, %v1301_v42, %v759_v46 }
 0x116   : > { %vm725_vm10 = vcmp.gt.f32.partialorder %v535_v47, 0.0  ;;  %vm728_vm11 = vcmp.gt.f32.partialorder %v1302_v52, 0.0  ;;  %v760_v55 = vmul.f32 0.2, %v1302_v52  ;;  %v538_v56 = vpop.f32.mrb[15].mxu0  ;;  %v602_v57 = vpop.f32.mrb[15].mxu1  ;;  %v807_v62 = vsel %vm743_vm9, %v1317_v43, %v775_v49 }
 0x117   : > { %vm741_vm12 = vcmp.gt.f32.partialorder %v599_v48, 0.0  ;;  %vm744_vm13 = vcmp.gt.f32.partialorder %v1318_v53, 0.0  ;;  %v776_v58 = vmul.f32 0.2, %v1318_v53  ;;  %vm726_vm14 = vcmp.gt.f32.partialorder %v538_v56, 0.0 }
 0x118   : > { %v792_v59 = vsel %vm728_vm11, %v1302_v52, %v760_v55  ;;  %v758_v60 = vmul.f32 0.2, %v538_v56  ;;  %vm742_vm15 = vcmp.gt.f32.partialorder %v602_v57, 0.0  ;;  %v774_v61 = vmul.f32 0.2, %v602_v57 }
 0x119   : > { %v789_v63 = vsel %vm725_vm10, %v535_v47, %v757_v50  ;;  %v1190_v0 = vpack.c.bf16 %v792_v59, %v791_v54  ;;  %v808_v1 = vsel %vm744_vm13, %v1318_v53, %v776_v58  ;;  %v805_v2 = vsel %vm741_vm12, %v599_v48, %v773_v51 }
 0x11a   : > { %v1230_v3 = vpack.c.bf16 %v808_v1, %v807_v62  ;;  %v790_v4 = vsel %vm726_vm14, %v538_v56, %v758_v60  ;;  %v806_v5 = vsel %vm742_vm15, %v602_v57, %v774_v61 }
 0x11b   : > { %1238 = vst [vmem:[%s1495_s8 + $0x38] sm:$0xff] %v1190_v0   ;;  %v1185_v6 = vpack.c.bf16 %v790_v4, %v789_v63  ;;  %v1225_v7 = vpack.c.bf16 %v806_v5, %v805_v2 }
 0x11c   : > { %1246 = vst [vmem:[%s1495_s8 + $0x78] sm:$0xff] %v1230_v3  }
 0x11d   : > { %1237 = vst [vmem:[%s1495_s8 + $0x30] sm:$0xff] %v1185_v6   ;;  %1245 = vst [vmem:[%s1495_s8 + $0x70] sm:$0xff] %v1225_v7  }
 0x11e PF: > { %s12_s11 = sadd.s32 1, %s1405_s11   ;;  %s1528_s9 = smov %s1401_s10 }
 0x11f   : > { %p9_p5 = scmp.ge.s32.totalorder %s12_s11, 10   ;;  %s1529_s10 = smov %s1531_s12 }
 0x121   :  { %11 = sbr.rel (!%p9_p5) target bundleno = 2 (0x2), region = 69 }

// kernel: discriminator_forward.9
= control target key start
LH: loop header
LB: loop body
LE: loop exit
PB: predicated region body
PF: predicated region fallthrough
CT: control target
= control target key end

     0   :  { %s2333_s12 = smov 0   ;;  %s2335_s13 = smov 0   ;;  %s2797_s0 = inlined_call_operand.vmem [shape: bf16[512,2048], index: 0, kind: input, shape index: {}]   ;;  %s2798_s1 = inlined_call_operand.vmem [shape: bf16[2048,128], index: 1, kind: input, shape index: {}]   ;;  %s2799_s2 = inlined_call_operand.vmem [shape: f32[512,128], index: 2, kind: output, shape index: {0}]   ;;  %s2800_s3 = inlined_call_operand.vmem [shape: f32[2,2,128], index: 3, kind: output, shape index: {1}]  }
   0x1   :  { %s2337_s14 = smov 0   ;;  %s2339_s15 = smov 0  }
   0x2   :  { %s2341_s16 = smov 0   ;;  %s2343_s17 = smov 0  }
   0x3   :  { %s2345_s18 = smov 0  }
   0x4 LB: > { %s23_s19 = sadd.s32 1, %s2302_s16  ;;  %s26_s20 = sadd.s32 1, %s2306_s17  ;;  %s2310_s18 = sphi %s2345_s18, %s14_s18   ;;  %s2306_s17 = sphi %s2343_s17, %s2806_s17   ;;  %s2302_s16 = sphi %s2341_s16, %s2805_s16   ;;  %s2298_s15 = sphi %s2339_s15, %s2804_s15   ;;  %s2294_s14 = sphi %s2337_s14, %s2803_s14   ;;  %s2290_s13 = sphi %s2335_s13, %s2802_s13   ;;  %s2286_s12 = sphi %s2333_s12, %s2801_s12  }
   0x5   : > { %p24_p0 = scmp.ge.s32.totalorder %s23_s19, 4  ;;  %p42_p1 = scmp.ne.s32.totalorder %s2290_s13, %s2286_s12 }
   0x6   : > { %p43_p2 = scmp.eq.s32.totalorder %s2310_s18, 0  ;;  %s35_s24 = sadd.s32 1, %s2290_s13 }
   0x7   : > { %s2808_s19 = smov (%p24_p0, %s23_s19), 0  ;;  %s2810_s20 = smov (!%p24_p0, %s26_s20), %s2306_s17 }
   0x8   : > { %p44_p3 = por %p43_p2, %p42_p1  ;;  %p28_p4 = scmp.ge.s32.totalorder %s2810_s20, 2 }
   0x9   : > { %s31_s21 = ssub.s32 %s2302_s16, %s2808_s19  ;;  %p1733_p6 = scmp.ge.s32.totalorder %s2310_s18, 8 }
   0xa   : > { %s2812_s20 = smov (%p28_p4, %s2810_s20), 0 }
   0xb   : > { %s30_s22 = ssub.s32 %s2306_s17, %s2812_s20  ;;  %146 = sbr.rel (%p1733_p6) target bundleno = 57 (0x39), region = 16 }
   0xc   : > { %s32_s23 = sor.u32 %s31_s21, %s30_s22 }
   0xd   : > { %p33_p5 = scmp.eq.s32.totalorder %s32_s23, 0 }
   0xf   : > { %s2384_s25 = scalar_select %p33_p5, %s2290_s13, %s35_s24  }
  0x12   : > { %149 = sbr.rel (!%p44_p3) target bundleno = 57 (0x39), region = 20  ;;  %s151_s26 = sand.u32 (%p44_p3), 1, %s2290_s13  }
  0x13   : > { %s1736_s27 = sshll.u32 (%p44_p3), %s2302_s16, 2  ;;  %s1734_s28 = sshll.u32 (%p44_p3), %s151_s26, 9 }
  0x14   : > { %s1846_s29 = sshll.u32 (%p44_p3), %s2306_s17, 9  ;;  %s2398_s8 = scalar_lea.vmem (%p44_p3), [#allocation2], %s1734_s28 }
  0x15   : > { %s157_s30 = sadd.s32 (%p44_p3), %s1846_s29, %s1736_s27 }
  0x16   : > { %s1738_s4 = sshll.u32 (%p44_p3), %s157_s30, 2 }
  0x17   : > { %s2393_s7 = scalar_lea.vmem (%p44_p3), %s2797_s0, %s1738_s4 }
  0x18   : > { %v172_v0 = vld [vmem:[%s2393_s7] sm:$0xff] (%p44_p3)  ;;  %v174_v1 = vld [vmem:[%s2393_s7 + $0x8] sm:$0xff] (%p44_p3) }
  0x19   : > { %v176_v2 = vld [vmem:[%s2393_s7 + $0x40] sm:$0xff]  ;;  %173 = vst [vmem:[%s2398_s8] sm:$0xff] %v172_v0  ;;  %175 = vst [vmem:[%s2398_s8 + $0x8] sm:$0xff] %v174_v1  ;;  %v178_v3 = vld [vmem:[%s2393_s7 + $0x48] sm:$0xff] }
  0x1a   : > { %177 = vst [vmem:[%s2398_s8 + $0x10] sm:$0xff] %v176_v2  ;;  %v180_v4 = vld [vmem:[%s2393_s7 + $0x80] sm:$0xff]  ;;  %v182_v5 = vld [vmem:[%s2393_s7 + $0x88] sm:$0xff]  ;;  %179 = vst [vmem:[%s2398_s8 + $0x18] sm:$0xff] %v178_v3 }
  0x1b   : > { %181 = vst [vmem:[%s2398_s8 + $0x20] sm:$0xff] %v180_v4  ;;  %183 = vst [vmem:[%s2398_s8 + $0x28] sm:$0xff] %v182_v5  ;;  %v184_v6 = vld [vmem:[%s2393_s7 + $0xc0] sm:$0xff]  ;;  %v186_v7 = vld [vmem:[%s2393_s7 + $0xc8] sm:$0xff] }
  0x1c   : > { %v188_v8 = vld [vmem:[%s2393_s7 + $0x100] sm:$0xff]  ;;  %185 = vst [vmem:[%s2398_s8 + $0x30] sm:$0xff] %v184_v6  ;;  %187 = vst [vmem:[%s2398_s8 + $0x38] sm:$0xff] %v186_v7  ;;  %v190_v9 = vld [vmem:[%s2393_s7 + $0x108] sm:$0xff] }
  0x1d   : > { %189 = vst [vmem:[%s2398_s8 + $0x40] sm:$0xff] %v188_v8  ;;  %v192_v10 = vld [vmem:[%s2393_s7 + $0x140] sm:$0xff]  ;;  %v194_v11 = vld [vmem:[%s2393_s7 + $0x148] sm:$0xff]  ;;  %191 = vst [vmem:[%s2398_s8 + $0x48] sm:$0xff] %v190_v9 }
  0x1e   : > { %193 = vst [vmem:[%s2398_s8 + $0x50] sm:$0xff] %v192_v10  ;;  %195 = vst [vmem:[%s2398_s8 + $0x58] sm:$0xff] %v194_v11  ;;  %v196_v12 = vld [vmem:[%s2393_s7 + $0x180] sm:$0xff]  ;;  %v198_v13 = vld [vmem:[%s2393_s7 + $0x188] sm:$0xff] }
  0x1f   : > { %v200_v14 = vld [vmem:[%s2393_s7 + $0x1c0] sm:$0xff]  ;;  %197 = vst [vmem:[%s2398_s8 + $0x60] sm:$0xff] %v196_v12  ;;  %199 = vst [vmem:[%s2398_s8 + $0x68] sm:$0xff] %v198_v13  ;;  %v202_v15 = vld [vmem:[%s2393_s7 + $0x1c8] sm:$0xff] }
  0x20   : > { %201 = vst [vmem:[%s2398_s8 + $0x70] sm:$0xff] %v200_v14  ;;  %v204_v16 = vld [vmem:[%s2393_s7 + $0x200] sm:$0xff]  ;;  %v206_v17 = vld [vmem:[%s2393_s7 + $0x208] sm:$0xff]  ;;  %203 = vst [vmem:[%s2398_s8 + $0x78] sm:$0xff] %v202_v15 }
  0x21   : > { %205 = vst [vmem:[%s2398_s8 + $0x80] sm:$0xff] %v204_v16  ;;  %207 = vst [vmem:[%s2398_s8 + $0x88] sm:$0xff] %v206_v17  ;;  %v208_v18 = vld [vmem:[%s2393_s7 + $0x240] sm:$0xff]  ;;  %v210_v19 = vld [vmem:[%s2393_s7 + $0x248] sm:$0xff] }
  0x22   : > { %v212_v20 = vld [vmem:[%s2393_s7 + $0x280] sm:$0xff]  ;;  %209 = vst [vmem:[%s2398_s8 + $0x90] sm:$0xff] %v208_v18  ;;  %211 = vst [vmem:[%s2398_s8 + $0x98] sm:$0xff] %v210_v19  ;;  %v214_v21 = vld [vmem:[%s2393_s7 + $0x288] sm:$0xff] }
  0x23   : > { %213 = vst [vmem:[%s2398_s8 + $0xa0] sm:$0xff] %v212_v20  ;;  %v216_v22 = vld [vmem:[%s2393_s7 + $0x2c0] sm:$0xff]  ;;  %v218_v23 = vld [vmem:[%s2393_s7 + $0x2c8] sm:$0xff]  ;;  %215 = vst [vmem:[%s2398_s8 + $0xa8] sm:$0xff] %v214_v21 }
  0x24   : > { %217 = vst [vmem:[%s2398_s8 + $0xb0] sm:$0xff] %v216_v22  ;;  %219 = vst [vmem:[%s2398_s8 + $0xb8] sm:$0xff] %v218_v23  ;;  %v220_v24 = vld [vmem:[%s2393_s7 + $0x300] sm:$0xff]  ;;  %v222_v25 = vld [vmem:[%s2393_s7 + $0x308] sm:$0xff] }
  0x25   : > { %v224_v26 = vld [vmem:[%s2393_s7 + $0x340] sm:$0xff]  ;;  %221 = vst [vmem:[%s2398_s8 + $0xc0] sm:$0xff] %v220_v24  ;;  %223 = vst [vmem:[%s2398_s8 + $0xc8] sm:$0xff] %v222_v25  ;;  %v226_v27 = vld [vmem:[%s2393_s7 + $0x348] sm:$0xff] }
  0x26   : > { %225 = vst [vmem:[%s2398_s8 + $0xd0] sm:$0xff] %v224_v26  ;;  %v228_v28 = vld [vmem:[%s2393_s7 + $0x380] sm:$0xff]  ;;  %v230_v29 = vld [vmem:[%s2393_s7 + $0x388] sm:$0xff]  ;;  %227 = vst [vmem:[%s2398_s8 + $0xd8] sm:$0xff] %v226_v27 }
  0x27   : > { %229 = vst [vmem:[%s2398_s8 + $0xe0] sm:$0xff] %v228_v28  ;;  %231 = vst [vmem:[%s2398_s8 + $0xe8] sm:$0xff] %v230_v29  ;;  %v232_v30 = vld [vmem:[%s2393_s7 + $0x3c0] sm:$0xff]  ;;  %v234_v31 = vld [vmem:[%s2393_s7 + $0x3c8] sm:$0xff] }
  0x28   : > { %v236_v32 = vld [vmem:[%s2393_s7 + $0x400] sm:$0xff]  ;;  %233 = vst [vmem:[%s2398_s8 + $0xf0] sm:$0xff] %v232_v30  ;;  %235 = vst [vmem:[%s2398_s8 + $0xf8] sm:$0xff] %v234_v31  ;;  %v238_v33 = vld [vmem:[%s2393_s7 + $0x408] sm:$0xff] }
  0x29   : > { %237 = vst [vmem:[%s2398_s8 + $0x100] sm:$0xff] %v236_v32  ;;  %v240_v34 = vld [vmem:[%s2393_s7 + $0x440] sm:$0xff]  ;;  %v242_v35 = vld [vmem:[%s2393_s7 + $0x448] sm:$0xff]  ;;  %239 = vst [vmem:[%s2398_s8 + $0x108] sm:$0xff] %v238_v33 }
  0x2a   : > { %241 = vst [vmem:[%s2398_s8 + $0x110] sm:$0xff] %v240_v34  ;;  %243 = vst [vmem:[%s2398_s8 + $0x118] sm:$0xff] %v242_v35  ;;  %v244_v36 = vld [vmem:[%s2393_s7 + $0x480] sm:$0xff]  ;;  %v246_v37 = vld [vmem:[%s2393_s7 + $0x488] sm:$0xff] }
  0x2b   : > { %v248_v38 = vld [vmem:[%s2393_s7 + $0x4c0] sm:$0xff]  ;;  %245 = vst [vmem:[%s2398_s8 + $0x120] sm:$0xff] %v244_v36  ;;  %247 = vst [vmem:[%s2398_s8 + $0x128] sm:$0xff] %v246_v37  ;;  %v250_v39 = vld [vmem:[%s2393_s7 + $0x4c8] sm:$0xff] }
  0x2c   : > { %249 = vst [vmem:[%s2398_s8 + $0x130] sm:$0xff] %v248_v38  ;;  %v252_v40 = vld [vmem:[%s2393_s7 + $0x500] sm:$0xff]  ;;  %v254_v41 = vld [vmem:[%s2393_s7 + $0x508] sm:$0xff]  ;;  %251 = vst [vmem:[%s2398_s8 + $0x138] sm:$0xff] %v250_v39 }
  0x2d   : > { %253 = vst [vmem:[%s2398_s8 + $0x140] sm:$0xff] %v252_v40  ;;  %255 = vst [vmem:[%s2398_s8 + $0x148] sm:$0xff] %v254_v41  ;;  %v256_v42 = vld [vmem:[%s2393_s7 + $0x540] sm:$0xff]  ;;  %v258_v43 = vld [vmem:[%s2393_s7 + $0x548] sm:$0xff] }
  0x2e   : > { %v260_v44 = vld [vmem:[%s2393_s7 + $0x580] sm:$0xff]  ;;  %257 = vst [vmem:[%s2398_s8 + $0x150] sm:$0xff] %v256_v42  ;;  %259 = vst [vmem:[%s2398_s8 + $0x158] sm:$0xff] %v258_v43  ;;  %v262_v45 = vld [vmem:[%s2393_s7 + $0x588] sm:$0xff] }
  0x2f   : > { %261 = vst [vmem:[%s2398_s8 + $0x160] sm:$0xff] %v260_v44  ;;  %v264_v46 = vld [vmem:[%s2393_s7 + $0x5c0] sm:$0xff]  ;;  %v266_v47 = vld [vmem:[%s2393_s7 + $0x5c8] sm:$0xff]  ;;  %263 = vst [vmem:[%s2398_s8 + $0x168] sm:$0xff] %v262_v45 }
  0x30   : > { %265 = vst [vmem:[%s2398_s8 + $0x170] sm:$0xff] %v264_v46  ;;  %267 = vst [vmem:[%s2398_s8 + $0x178] sm:$0xff] %v266_v47  ;;  %v268_v48 = vld [vmem:[%s2393_s7 + $0x600] sm:$0xff]  ;;  %v270_v49 = vld [vmem:[%s2393_s7 + $0x608] sm:$0xff] }
  0x31   : > { %v272_v50 = vld [vmem:[%s2393_s7 + $0x640] sm:$0xff]  ;;  %269 = vst [vmem:[%s2398_s8 + $0x180] sm:$0xff] %v268_v48  ;;  %271 = vst [vmem:[%s2398_s8 + $0x188] sm:$0xff] %v270_v49  ;;  %v274_v51 = vld [vmem:[%s2393_s7 + $0x648] sm:$0xff] }
  0x32   : > { %273 = vst [vmem:[%s2398_s8 + $0x190] sm:$0xff] %v272_v50  ;;  %v276_v52 = vld [vmem:[%s2393_s7 + $0x680] sm:$0xff]  ;;  %v278_v53 = vld [vmem:[%s2393_s7 + $0x688] sm:$0xff]  ;;  %275 = vst [vmem:[%s2398_s8 + $0x198] sm:$0xff] %v274_v51 }
  0x33   : > { %277 = vst [vmem:[%s2398_s8 + $0x1a0] sm:$0xff] %v276_v52  ;;  %279 = vst [vmem:[%s2398_s8 + $0x1a8] sm:$0xff] %v278_v53  ;;  %v280_v54 = vld [vmem:[%s2393_s7 + $0x6c0] sm:$0xff]  ;;  %v282_v55 = vld [vmem:[%s2393_s7 + $0x6c8] sm:$0xff] }
  0x34   : > { %v284_v56 = vld [vmem:[%s2393_s7 + $0x700] sm:$0xff]  ;;  %281 = vst [vmem:[%s2398_s8 + $0x1b0] sm:$0xff] %v280_v54  ;;  %283 = vst [vmem:[%s2398_s8 + $0x1b8] sm:$0xff] %v282_v55  ;;  %v286_v57 = vld [vmem:[%s2393_s7 + $0x708] sm:$0xff] }
  0x35   : > { %285 = vst [vmem:[%s2398_s8 + $0x1c0] sm:$0xff] %v284_v56  ;;  %v288_v58 = vld [vmem:[%s2393_s7 + $0x740] sm:$0xff]  ;;  %v290_v59 = vld [vmem:[%s2393_s7 + $0x748] sm:$0xff]  ;;  %287 = vst [vmem:[%s2398_s8 + $0x1c8] sm:$0xff] %v286_v57 }
  0x36   : > { %289 = vst [vmem:[%s2398_s8 + $0x1d0] sm:$0xff] %v288_v58  ;;  %291 = vst [vmem:[%s2398_s8 + $0x1d8] sm:$0xff] %v290_v59  ;;  %v292_v60 = vld [vmem:[%s2393_s7 + $0x780] sm:$0xff]  ;;  %v294_v61 = vld [vmem:[%s2393_s7 + $0x788] sm:$0xff] }
  0x37   : > { %v296_v62 = vld [vmem:[%s2393_s7 + $0x7c0] sm:$0xff]  ;;  %293 = vst [vmem:[%s2398_s8 + $0x1e0] sm:$0xff] %v292_v60  ;;  %295 = vst [vmem:[%s2398_s8 + $0x1e8] sm:$0xff] %v294_v61  ;;  %v298_v63 = vld [vmem:[%s2393_s7 + $0x7c8] sm:$0xff] }
  0x38   : > { %297 = vst [vmem:[%s2398_s8 + $0x1f0] sm:$0xff] %v296_v62  ;;  %299 = vst [vmem:[%s2398_s8 + $0x1f8] sm:$0xff] %v298_v63 }
  0x39 PF: > { %p1739_p7 = scmp.ge.s32.totalorder %s2310_s18, 1  ;;  %p313_p8 = scmp.lt.s32.totalorder %s2310_s18, 9 }
  0x3b   : > { %p314_p9 = pnand %p1739_p7, %p313_p8 }
  0x3c   : > { %s320_s9 = sand.u32 (!%p314_p9), 1, %s2286_s12   ;;  %s1741_s10 = sshll.u32 (!%p314_p9), %s2294_s14, 6 }
  0x3d   : > { %317 = sbr.rel (%p314_p9) target bundleno = 516 (0x204), region = 47  ;;  %s1740_s11 = sshll.u32 (!%p314_p9), %s320_s9, 9 }
  0x3e   : > { %p355_p10 = scmp.lt.s32.totalorder (!%p314_p9), %s1741_s10, 255  ;;  %s1743_s21 = sshll.u32 (!%p314_p9), %s2298_s15, 5 }
  0x3f   : > { %p361_p11 = scmp.lt.s32.totalorder (!%p314_p9), %s1743_s21, 63  ;;  %p366_p12 = scmp.lt.s32.totalorder (!%p314_p9), %s2298_s15, 1 }
  0x40   : > { %s2547_s7 = scalar_lea.vmem (!%p314_p9), [#allocation2], %s1740_s11  ;;  %p1746_p13 = scmp.ne.s32.totalorder (!%p314_p9), %s2294_s14, 0 }
  0x44   : > { %s2814_s10 = smov (!%p355_p10, %s1741_s10), 255  ;;  %s2816_s21 = smov (!%p361_p11, %s1743_s21), 63 }
  0x45   : > { %s1742_s22 = sshll.u32 %s2814_s10, 2  ;;  %s2818_s15 = smov (!%p366_p12, %s2298_s15), 1  ;;  %v2312_v0 = vmov (!%p1746_p13), 0.0  }
  0x46   : > { %s2534_s26 = scalar_lea.vmem %s2798_s1, %s1742_s22  ;;  %s1744_s27 = sshll.u32 %s2816_s21, 3 }
  0x47   : > { %s2540_s12 = scalar_lea.vmem %s2799_s2, %s1744_s27  ;;  %s1745_s30 = sshll.u32 %s2818_s15, 1 }
  0x48   : > { %s2545_s6 = scalar_lea.vmem %s2800_s3, %s1745_s30  ;;  %374 = sbr.rel (%p1746_p13) target bundleno = 88 (0x58), region = 55  ;;  %375 = vst [vmem:[%s2540_s12] sm:$0xff] (!%p1746_p13), %v2312_v0  ;;  %376 = vst [vmem:[%s2540_s12 + $0x8] sm:$0xff] (!%p1746_p13), %v2312_v0 }
  0x49   : > { %377 = vst [vmem:[%s2540_s12 + $0x10] sm:$0xff] (!%p1746_p13), %v2312_v0  ;;  %378 = vst [vmem:[%s2540_s12 + $0x18] sm:$0xff] (!%p1746_p13), %v2312_v0 }
  0x4a   : > { %379 = vst [vmem:[%s2540_s12 + $0x20] sm:$0xff] (!%p1746_p13), %v2312_v0  ;;  %380 = vst [vmem:[%s2540_s12 + $0x28] sm:$0xff] (!%p1746_p13), %v2312_v0 }
  0x4b   : > { %381 = vst [vmem:[%s2540_s12 + $0x30] sm:$0xff] (!%p1746_p13), %v2312_v0  ;;  %382 = vst [vmem:[%s2540_s12 + $0x38] sm:$0xff] (!%p1746_p13), %v2312_v0 }
  0x4c   : > { %383 = vst [vmem:[%s2540_s12 + $0x40] sm:$0xff] (!%p1746_p13), %v2312_v0  ;;  %384 = vst [vmem:[%s2540_s12 + $0x48] sm:$0xff] (!%p1746_p13), %v2312_v0 }
  0x4d   : > { %385 = vst [vmem:[%s2540_s12 + $0x50] sm:$0xff] (!%p1746_p13), %v2312_v0  ;;  %386 = vst [vmem:[%s2540_s12 + $0x58] sm:$0xff] (!%p1746_p13), %v2312_v0 }
  0x4e   : > { %387 = vst [vmem:[%s2540_s12 + $0x60] sm:$0xff] (!%p1746_p13), %v2312_v0  ;;  %388 = vst [vmem:[%s2540_s12 + $0x68] sm:$0xff] (!%p1746_p13), %v2312_v0 }
  0x4f   : > { %389 = vst [vmem:[%s2540_s12 + $0x70] sm:$0xff] %v2312_v0  ;;  %390 = vst [vmem:[%s2540_s12 + $0x78] sm:$0xff] %v2312_v0 }
  0x50   : > { %391 = vst [vmem:[%s2540_s12 + $0x80] sm:$0xff] %v2312_v0  ;;  %392 = vst [vmem:[%s2540_s12 + $0x88] sm:$0xff] %v2312_v0 }
  0x51   : > { %393 = vst [vmem:[%s2540_s12 + $0x90] sm:$0xff] %v2312_v0  ;;  %394 = vst [vmem:[%s2540_s12 + $0x98] sm:$0xff] %v2312_v0 }
  0x52   : > { %395 = vst [vmem:[%s2540_s12 + $0xa0] sm:$0xff] %v2312_v0  ;;  %396 = vst [vmem:[%s2540_s12 + $0xa8] sm:$0xff] %v2312_v0 }
  0x53   : > { %397 = vst [vmem:[%s2540_s12 + $0xb0] sm:$0xff] %v2312_v0  ;;  %398 = vst [vmem:[%s2540_s12 + $0xb8] sm:$0xff] %v2312_v0 }
  0x54   : > { %399 = vst [vmem:[%s2540_s12 + $0xc0] sm:$0xff] %v2312_v0  ;;  %400 = vst [vmem:[%s2540_s12 + $0xc8] sm:$0xff] %v2312_v0 }
  0x55   : > { %401 = vst [vmem:[%s2540_s12 + $0xd0] sm:$0xff] %v2312_v0  ;;  %402 = vst [vmem:[%s2540_s12 + $0xd8] sm:$0xff] %v2312_v0 }
  0x56   : > { %403 = vst [vmem:[%s2540_s12 + $0xe0] sm:$0xff] %v2312_v0  ;;  %404 = vst [vmem:[%s2540_s12 + $0xe8] sm:$0xff] %v2312_v0 }
  0x57   : > { %405 = vst [vmem:[%s2540_s12 + $0xf0] sm:$0xff] %v2312_v0  ;;  %406 = vst [vmem:[%s2540_s12 + $0xf8] sm:$0xff] %v2312_v0 }
  0x58 PF: > { %v2128_v1 = vld [vmem:[%s2534_s26 + $0x40] sm:$0xff]   ;;  %v2132_v5 = vld [vmem:[%s2534_s26 + $0x48] sm:$0xff]   ;;  %v2136_v9 = vld [vmem:[%s2534_s26 + $0x50] sm:$0xff]   ;;  %p1843_p0 = scmp.ne.s32.totalorder %s2294_s14, 3 }
  0x59   : > { %v2129_v2 = vld [vmem:[%s2534_s26 + $0xc0] sm:$0xff]   ;;  %1847 = vmatprep.subr.bf16.mxu0 %v2128_v1  ;;  %v2133_v6 = vld [vmem:[%s2534_s26 + $0xc8] sm:$0xff]   ;;  %v2137_v10 = vld [vmem:[%s2534_s26 + $0xd0] sm:$0xff]   ;;  %vm1607_vm0 = vcmask (!%p1843_p0), 1040384  }
  0x5a   : > { %v2130_v3 = vld [vmem:[%s2534_s26] sm:$0xff]   ;;  %1959 = vmatprep.subr.bf16.mxu1 %v2129_v2  ;;  %v2134_v7 = vld [vmem:[%s2534_s26 + $0x8] sm:$0xff]   ;;  %v2138_v11 = vld [vmem:[%s2534_s26 + $0x10] sm:$0xff]  }
  0x5b   : > { %v2131_v4 = vld [vmem:[%s2534_s26 + $0x80] sm:$0xff]   ;;  %1848 = vmatpush3.bf16.msra.mxu0 %v2130_v3  ;;  %v2135_v8 = vld [vmem:[%s2534_s26 + $0x88] sm:$0xff]   ;;  %v2139_v12 = vld [vmem:[%s2534_s26 + $0x90] sm:$0xff]  }
  0x5c   : > { %1960 = vmatpush3.bf16.msra.mxu1 %v2131_v4  ;;  %1849 = vmatprep.subr.bf16.mxu0 %v2132_v5  ;;  %v2140_v13 = vld [vmem:[%s2534_s26 + $0x58] sm:$0xff]   ;;  %v2144_v17 = vld [vmem:[%s2534_s26 + $0x60] sm:$0xff]   ;;  %v2148_v21 = vld [vmem:[%s2534_s26 + $0x68] sm:$0xff]  }
  0x5d   : > { %1961 = vmatprep.subr.bf16.mxu1 %v2133_v6  ;;  %v2141_v14 = vld [vmem:[%s2534_s26 + $0xd8] sm:$0xff]   ;;  %v2145_v18 = vld [vmem:[%s2534_s26 + $0xe0] sm:$0xff]   ;;  %v2149_v22 = vld [vmem:[%s2534_s26 + $0xe8] sm:$0xff]  }
  0x5e   : > { %v2142_v15 = vld [vmem:[%s2534_s26 + $0x18] sm:$0xff]   ;;  %v2146_v19 = vld [vmem:[%s2534_s26 + $0x20] sm:$0xff]   ;;  %v2150_v23 = vld [vmem:[%s2534_s26 + $0x28] sm:$0xff]  }
  0x5f   : > { %1850 = vmatpush3.bf16.msra.mxu0 %v2134_v7  ;;  %v2143_v16 = vld [vmem:[%s2534_s26 + $0x98] sm:$0xff]   ;;  %v2147_v20 = vld [vmem:[%s2534_s26 + $0xa0] sm:$0xff]   ;;  %v2151_v24 = vld [vmem:[%s2534_s26 + $0xa8] sm:$0xff]  }
  0x60   : > { %1962 = vmatpush3.bf16.msra.mxu1 %v2135_v8  ;;  %1851 = vmatprep.subr.bf16.mxu0 %v2136_v9  ;;  %v2152_v25 = vld [vmem:[%s2534_s26 + $0x70] sm:$0xff]   ;;  %v2156_v29 = vld [vmem:[%s2534_s26 + $0x78] sm:$0xff]  }
  0x61   : > { %1963 = vmatprep.subr.bf16.mxu1 %v2137_v10  ;;  %v2153_v26 = vld [vmem:[%s2534_s26 + $0xf0] sm:$0xff]   ;;  %v2157_v30 = vld [vmem:[%s2534_s26 + $0xf8] sm:$0xff]  }
  0x62   : > { %v2154_v27 = vld [vmem:[%s2534_s26 + $0x30] sm:$0xff]   ;;  %v2158_v31 = vld [vmem:[%s2534_s26 + $0x38] sm:$0xff]  }
  0x63   : > { %1852 = vmatpush3.bf16.msra.mxu0 %v2138_v11  ;;  %v2155_v28 = vld [vmem:[%s2534_s26 + $0xb0] sm:$0xff]   ;;  %v2159_v32 = vld [vmem:[%s2534_s26 + $0xb8] sm:$0xff]  }
  0x64   : > { %1964 = vmatpush3.bf16.msra.mxu1 %v2139_v12  ;;  %1853 = vmatprep.subr.bf16.mxu0 %v2140_v13  ;;  %v2160_v33 = vld [vmem:[%s2547_s7] ss:$16 sps:$4 sm:$0xff]   ;;  %v2162_v34 = vld [vmem:[%s2547_s7 + $0x4] ss:$16 sps:$4 sm:$0xff]   ;;  %v2163_v35 = vld [vmem:[%s2547_s7 + $0x8] ss:$16 sps:$4 sm:$0xff]  }
  0x65   : > { %1965 = vmatprep.subr.bf16.mxu1 %v2141_v14  ;;  %v2165_v36 = vld [vmem:[%s2547_s7 + $0xc] ss:$16 sps:$4 sm:$0xff]   ;;  %1111 = vmatprep.mubr.bf16.mxu0 %v2162_v34  ;;  %v2166_v37 = vld [vmem:[%s2547_s7 + $0x24] ss:$16 sps:$4 sm:$0xff]   ;;  %v2170_v39 = vld [vmem:[%s2547_s7 + $0x20] ss:$16 sps:$4 sm:$0xff]  }
  0x66   : > { %1272 = vmatprep.mubr.bf16.mxu1 %v2165_v36  ;;  %v2168_v38 = vld [vmem:[%s2547_s7 + $0x2c] ss:$16 sps:$4 sm:$0xff]   ;;  %v2171_v40 = vld [vmem:[%s2547_s7 + $0x28] ss:$16 sps:$4 sm:$0xff]   ;;  %v2172_v41 = vld [vmem:[%s2547_s7 + $0x44] ss:$16 sps:$4 sm:$0xff]  }
  0x67   : > { %1854 = vmatpush3.bf16.msra.mxu0 %v2142_v15  ;;  %v2174_v42 = vld [vmem:[%s2547_s7 + $0x4c] ss:$16 sps:$4 sm:$0xff]   ;;  %v2176_v43 = vld [vmem:[%s2547_s7 + $0x40] ss:$16 sps:$4 sm:$0xff]   ;;  %v2177_v44 = vld [vmem:[%s2547_s7 + $0x48] ss:$16 sps:$4 sm:$0xff]  }
  0x68   : > { %1966 = vmatpush3.bf16.msra.mxu1 %v2143_v16  ;;  %1855 = vmatprep.subr.bf16.mxu0 %v2144_v17  ;;  %v2178_v45 = vld [vmem:[%s2547_s7 + $0x64] ss:$16 sps:$4 sm:$0xff]   ;;  %v2180_v46 = vld [vmem:[%s2547_s7 + $0x6c] ss:$16 sps:$4 sm:$0xff]   ;;  %v2182_v47 = vld [vmem:[%s2547_s7 + $0x60] ss:$16 sps:$4 sm:$0xff]  }
  0x69   : > { %1967 = vmatprep.subr.bf16.mxu1 %v2145_v18  ;;  %v2183_v48 = vld [vmem:[%s2547_s7 + $0x68] ss:$16 sps:$4 sm:$0xff]   ;;  %v2184_v49 = vld [vmem:[%s2547_s7 + $0x84] ss:$16 sps:$4 sm:$0xff]   ;;  %v2186_v50 = vld [vmem:[%s2547_s7 + $0x8c] ss:$16 sps:$4 sm:$0xff]  }
  0x6a   : > { %v2188_v51 = vld [vmem:[%s2547_s7 + $0x80] ss:$16 sps:$4 sm:$0xff]   ;;  %v2189_v52 = vld [vmem:[%s2547_s7 + $0x88] ss:$16 sps:$4 sm:$0xff]   ;;  %v2190_v53 = vld [vmem:[%s2547_s7 + $0xa4] ss:$16 sps:$4 sm:$0xff]  }
  0x6b   : > { %1856 = vmatpush3.bf16.msra.mxu0 %v2146_v19  ;;  %v2192_v54 = vld [vmem:[%s2547_s7 + $0xac] ss:$16 sps:$4 sm:$0xff]   ;;  %v2194_v55 = vld [vmem:[%s2547_s7 + $0xa0] ss:$16 sps:$4 sm:$0xff]   ;;  %v2195_v56 = vld [vmem:[%s2547_s7 + $0xa8] ss:$16 sps:$4 sm:$0xff]  }
  0x6c   : > { %1968 = vmatpush3.bf16.msra.mxu1 %v2147_v20  ;;  %1857 = vmatprep.subr.bf16.mxu0 %v2148_v21  ;;  %v2196_v57 = vld [vmem:[%s2547_s7 + $0xc4] ss:$16 sps:$4 sm:$0xff]   ;;  %v2198_v58 = vld [vmem:[%s2547_s7 + $0xcc] ss:$16 sps:$4 sm:$0xff]   ;;  %v2200_v59 = vld [vmem:[%s2547_s7 + $0xc0] ss:$16 sps:$4 sm:$0xff]  }
  0x6d   : > { %1969 = vmatprep.subr.bf16.mxu1 %v2149_v22  ;;  %v2201_v60 = vld [vmem:[%s2547_s7 + $0xc8] ss:$16 sps:$4 sm:$0xff]   ;;  %v2202_v61 = vld [vmem:[%s2547_s7 + $0xe4] ss:$16 sps:$4 sm:$0xff]   ;;  %v2204_v62 = vld [vmem:[%s2547_s7 + $0xec] ss:$16 sps:$4 sm:$0xff]  }
  0x6e   : > { %v2206_v63 = vld [vmem:[%s2547_s7 + $0xe0] ss:$16 sps:$4 sm:$0xff]   ;;  %v2207_v0 = vld [vmem:[%s2547_s7 + $0xe8] ss:$16 sps:$4 sm:$0xff]   ;;  %v2208_v1 = vld [vmem:[%s2547_s7 + $0x104] ss:$16 sps:$4 sm:$0xff]  }
  0x6f   : > { %1858 = vmatpush3.bf16.msra.mxu0 %v2150_v23  ;;  %v2210_v2 = vld [vmem:[%s2547_s7 + $0x10c] ss:$16 sps:$4 sm:$0xff]   ;;  %v2212_v3 = vld [vmem:[%s2547_s7 + $0x100] ss:$16 sps:$4 sm:$0xff]   ;;  %v2213_v4 = vld [vmem:[%s2547_s7 + $0x108] ss:$16 sps:$4 sm:$0xff]  }
  0x70   : > { %1970 = vmatpush3.bf16.msra.mxu1 %v2151_v24  ;;  %1859 = vmatprep.subr.bf16.mxu0 %v2152_v25  ;;  %v2214_v5 = vld [vmem:[%s2547_s7 + $0x124] ss:$16 sps:$4 sm:$0xff]   ;;  %v2216_v6 = vld [vmem:[%s2547_s7 + $0x12c] ss:$16 sps:$4 sm:$0xff]   ;;  %v2218_v7 = vld [vmem:[%s2547_s7 + $0x120] ss:$16 sps:$4 sm:$0xff]  }
  0x71   : > { %1971 = vmatprep.subr.bf16.mxu1 %v2153_v26  ;;  %v2219_v8 = vld [vmem:[%s2547_s7 + $0x128] ss:$16 sps:$4 sm:$0xff]   ;;  %v2220_v9 = vld [vmem:[%s2547_s7 + $0x144] ss:$16 sps:$4 sm:$0xff]   ;;  %v2222_v10 = vld [vmem:[%s2547_s7 + $0x14c] ss:$16 sps:$4 sm:$0xff]  }
  0x72   : > { %v2224_v11 = vld [vmem:[%s2547_s7 + $0x140] ss:$16 sps:$4 sm:$0xff]   ;;  %v2225_v12 = vld [vmem:[%s2547_s7 + $0x148] ss:$16 sps:$4 sm:$0xff]   ;;  %v2226_v13 = vld [vmem:[%s2547_s7 + $0x164] ss:$16 sps:$4 sm:$0xff]  }
  0x73   : > { %1860 = vmatpush3.bf16.msra.mxu0 %v2154_v27  ;;  %v2228_v14 = vld [vmem:[%s2547_s7 + $0x16c] ss:$16 sps:$4 sm:$0xff]   ;;  %v2230_v15 = vld [vmem:[%s2547_s7 + $0x160] ss:$16 sps:$4 sm:$0xff]   ;;  %v2231_v16 = vld [vmem:[%s2547_s7 + $0x168] ss:$16 sps:$4 sm:$0xff]  }
  0x74   : > { %1972 = vmatpush3.bf16.msra.mxu1 %v2155_v28  ;;  %1861 = vmatprep.subr.bf16.mxu0 %v2156_v29  ;;  %v2232_v17 = vld [vmem:[%s2547_s7 + $0x184] ss:$16 sps:$4 sm:$0xff]   ;;  %v2234_v18 = vld [vmem:[%s2547_s7 + $0x18c] ss:$16 sps:$4 sm:$0xff]   ;;  %v2236_v19 = vld [vmem:[%s2547_s7 + $0x180] ss:$16 sps:$4 sm:$0xff]  }
  0x75   : > { %1973 = vmatprep.subr.bf16.mxu1 %v2157_v30  ;;  %v2237_v20 = vld [vmem:[%s2547_s7 + $0x188] ss:$16 sps:$4 sm:$0xff]   ;;  %v2238_v21 = vld [vmem:[%s2547_s7 + $0x1a4] ss:$16 sps:$4 sm:$0xff]   ;;  %v2240_v22 = vld [vmem:[%s2547_s7 + $0x1ac] ss:$16 sps:$4 sm:$0xff]  }
  0x76   : > { %v2242_v23 = vld [vmem:[%s2547_s7 + $0x1a0] ss:$16 sps:$4 sm:$0xff]   ;;  %v2243_v24 = vld [vmem:[%s2547_s7 + $0x1a8] ss:$16 sps:$4 sm:$0xff]   ;;  %v2244_v25 = vld [vmem:[%s2547_s7 + $0x1c4] ss:$16 sps:$4 sm:$0xff]  }
  0x77   : > { %1862 = vmatpush3.bf16.msra.mxu0 %v2158_v31  ;;  %v2246_v26 = vld [vmem:[%s2547_s7 + $0x1cc] ss:$16 sps:$4 sm:$0xff]   ;;  %v2248_v27 = vld [vmem:[%s2547_s7 + $0x1c0] ss:$16 sps:$4 sm:$0xff]   ;;  %v2249_v28 = vld [vmem:[%s2547_s7 + $0x1c8] ss:$16 sps:$4 sm:$0xff]  }
  0x78   : > { %1974 = vmatpush3.bf16.msra.mxu1 %v2159_v32  ;;  %v2250_v29 = vld [vmem:[%s2547_s7 + $0x1e4] ss:$16 sps:$4 sm:$0xff]   ;;  %v2252_v30 = vld [vmem:[%s2547_s7 + $0x1ec] ss:$16 sps:$4 sm:$0xff]   ;;  %v2254_v31 = vld [vmem:[%s2547_s7 + $0x1e0] ss:$16 sps:$4 sm:$0xff]  }
  0x79   : > { %v2255_v32 = vld [vmem:[%s2547_s7 + $0x1e8] ss:$16 sps:$4 sm:$0xff]  }
  0x7a   : > { %1112 = vmatmul.mubr.bf16.vlgmr.msra.gmra.mrb[0].mxu0 %v2160_v33 }
  0x7b   : > { %1273 = vmatmul.mubr.bf16.vlgmr.msra.gmra.mrb[0].mxu1 %v2163_v35  ;;  %1119 = vmatprep.mubr.bf16.mxu0 %v2166_v37 }
  0x7c   : > { %1280 = vmatprep.mubr.bf16.mxu1 %v2168_v38 }
  0x82   : > { %1120 = vmatmul.mubr.bf16.gmra.mrb[4].mxu0 %v2170_v39 }
  0x83   : > { %1281 = vmatmul.mubr.bf16.gmra.mrb[4].mxu1 %v2171_v40  ;;  %1127 = vmatprep.mubr.bf16.mxu0 %v2172_v41 }
  0x84   : > { %1288 = vmatprep.mubr.bf16.mxu1 %v2174_v42  ;;  %v407_v42 = vld [vmem:[%s2540_s12] sm:$0xff] }
  0x8a   : > { %1128 = vmatmul.mubr.bf16.gmra.mrb[8].mxu0 %v2176_v43 }
  0x8b   : > { %1289 = vmatmul.mubr.bf16.gmra.mrb[8].mxu1 %v2177_v44  ;;  %1135 = vmatprep.mubr.bf16.mxu0 %v2178_v45 }
  0x8c   : > { %1296 = vmatprep.mubr.bf16.mxu1 %v2180_v46 }
  0x92   : > { %1136 = vmatmul.mubr.bf16.gmra.mrb[12].mxu0 %v2182_v47  ;;  %v408_v47 = vld [vmem:[%s2540_s12 + $0x8] sm:$0xff] }
  0x93   : > { %1297 = vmatmul.mubr.bf16.gmra.mrb[12].mxu1 %v2183_v48  ;;  %1143 = vmatprep.mubr.bf16.mxu0 %v2184_v49 }
  0x94   : > { %1304 = vmatprep.mubr.bf16.mxu1 %v2186_v50 }
  0x9a   : > { %1144 = vmatmul.mubr.bf16.gmra.mrb[16].mxu0 %v2188_v51 }
  0x9b   : > { %1305 = vmatmul.mubr.bf16.gmra.mrb[16].mxu1 %v2189_v52  ;;  %1151 = vmatprep.mubr.bf16.mxu0 %v2190_v53 }
  0x9c   : > { %1312 = vmatprep.mubr.bf16.mxu1 %v2192_v54 }
  0xa2   : > { %1152 = vmatmul.mubr.bf16.gmra.mrb[20].mxu0 %v2194_v55 }
  0xa3   : > { %1313 = vmatmul.mubr.bf16.gmra.mrb[20].mxu1 %v2195_v56  ;;  %1159 = vmatprep.mubr.bf16.mxu0 %v2196_v57 }
  0xa4   : > { %1320 = vmatprep.mubr.bf16.mxu1 %v2198_v58 }
  0xaa   : > { %1160 = vmatmul.mubr.bf16.gmra.mrb[24].mxu0 %v2200_v59 }
  0xab   : > { %1321 = vmatmul.mubr.bf16.gmra.mrb[24].mxu1 %v2201_v60  ;;  %1167 = vmatprep.mubr.bf16.mxu0 %v2202_v61  ;;  %v409_v60 = vld [vmem:[%s2540_s12 + $0x10] sm:$0xff] }
  0xac   : > { %1328 = vmatprep.mubr.bf16.mxu1 %v2204_v62 }
  0xb2   : > { %1168 = vmatmul.mubr.bf16.gmra.mrb[28].mxu0 %v2206_v63 }
  0xb3   : > { %1329 = vmatmul.mubr.bf16.gmra.mrb[28].mxu1 %v2207_v0  ;;  %1175 = vmatprep.mubr.bf16.mxu0 %v2208_v1  ;;  %v410_v1 = vld [vmem:[%s2540_s12 + $0x18] sm:$0xff] }
  0xb4   : > { %1336 = vmatprep.mubr.bf16.mxu1 %v2210_v2 }
  0xba   : > { %1176 = vmatmul.mubr.bf16.gmra.mrb[32].mxu0 %v2212_v3 }
  0xbb   : > { %1337 = vmatmul.mubr.bf16.gmra.mrb[32].mxu1 %v2213_v4  ;;  %1183 = vmatprep.mubr.bf16.mxu0 %v2214_v5 }
  0xbc   : > { %1344 = vmatprep.mubr.bf16.mxu1 %v2216_v6 }
  0xc2   : > { %1184 = vmatmul.mubr.bf16.gmra.mrb[36].mxu0 %v2218_v7 }
  0xc3   : > { %1345 = vmatmul.mubr.bf16.gmra.mrb[36].mxu1 %v2219_v8  ;;  %1191 = vmatprep.mubr.bf16.mxu0 %v2220_v9 }
  0xc4   : > { %1352 = vmatprep.mubr.bf16.mxu1 %v2222_v10 }
  0xca   : > { %1192 = vmatmul.mubr.bf16.gmra.mrb[40].mxu0 %v2224_v11 }
  0xcb   : > { %1353 = vmatmul.mubr.bf16.gmra.mrb[40].mxu1 %v2225_v12  ;;  %1199 = vmatprep.mubr.bf16.mxu0 %v2226_v13 }
  0xcc   : > { %1360 = vmatprep.mubr.bf16.mxu1 %v2228_v14  ;;  %v411_v14 = vld [vmem:[%s2540_s12 + $0x20] sm:$0xff] }
  0xd2   : > { %1200 = vmatmul.mubr.bf16.gmra.mrb[44].mxu0 %v2230_v15 }
  0xd3   : > { %1361 = vmatmul.mubr.bf16.gmra.mrb[44].mxu1 %v2231_v16  ;;  %1207 = vmatprep.mubr.bf16.mxu0 %v2232_v17 }
  0xd4   : > { %1368 = vmatprep.mubr.bf16.mxu1 %v2234_v18 }
  0xda   : > { %1208 = vmatmul.mubr.bf16.gmra.mrb[48].mxu0 %v2236_v19  ;;  %v412_v19 = vld [vmem:[%s2540_s12 + $0x28] sm:$0xff] }
  0xdb   : > { %1369 = vmatmul.mubr.bf16.gmra.mrb[48].mxu1 %v2237_v20  ;;  %1215 = vmatprep.mubr.bf16.mxu0 %v2238_v21 }
  0xdc   : > { %1376 = vmatprep.mubr.bf16.mxu1 %v2240_v22 }
  0xe2   : > { %1216 = vmatmul.mubr.bf16.gmra.mrb[52].mxu0 %v2242_v23 }
  0xe3   : > { %1377 = vmatmul.mubr.bf16.gmra.mrb[52].mxu1 %v2243_v24  ;;  %1223 = vmatprep.mubr.bf16.mxu0 %v2244_v25 }
  0xe4   : > { %1384 = vmatprep.mubr.bf16.mxu1 %v2246_v26 }
  0xea   : > { %1224 = vmatmul.mubr.bf16.gmra.mrb[56].mxu0 %v2248_v27 }
  0xeb   : > { %1385 = vmatmul.mubr.bf16.gmra.mrb[56].mxu1 %v2249_v28  ;;  %1231 = vmatprep.mubr.bf16.mxu0 %v2250_v29 }
  0xec   : > { %1392 = vmatprep.mubr.bf16.mxu1 %v2252_v30 }
  0xf2   : > { %1232 = vmatmul.mubr.bf16.gmra.mrb[60].mxu0 %v2254_v31 }
  0xf3   : > { %1393 = vmatmul.mubr.bf16.gmra.mrb[60].mxu1 %v2255_v32  ;;  %v413_v32 = vld [vmem:[%s2540_s12 + $0x30] sm:$0xff] }
 0x14d   : > { %v1863_v33 = vpop.f32.mrb[0].mxu0 }
 0x14e   : > { %v1975_v34 = vpop.f32.mrb[0].mxu1  ;;  %v1864_v35 = vpop.f32.mrb[1].mxu0 }
 0x14f   : > { %v1865_v36 = vadd.f32 %v1864_v35, %v1863_v33  ;;  %v1976_v37 = vpop.f32.mrb[1].mxu1  ;;  %v1866_v38 = vpop.f32.mrb[2].mxu0 }
 0x150   : > { %v1977_v39 = vadd.f32 %v1976_v37, %v1975_v34  ;;  %v1978_v40 = vpop.f32.mrb[2].mxu1  ;;  %v1867_v41 = vpop.f32.mrb[3].mxu0  ;;  %v414_v37 = vld [vmem:[%s2540_s12 + $0x38] sm:$0xff] }
 0x151   : > { %v1868_v43 = vadd.f32 %v1867_v41, %v1866_v38  ;;  %v1979_v44 = vpop.f32.mrb[3].mxu1 }
 0x152   : > { %v1275_v45 = vadd.f32 %v1977_v39, %v1865_v36  ;;  %v1980_v46 = vadd.f32 %v1979_v44, %v1978_v40 }
 0x154   : > { %v1401_v48 = vadd.f32 %v1275_v45, %v407_v42  ;;  %v1278_v49 = vadd.f32 %v1980_v46, %v1868_v43 }
 0x155   : > { %v1869_v50 = vpop.f32.mrb[4].mxu0 }
 0x156   : > { %1433 = vst [vmem:[%s2540_s12] sm:$0xff] %v1401_v48  ;;  %v1402_v51 = vadd.f32 %v1278_v49, %v408_v47  ;;  %v1981_v52 = vpop.f32.mrb[4].mxu1  ;;  %v1870_v53 = vpop.f32.mrb[5].mxu0 }
 0x157   : > { %v1871_v54 = vadd.f32 %v1870_v53, %v1869_v50  ;;  %v1982_v55 = vpop.f32.mrb[5].mxu1  ;;  %v1872_v56 = vpop.f32.mrb[6].mxu0  ;;  %v415_v50 = vld [vmem:[%s2540_s12 + $0x40] sm:$0xff] }
 0x158   : > { %1434 = vst [vmem:[%s2540_s12 + $0x8] sm:$0xff] %v1402_v51  ;;  %v1983_v57 = vadd.f32 %v1982_v55, %v1981_v52  ;;  %v1984_v58 = vpop.f32.mrb[6].mxu1  ;;  %v1873_v59 = vpop.f32.mrb[7].mxu0  ;;  %v416_v55 = vld [vmem:[%s2540_s12 + $0x48] sm:$0xff] }
 0x159   : > { %v1874_v61 = vadd.f32 %v1873_v59, %v1872_v56  ;;  %v1985_v62 = vpop.f32.mrb[7].mxu1 }
 0x15a   : > { %v1283_v63 = vadd.f32 %v1983_v57, %v1871_v54  ;;  %v1986_v0 = vadd.f32 %v1985_v62, %v1984_v58 }
 0x15c   : > { %v1403_v2 = vadd.f32 %v1283_v63, %v409_v60  ;;  %v1286_v3 = vadd.f32 %v1986_v0, %v1874_v61 }
 0x15d   : > { %v1875_v4 = vpop.f32.mrb[8].mxu0 }
 0x15e   : > { %1435 = vst [vmem:[%s2540_s12 + $0x10] sm:$0xff] %v1403_v2  ;;  %v1404_v5 = vadd.f32 %v1286_v3, %v410_v1  ;;  %v1987_v6 = vpop.f32.mrb[8].mxu1  ;;  %v1876_v7 = vpop.f32.mrb[9].mxu0 }
 0x15f   : > { %v1877_v8 = vadd.f32 %v1876_v7, %v1875_v4  ;;  %v1988_v9 = vpop.f32.mrb[9].mxu1  ;;  %v1878_v10 = vpop.f32.mrb[10].mxu0  ;;  %v417_v4 = vld [vmem:[%s2540_s12 + $0x50] sm:$0xff] }
 0x160   : > { %1436 = vst [vmem:[%s2540_s12 + $0x18] sm:$0xff] %v1404_v5  ;;  %v1989_v11 = vadd.f32 %v1988_v9, %v1987_v6  ;;  %v1990_v12 = vpop.f32.mrb[10].mxu1  ;;  %v1879_v13 = vpop.f32.mrb[11].mxu0  ;;  %v418_v9 = vld [vmem:[%s2540_s12 + $0x58] sm:$0xff] }
 0x161   : > { %v1880_v15 = vadd.f32 %v1879_v13, %v1878_v10  ;;  %v1991_v16 = vpop.f32.mrb[11].mxu1 }
 0x162   : > { %v1291_v17 = vadd.f32 %v1989_v11, %v1877_v8  ;;  %v1992_v18 = vadd.f32 %v1991_v16, %v1990_v12 }
 0x164   : > { %v1405_v20 = vadd.f32 %v1291_v17, %v411_v14  ;;  %v1294_v21 = vadd.f32 %v1992_v18, %v1880_v15 }
 0x165   : > { %v1881_v22 = vpop.f32.mrb[12].mxu0 }
 0x166   : > { %1437 = vst [vmem:[%s2540_s12 + $0x20] sm:$0xff] %v1405_v20  ;;  %v1406_v23 = vadd.f32 %v1294_v21, %v412_v19  ;;  %v1993_v24 = vpop.f32.mrb[12].mxu1  ;;  %v1882_v25 = vpop.f32.mrb[13].mxu0 }
 0x167   : > { %v1883_v26 = vadd.f32 %v1882_v25, %v1881_v22  ;;  %v1994_v27 = vpop.f32.mrb[13].mxu1  ;;  %v1884_v28 = vpop.f32.mrb[14].mxu0  ;;  %v419_v22 = vld [vmem:[%s2540_s12 + $0x60] sm:$0xff] }
 0x168   : > { %1438 = vst [vmem:[%s2540_s12 + $0x28] sm:$0xff] %v1406_v23  ;;  %v1995_v29 = vadd.f32 %v1994_v27, %v1993_v24  ;;  %v1996_v30 = vpop.f32.mrb[14].mxu1  ;;  %v1885_v31 = vpop.f32.mrb[15].mxu0  ;;  %v420_v27 = vld [vmem:[%s2540_s12 + $0x68] sm:$0xff] }
 0x169   : > { %v1886_v33 = vadd.f32 %v1885_v31, %v1884_v28  ;;  %v1997_v34 = vpop.f32.mrb[15].mxu1 }
 0x16a   : > { %v1299_v35 = vadd.f32 %v1995_v29, %v1883_v26  ;;  %v1998_v36 = vadd.f32 %v1997_v34, %v1996_v30 }
 0x16c   : > { %v1407_v38 = vadd.f32 %v1299_v35, %v413_v32  ;;  %v1302_v39 = vadd.f32 %v1998_v36, %v1886_v33 }
 0x16d   : > { %v1887_v40 = vpop.f32.mrb[16].mxu0 }
 0x16e   : > { %1439 = vst [vmem:[%s2540_s12 + $0x30] sm:$0xff] %v1407_v38  ;;  %v1408_v41 = vadd.f32 %v1302_v39, %v414_v37  ;;  %v1999_v42 = vpop.f32.mrb[16].mxu1  ;;  %v1888_v43 = vpop.f32.mrb[17].mxu0 }
 0x16f   : > { %v1889_v44 = vadd.f32 %v1888_v43, %v1887_v40  ;;  %v2000_v45 = vpop.f32.mrb[17].mxu1  ;;  %v1890_v46 = vpop.f32.mrb[18].mxu0  ;;  %v421_v40 = vld [vmem:[%s2540_s12 + $0x70] sm:$0xff] }
 0x170   : > { %1440 = vst [vmem:[%s2540_s12 + $0x38] sm:$0xff] %v1408_v41  ;;  %v2001_v47 = vadd.f32 %v2000_v45, %v1999_v42  ;;  %v2002_v48 = vpop.f32.mrb[18].mxu1  ;;  %v1891_v49 = vpop.f32.mrb[19].mxu0  ;;  %v422_v45 = vld [vmem:[%s2540_s12 + $0x78] sm:$0xff] }
 0x171   : > { %v1892_v51 = vadd.f32 %v1891_v49, %v1890_v46  ;;  %v2003_v52 = vpop.f32.mrb[19].mxu1 }
 0x172   : > { %v1307_v53 = vadd.f32 %v2001_v47, %v1889_v44  ;;  %v2004_v54 = vadd.f32 %v2003_v52, %v2002_v48 }
 0x174   : > { %v1409_v56 = vadd.f32 %v1307_v53, %v415_v50  ;;  %v1310_v57 = vadd.f32 %v2004_v54, %v1892_v51 }
 0x175   : > { %v1893_v58 = vpop.f32.mrb[20].mxu0 }
 0x176   : > { %1441 = vst [vmem:[%s2540_s12 + $0x40] sm:$0xff] %v1409_v56  ;;  %v1410_v59 = vadd.f32 %v1310_v57, %v416_v55  ;;  %v2005_v60 = vpop.f32.mrb[20].mxu1  ;;  %v1894_v61 = vpop.f32.mrb[21].mxu0 }
 0x177   : > { %v1895_v62 = vadd.f32 %v1894_v61, %v1893_v58  ;;  %v2006_v63 = vpop.f32.mrb[21].mxu1  ;;  %v1896_v0 = vpop.f32.mrb[22].mxu0  ;;  %v423_v58 = vld [vmem:[%s2540_s12 + $0x80] sm:$0xff] }
 0x178   : > { %1442 = vst [vmem:[%s2540_s12 + $0x48] sm:$0xff] %v1410_v59  ;;  %v2007_v1 = vadd.f32 %v2006_v63, %v2005_v60  ;;  %v2008_v2 = vpop.f32.mrb[22].mxu1  ;;  %v1897_v3 = vpop.f32.mrb[23].mxu0  ;;  %v424_v63 = vld [vmem:[%s2540_s12 + $0x88] sm:$0xff] }
 0x179   : > { %v1898_v5 = vadd.f32 %v1897_v3, %v1896_v0  ;;  %v2009_v6 = vpop.f32.mrb[23].mxu1 }
 0x17a   : > { %v1315_v7 = vadd.f32 %v2007_v1, %v1895_v62  ;;  %v2010_v8 = vadd.f32 %v2009_v6, %v2008_v2 }
 0x17c   : > { %v1411_v10 = vadd.f32 %v1315_v7, %v417_v4  ;;  %v1318_v11 = vadd.f32 %v2010_v8, %v1898_v5 }
 0x17d   : > { %v1899_v12 = vpop.f32.mrb[24].mxu0 }
 0x17e   : > { %1443 = vst [vmem:[%s2540_s12 + $0x50] sm:$0xff] %v1411_v10  ;;  %v1412_v13 = vadd.f32 %v1318_v11, %v418_v9  ;;  %v2011_v14 = vpop.f32.mrb[24].mxu1  ;;  %v1900_v15 = vpop.f32.mrb[25].mxu0 }
 0x17f   : > { %v1901_v16 = vadd.f32 %v1900_v15, %v1899_v12  ;;  %v2012_v17 = vpop.f32.mrb[25].mxu1  ;;  %v1902_v18 = vpop.f32.mrb[26].mxu0  ;;  %v425_v12 = vld [vmem:[%s2540_s12 + $0x90] sm:$0xff] }
 0x180   : > { %1444 = vst [vmem:[%s2540_s12 + $0x58] sm:$0xff] %v1412_v13  ;;  %v2013_v19 = vadd.f32 %v2012_v17, %v2011_v14  ;;  %v2014_v20 = vpop.f32.mrb[26].mxu1  ;;  %v1903_v21 = vpop.f32.mrb[27].mxu0  ;;  %v426_v17 = vld [vmem:[%s2540_s12 + $0x98] sm:$0xff] }
 0x181   : > { %v1904_v23 = vadd.f32 %v1903_v21, %v1902_v18  ;;  %v2015_v24 = vpop.f32.mrb[27].mxu1 }
 0x182   : > { %v1323_v25 = vadd.f32 %v2013_v19, %v1901_v16  ;;  %v2016_v26 = vadd.f32 %v2015_v24, %v2014_v20 }
 0x184   : > { %v1413_v28 = vadd.f32 %v1323_v25, %v419_v22  ;;  %v1326_v29 = vadd.f32 %v2016_v26, %v1904_v23 }
 0x185   : > { %v1905_v30 = vpop.f32.mrb[28].mxu0 }
 0x186   : > { %1445 = vst [vmem:[%s2540_s12 + $0x60] sm:$0xff] %v1413_v28  ;;  %v1414_v31 = vadd.f32 %v1326_v29, %v420_v27  ;;  %v2017_v32 = vpop.f32.mrb[28].mxu1  ;;  %v1906_v33 = vpop.f32.mrb[29].mxu0 }
 0x187   : > { %v1907_v34 = vadd.f32 %v1906_v33, %v1905_v30  ;;  %v2018_v35 = vpop.f32.mrb[29].mxu1  ;;  %v1908_v36 = vpop.f32.mrb[30].mxu0  ;;  %v427_v30 = vld [vmem:[%s2540_s12 + $0xa0] sm:$0xff] }
 0x188   : > { %1446 = vst [vmem:[%s2540_s12 + $0x68] sm:$0xff] %v1414_v31  ;;  %v2019_v37 = vadd.f32 %v2018_v35, %v2017_v32  ;;  %v2020_v38 = vpop.f32.mrb[30].mxu1  ;;  %v1909_v39 = vpop.f32.mrb[31].mxu0  ;;  %v428_v35 = vld [vmem:[%s2540_s12 + $0xa8] sm:$0xff] }
 0x189   : > { %v1910_v41 = vadd.f32 %v1909_v39, %v1908_v36  ;;  %v2021_v42 = vpop.f32.mrb[31].mxu1 }
 0x18a   : > { %v1331_v43 = vadd.f32 %v2019_v37, %v1907_v34  ;;  %v2022_v44 = vadd.f32 %v2021_v42, %v2020_v38 }
 0x18c   : > { %v1415_v46 = vadd.f32 %v1331_v43, %v421_v40  ;;  %v1334_v47 = vadd.f32 %v2022_v44, %v1910_v41 }
 0x18d   : > { %v1911_v48 = vpop.f32.mrb[32].mxu0 }
 0x18e   : > { %1447 = vst [vmem:[%s2540_s12 + $0x70] sm:$0xff] %v1415_v46  ;;  %v1416_v49 = vadd.f32 %v1334_v47, %v422_v45  ;;  %v2023_v50 = vpop.f32.mrb[32].mxu1  ;;  %v1912_v51 = vpop.f32.mrb[33].mxu0 }
 0x18f   : > { %v1913_v52 = vadd.f32 %v1912_v51, %v1911_v48  ;;  %v2024_v53 = vpop.f32.mrb[33].mxu1  ;;  %v1914_v54 = vpop.f32.mrb[34].mxu0  ;;  %v429_v48 = vld [vmem:[%s2540_s12 + $0xb0] sm:$0xff] }
 0x190   : > { %1448 = vst [vmem:[%s2540_s12 + $0x78] sm:$0xff] %v1416_v49  ;;  %v2025_v55 = vadd.f32 %v2024_v53, %v2023_v50  ;;  %v2026_v56 = vpop.f32.mrb[34].mxu1  ;;  %v1915_v57 = vpop.f32.mrb[35].mxu0  ;;  %v430_v53 = vld [vmem:[%s2540_s12 + $0xb8] sm:$0xff] }
 0x191   : > { %v1916_v59 = vadd.f32 %v1915_v57, %v1914_v54  ;;  %v2027_v60 = vpop.f32.mrb[35].mxu1 }
 0x192   : > { %v1339_v61 = vadd.f32 %v2025_v55, %v1913_v52  ;;  %v2028_v62 = vadd.f32 %v2027_v60, %v2026_v56 }
 0x194   : > { %v1417_v0 = vadd.f32 %v1339_v61, %v423_v58  ;;  %v1342_v1 = vadd.f32 %v2028_v62, %v1916_v59 }
 0x195   : > { %v1917_v2 = vpop.f32.mrb[36].mxu0 }
 0x196   : > { %1449 = vst [vmem:[%s2540_s12 + $0x80] sm:$0xff] %v1417_v0  ;;  %v1418_v3 = vadd.f32 %v1342_v1, %v424_v63  ;;  %v2029_v4 = vpop.f32.mrb[36].mxu1  ;;  %v1918_v5 = vpop.f32.mrb[37].mxu0 }
 0x197   : > { %v1919_v6 = vadd.f32 %v1918_v5, %v1917_v2  ;;  %v2030_v7 = vpop.f32.mrb[37].mxu1  ;;  %v1920_v8 = vpop.f32.mrb[38].mxu0  ;;  %v431_v2 = vld [vmem:[%s2540_s12 + $0xc0] sm:$0xff] }
 0x198   : > { %1450 = vst [vmem:[%s2540_s12 + $0x88] sm:$0xff] %v1418_v3  ;;  %v2031_v9 = vadd.f32 %v2030_v7, %v2029_v4  ;;  %v2032_v10 = vpop.f32.mrb[38].mxu1  ;;  %v1921_v11 = vpop.f32.mrb[39].mxu0  ;;  %v432_v7 = vld [vmem:[%s2540_s12 + $0xc8] sm:$0xff] }
 0x199   : > { %v1922_v13 = vadd.f32 %v1921_v11, %v1920_v8  ;;  %v2033_v14 = vpop.f32.mrb[39].mxu1 }
 0x19a   : > { %v1347_v15 = vadd.f32 %v2031_v9, %v1919_v6  ;;  %v2034_v16 = vadd.f32 %v2033_v14, %v2032_v10 }
 0x19c   : > { %v1419_v18 = vadd.f32 %v1347_v15, %v425_v12  ;;  %v1350_v19 = vadd.f32 %v2034_v16, %v1922_v13 }
 0x19d   : > { %v1923_v20 = vpop.f32.mrb[40].mxu0 }
 0x19e   : > { %1451 = vst [vmem:[%s2540_s12 + $0x90] sm:$0xff] %v1419_v18  ;;  %v1420_v21 = vadd.f32 %v1350_v19, %v426_v17  ;;  %v2035_v22 = vpop.f32.mrb[40].mxu1  ;;  %v1924_v23 = vpop.f32.mrb[41].mxu0 }
 0x19f   : > { %v1925_v24 = vadd.f32 %v1924_v23, %v1923_v20  ;;  %v2036_v25 = vpop.f32.mrb[41].mxu1  ;;  %v1926_v26 = vpop.f32.mrb[42].mxu0  ;;  %v433_v20 = vld [vmem:[%s2540_s12 + $0xd0] sm:$0xff] }
 0x1a0   : > { %1452 = vst [vmem:[%s2540_s12 + $0x98] sm:$0xff] %v1420_v21  ;;  %v2037_v27 = vadd.f32 %v2036_v25, %v2035_v22  ;;  %v2038_v28 = vpop.f32.mrb[42].mxu1  ;;  %v1927_v29 = vpop.f32.mrb[43].mxu0  ;;  %v434_v25 = vld [vmem:[%s2540_s12 + $0xd8] sm:$0xff] }
 0x1a1   : > { %v1928_v31 = vadd.f32 %v1927_v29, %v1926_v26  ;;  %v2039_v32 = vpop.f32.mrb[43].mxu1 }
 0x1a2   : > { %v1355_v33 = vadd.f32 %v2037_v27, %v1925_v24  ;;  %v2040_v34 = vadd.f32 %v2039_v32, %v2038_v28 }
 0x1a4   : > { %v1421_v36 = vadd.f32 %v1355_v33, %v427_v30  ;;  %v1358_v37 = vadd.f32 %v2040_v34, %v1928_v31 }
 0x1a5   : > { %v1929_v38 = vpop.f32.mrb[44].mxu0 }
 0x1a6   : > { %1453 = vst [vmem:[%s2540_s12 + $0xa0] sm:$0xff] %v1421_v36  ;;  %v1422_v39 = vadd.f32 %v1358_v37, %v428_v35  ;;  %v2041_v40 = vpop.f32.mrb[44].mxu1  ;;  %v1930_v41 = vpop.f32.mrb[45].mxu0 }
 0x1a7   : > { %v1931_v42 = vadd.f32 %v1930_v41, %v1929_v38  ;;  %v2042_v43 = vpop.f32.mrb[45].mxu1  ;;  %v1932_v44 = vpop.f32.mrb[46].mxu0  ;;  %v435_v38 = vld [vmem:[%s2540_s12 + $0xe0] sm:$0xff] }
 0x1a8   : > { %1454 = vst [vmem:[%s2540_s12 + $0xa8] sm:$0xff] %v1422_v39  ;;  %v2043_v45 = vadd.f32 %v2042_v43, %v2041_v40  ;;  %v2044_v46 = vpop.f32.mrb[46].mxu1  ;;  %v1933_v47 = vpop.f32.mrb[47].mxu0  ;;  %v436_v43 = vld [vmem:[%s2540_s12 + $0xe8] sm:$0xff] }
 0x1a9   : > { %v1934_v49 = vadd.f32 %v1933_v47, %v1932_v44  ;;  %v2045_v50 = vpop.f32.mrb[47].mxu1 }
 0x1aa   : > { %v1363_v51 = vadd.f32 %v2043_v45, %v1931_v42  ;;  %v2046_v52 = vadd.f32 %v2045_v50, %v2044_v46 }
 0x1ac   : > { %v1423_v54 = vadd.f32 %v1363_v51, %v429_v48  ;;  %v1366_v55 = vadd.f32 %v2046_v52, %v1934_v49 }
 0x1ad   : > { %v1935_v56 = vpop.f32.mrb[48].mxu0 }
 0x1ae   : > { %1455 = vst [vmem:[%s2540_s12 + $0xb0] sm:$0xff] %v1423_v54  ;;  %v1424_v57 = vadd.f32 %v1366_v55, %v430_v53  ;;  %v2047_v58 = vpop.f32.mrb[48].mxu1  ;;  %v1936_v59 = vpop.f32.mrb[49].mxu0 }
 0x1af   : > { %v1937_v60 = vadd.f32 %v1936_v59, %v1935_v56  ;;  %v2048_v61 = vpop.f32.mrb[49].mxu1  ;;  %v1938_v62 = vpop.f32.mrb[50].mxu0  ;;  %v437_v56 = vld [vmem:[%s2540_s12 + $0xf0] sm:$0xff] }
 0x1b0   : > { %1456 = vst [vmem:[%s2540_s12 + $0xb8] sm:$0xff] %v1424_v57  ;;  %v2049_v63 = vadd.f32 %v2048_v61, %v2047_v58  ;;  %v2050_v0 = vpop.f32.mrb[50].mxu1  ;;  %v1939_v1 = vpop.f32.mrb[51].mxu0  ;;  %v438_v61 = vld [vmem:[%s2540_s12 + $0xf8] sm:$0xff] }
 0x1b1   : > { %v1940_v3 = vadd.f32 %v1939_v1, %v1938_v62  ;;  %v2051_v4 = vpop.f32.mrb[51].mxu1  ;;  %v1469_v1 = vld [vmem:[%s2540_s12] sm:$0xff] (!%p1843_p0) }
 0x1b2   : > { %v1371_v5 = vadd.f32 %v2049_v63, %v1937_v60  ;;  %v2052_v6 = vadd.f32 %v2051_v4, %v2050_v0  ;;  %v1472_v4 = vld [vmem:[%s2540_s12 + $0x18] sm:$0xff] (!%p1843_p0) }
 0x1b4   : > { %v1425_v8 = vadd.f32 %v1371_v5, %v431_v2  ;;  %v1374_v9 = vadd.f32 %v2052_v6, %v1940_v3  ;;  %v1470_v2 = vld [vmem:[%s2540_s12 + $0x8] sm:$0xff] (!%p1843_p0)  ;;  %v1471_v3 = vld [vmem:[%s2540_s12 + $0x10] sm:$0xff] (!%p1843_p0)  ;;  %v1538_v6 = vmul.f32 (!%p1843_p0), %v1469_v1, %v1469_v1 }
 0x1b5   : > { %v1941_v10 = vpop.f32.mrb[52].mxu0  ;;  %v1501_v5 = vadd.f32 (!%p1843_p0), %v1470_v2, %v1469_v1  ;;  %v1487_v1 = vld [vmem:[%s2540_s12 + $0x90] sm:$0xff] (!%p1843_p0) }
 0x1b6   : > { %1457 = vst [vmem:[%s2540_s12 + $0xc0] sm:$0xff] %v1425_v8  ;;  %v1426_v11 = vadd.f32 %v1374_v9, %v432_v7  ;;  %v2053_v12 = vpop.f32.mrb[52].mxu1  ;;  %v1942_v13 = vpop.f32.mrb[53].mxu0  ;;  %v1539_v7 = vmul.f32 (!%p1843_p0), %v1470_v2, %v1470_v2  ;;  %v1540_v8 = vmul.f32 (!%p1843_p0), %v1471_v3, %v1471_v3  ;;  %v1473_v9 = vld [vmem:[%s2540_s12 + $0x20] sm:$0xff] (!%p1843_p0) }
 0x1b7   : > { %v1943_v14 = vadd.f32 %v1942_v13, %v1941_v10  ;;  %v2054_v15 = vpop.f32.mrb[53].mxu1  ;;  %v1944_v16 = vpop.f32.mrb[54].mxu0  ;;  %v1502_v10 = vadd.f32 (!%p1843_p0), %v1501_v5, %v1471_v3  ;;  %v1474_v13 = vld [vmem:[%s2540_s12 + $0x28] sm:$0xff] (!%p1843_p0)  ;;  %v1488_v5 = vld [vmem:[%s2540_s12 + $0x98] sm:$0xff] (!%p1843_p0) }
 0x1b8   : > { %1458 = vst [vmem:[%s2540_s12 + $0xc8] sm:$0xff] %v1426_v11  ;;  %v2055_v17 = vadd.f32 %v2054_v15, %v2053_v12  ;;  %v2056_v18 = vpop.f32.mrb[54].mxu1  ;;  %v1945_v19 = vpop.f32.mrb[55].mxu0  ;;  %v1541_v11 = vmul.f32 (!%p1843_p0), %v1472_v4, %v1472_v4  ;;  %v1570_v12 = vadd.f32 (!%p1843_p0), %v1539_v7, %v1538_v6  ;;  %v1542_v15 = vmul.f32 (!%p1843_p0), %v1473_v9, %v1473_v9 }
 0x1b9   : > { %v1946_v21 = vadd.f32 %v1945_v19, %v1944_v16  ;;  %v2057_v22 = vpop.f32.mrb[55].mxu1  ;;  %v1543_v19 = vmul.f32 (!%p1843_p0), %v1474_v13, %v1474_v13  ;;  %v1556_v7 = vmul.f32 (!%p1843_p0), %v1487_v1, %v1487_v1 }
 0x1ba   : > { %v1379_v23 = vadd.f32 %v2055_v17, %v1943_v14  ;;  %v2058_v24 = vadd.f32 %v2057_v22, %v2056_v18  ;;  %v1503_v14 = vadd.f32 (!%p1843_p0), %v1502_v10, %v1472_v4  ;;  %v1571_v16 = vadd.f32 (!%p1843_p0), %v1570_v12, %v1540_v8  ;;  %v1475_v17 = vld [vmem:[%s2540_s12 + $0x30] sm:$0xff] (!%p1843_p0) }
 0x1bc   : > { %v1427_v26 = vadd.f32 %v1379_v23, %v433_v20  ;;  %v1382_v27 = vadd.f32 %v2058_v24, %v1946_v21  ;;  %v1504_v18 = vadd.f32 (!%p1843_p0), %v1503_v14, %v1473_v9  ;;  %v1572_v20 = vadd.f32 (!%p1843_p0), %v1571_v16, %v1541_v11  ;;  %v1476_v21 = vld [vmem:[%s2540_s12 + $0x38] sm:$0xff] (!%p1843_p0)  ;;  %v1489_v9 = vld [vmem:[%s2540_s12 + $0xa0] sm:$0xff] (!%p1843_p0) }
 0x1bd   : > { %v1947_v28 = vpop.f32.mrb[56].mxu0  ;;  %v1544_v23 = vmul.f32 (!%p1843_p0), %v1475_v17, %v1475_v17  ;;  %v1557_v11 = vmul.f32 (!%p1843_p0), %v1488_v5, %v1488_v5 }
 0x1be   : > { %1459 = vst [vmem:[%s2540_s12 + $0xd0] sm:$0xff] %v1427_v26  ;;  %v1428_v29 = vadd.f32 %v1382_v27, %v434_v25  ;;  %v2059_v30 = vpop.f32.mrb[56].mxu1  ;;  %v1948_v31 = vpop.f32.mrb[57].mxu0  ;;  %v1505_v22 = vadd.f32 (!%p1843_p0), %v1504_v18, %v1474_v13  ;;  %v1573_v24 = vadd.f32 (!%p1843_p0), %v1572_v20, %v1542_v15  ;;  %v1477_v25 = vld [vmem:[%s2540_s12 + $0x40] sm:$0xff] (!%p1843_p0)  ;;  %v1545_v27 = vmul.f32 (!%p1843_p0), %v1476_v21, %v1476_v21  ;;  %v1490_v13 = vld [vmem:[%s2540_s12 + $0xa8] sm:$0xff] (!%p1843_p0) }
 0x1bf   : > { %v1949_v32 = vadd.f32 %v1948_v31, %v1947_v28  ;;  %v2060_v33 = vpop.f32.mrb[57].mxu1  ;;  %v1950_v34 = vpop.f32.mrb[58].mxu0  ;;  %v1546_v31 = vmul.f32 (!%p1843_p0), %v1477_v25, %v1477_v25  ;;  %v1558_v15 = vmul.f32 (!%p1843_p0), %v1489_v9, %v1489_v9 }
 0x1c0   : > { %1460 = vst [vmem:[%s2540_s12 + $0xd8] sm:$0xff] %v1428_v29  ;;  %v2061_v35 = vadd.f32 %v2060_v33, %v2059_v30  ;;  %v2062_v36 = vpop.f32.mrb[58].mxu1  ;;  %v1951_v37 = vpop.f32.mrb[59].mxu0  ;;  %v1506_v26 = vadd.f32 (!%p1843_p0), %v1505_v22, %v1475_v17  ;;  %v1574_v28 = vadd.f32 (!%p1843_p0), %v1573_v24, %v1543_v19  ;;  %v1478_v29 = vld [vmem:[%s2540_s12 + $0x48] sm:$0xff] (!%p1843_p0)  ;;  %v1479_v33 = vld [vmem:[%s2540_s12 + $0x50] sm:$0xff] (!%p1843_p0)  ;;  %v1559_v19 = vmul.f32 (!%p1843_p0), %v1490_v13, %v1490_v13 }
 0x1c1   : > { %v1952_v39 = vadd.f32 %v1951_v37, %v1950_v34  ;;  %v2063_v40 = vpop.f32.mrb[59].mxu1  ;;  %v1480_v37 = vld [vmem:[%s2540_s12 + $0x58] sm:$0xff] (!%p1843_p0)  ;;  %v1491_v17 = vld [vmem:[%s2540_s12 + $0xb0] sm:$0xff] (!%p1843_p0) }
 0x1c2   : > { %v1387_v41 = vadd.f32 %v2061_v35, %v1949_v32  ;;  %v2064_v42 = vadd.f32 %v2063_v40, %v2062_v36  ;;  %v1507_v30 = vadd.f32 (!%p1843_p0), %v1506_v26, %v1476_v21  ;;  %v1575_v32 = vadd.f32 (!%p1843_p0), %v1574_v28, %v1544_v23  ;;  %v1492_v21 = vld [vmem:[%s2540_s12 + $0xb8] sm:$0xff] (!%p1843_p0) }
 0x1c3   : > { %v1547_v35 = vmul.f32 (!%p1843_p0), %v1478_v29, %v1478_v29  ;;  %v1560_v23 = vmul.f32 (!%p1843_p0), %v1491_v17, %v1491_v17 }
 0x1c4   : > { %v1429_v44 = vadd.f32 %v1387_v41, %v435_v38  ;;  %v1390_v45 = vadd.f32 %v2064_v42, %v1952_v39  ;;  %v1508_v34 = vadd.f32 (!%p1843_p0), %v1507_v30, %v1477_v25  ;;  %v1576_v36 = vadd.f32 (!%p1843_p0), %v1575_v32, %v1545_v27  ;;  %v1481_v41 = vld [vmem:[%s2540_s12 + $0x60] sm:$0xff] (!%p1843_p0) }
 0x1c5   : > { %v1953_v46 = vpop.f32.mrb[60].mxu0  ;;  %v1548_v39 = vmul.f32 (!%p1843_p0), %v1479_v33, %v1479_v33  ;;  %v1493_v25 = vld [vmem:[%s2540_s12 + $0xc0] sm:$0xff] (!%p1843_p0)  ;;  %v1561_v27 = vmul.f32 (!%p1843_p0), %v1492_v21, %v1492_v21 }
 0x1c6   : > { %1461 = vst [vmem:[%s2540_s12 + $0xe0] sm:$0xff] %v1429_v44  ;;  %v1430_v47 = vadd.f32 %v1390_v45, %v436_v43  ;;  %v2065_v48 = vpop.f32.mrb[60].mxu1  ;;  %v1954_v49 = vpop.f32.mrb[61].mxu0  ;;  %v1509_v38 = vadd.f32 (!%p1843_p0), %v1508_v34, %v1478_v29  ;;  %v1577_v40 = vadd.f32 (!%p1843_p0), %v1576_v36, %v1546_v31  ;;  %v1549_v43 = vmul.f32 (!%p1843_p0), %v1480_v37, %v1480_v37  ;;  %v1482_v45 = vld [vmem:[%s2540_s12 + $0x68] sm:$0xff] (!%p1843_p0) }
 0x1c7   : > { %v1955_v50 = vadd.f32 %v1954_v49, %v1953_v46  ;;  %v2066_v51 = vpop.f32.mrb[61].mxu1  ;;  %v1956_v52 = vpop.f32.mrb[62].mxu0  ;;  %v1483_v49 = vld [vmem:[%s2540_s12 + $0x70] sm:$0xff] (!%p1843_p0)  ;;  %v1494_v29 = vld [vmem:[%s2540_s12 + $0xc8] sm:$0xff] (!%p1843_p0)  ;;  %v1562_v31 = vmul.f32 (!%p1843_p0), %v1493_v25, %v1493_v25 }
 0x1c8   : > { %1462 = vst [vmem:[%s2540_s12 + $0xe8] sm:$0xff] %v1430_v47  ;;  %v2067_v53 = vadd.f32 %v2066_v51, %v2065_v48  ;;  %v2068_v54 = vpop.f32.mrb[62].mxu1  ;;  %v1957_v55 = vpop.f32.mrb[63].mxu0  ;;  %v1510_v42 = vadd.f32 (!%p1843_p0), %v1509_v38, %v1479_v33  ;;  %v1578_v44 = vadd.f32 (!%p1843_p0), %v1577_v40, %v1547_v35  ;;  %v1550_v47 = vmul.f32 (!%p1843_p0), %v1481_v41, %v1481_v41  ;;  %v1495_v33 = vld [vmem:[%s2540_s12 + $0xd0] sm:$0xff] (!%p1843_p0) }
 0x1c9   : > { %v1958_v57 = vadd.f32 %v1957_v55, %v1956_v52  ;;  %v2069_v58 = vpop.f32.mrb[63].mxu1  ;;  %v1551_v51 = vmul.f32 (!%p1843_p0), %v1482_v45, %v1482_v45  ;;  %v1552_v55 = vmul.f32 (!%p1843_p0), %v1483_v49, %v1483_v49  ;;  %v1563_v35 = vmul.f32 (!%p1843_p0), %v1494_v29, %v1494_v29 }
 0x1ca   : > { %v1395_v59 = vadd.f32 %v2067_v53, %v1955_v50  ;;  %v2070_v60 = vadd.f32 %v2069_v58, %v2068_v54  ;;  %1468 = sbr.rel (%p1843_p0) target bundleno = 516 (0x204), region = 59  ;;  %v1511_v46 = vadd.f32 (!%p1843_p0), %v1510_v42, %v1480_v37  ;;  %v1579_v48 = vadd.f32 (!%p1843_p0), %v1578_v44, %v1548_v39  ;;  %v1484_v53 = vld [vmem:[%s2540_s12 + $0x78] sm:$0xff] (!%p1843_p0) }
 0x1cb   : > { %v1496_v37 = vld [vmem:[%s2540_s12 + $0xd8] sm:$0xff] (!%p1843_p0)  ;;  %v1564_v39 = vmul.f32 (!%p1843_p0), %v1495_v33, %v1495_v33 }
 0x1cc   : > { %v1431_v62 = vadd.f32 %v1395_v59, %v437_v56  ;;  %v1398_v63 = vadd.f32 %v2070_v60, %v1958_v57  ;;  %v1512_v50 = vadd.f32 (!%p1843_p0), %v1511_v46, %v1481_v41  ;;  %v1580_v52 = vadd.f32 (!%p1843_p0), %v1579_v48, %v1549_v43  ;;  %v1485_v57 = vld [vmem:[%s2540_s12 + $0x80] sm:$0xff] (!%p1843_p0) }
 0x1cd   : > { %v1553_v59 = vmul.f32 (!%p1843_p0), %v1484_v53, %v1484_v53  ;;  %v1497_v41 = vld [vmem:[%s2540_s12 + $0xe0] sm:$0xff] (!%p1843_p0)  ;;  %v1565_v43 = vmul.f32 (!%p1843_p0), %v1496_v37, %v1496_v37 }
 0x1ce   : > { %1463 = vst [vmem:[%s2540_s12 + $0xf0] sm:$0xff] %v1431_v62  ;;  %v1432_v0 = vadd.f32 %v1398_v63, %v438_v61  ;;  %v1513_v54 = vadd.f32 (!%p1843_p0), %v1512_v50, %v1482_v45  ;;  %v1581_v56 = vadd.f32 (!%p1843_p0), %v1580_v52, %v1550_v47  ;;  %v1486_v61 = vld [vmem:[%s2540_s12 + $0x88] sm:$0xff] (!%p1843_p0)  ;;  %v1554_v63 = vmul.f32 (!%p1843_p0), %v1485_v57, %v1485_v57 }
 0x1cf   : > { %v1555_v3 = vmul.f32 (!%p1843_p0), %v1486_v61, %v1486_v61  ;;  %v1498_v45 = vld [vmem:[%s2540_s12 + $0xe8] sm:$0xff] (!%p1843_p0)  ;;  %v1566_v47 = vmul.f32 (!%p1843_p0), %v1497_v41, %v1497_v41 }
 0x1d0   : > { %1464 = vst [vmem:[%s2540_s12 + $0xf8] sm:$0xff] %v1432_v0  ;;  %v1514_v58 = vadd.f32 (!%p1843_p0), %v1513_v54, %v1483_v49  ;;  %v1582_v60 = vadd.f32 (!%p1843_p0), %v1581_v56, %v1551_v51  ;;  %v1567_v51 = vmul.f32 (!%p1843_p0), %v1498_v45, %v1498_v45 }
 0x1d2   : > { %v1515_v62 = vadd.f32 %v1514_v58, %v1484_v53  ;;  %v1583_v0 = vadd.f32 %v1582_v60, %v1552_v55 }
 0x1d4   : > { %v1516_v2 = vadd.f32 %v1515_v62, %v1485_v57  ;;  %v1584_v4 = vadd.f32 %v1583_v0, %v1553_v59 }
 0x1d5   : > { %v1499_v49 = vld [vmem:[%s2540_s12 + $0xf0] sm:$0xff] }
 0x1d6   : > { %v1517_v6 = vadd.f32 %v1516_v2, %v1486_v61  ;;  %v1585_v8 = vadd.f32 %v1584_v4, %v1554_v63  ;;  %v1568_v55 = vmul.f32 %v1499_v49, %v1499_v49 }
 0x1d7   : > { %v1500_v53 = vld [vmem:[%s2540_s12 + $0xf8] sm:$0xff] }
 0x1d8   : > { %v1518_v10 = vadd.f32 %v1517_v6, %v1487_v1  ;;  %v1586_v12 = vadd.f32 %v1585_v8, %v1555_v3  ;;  %v1569_v58 = vmul.f32 %v1500_v53, %v1500_v53 }
 0x1da   : > { %v1519_v14 = vadd.f32 %v1518_v10, %v1488_v5  ;;  %v1587_v16 = vadd.f32 %v1586_v12, %v1556_v7 }
 0x1dc   : > { %v1520_v18 = vadd.f32 %v1519_v14, %v1489_v9  ;;  %v1588_v20 = vadd.f32 %v1587_v16, %v1557_v11 }
 0x1de   : > { %v1521_v22 = vadd.f32 %v1520_v18, %v1490_v13  ;;  %v1589_v24 = vadd.f32 %v1588_v20, %v1558_v15 }
 0x1e0   : > { %v1522_v26 = vadd.f32 %v1521_v22, %v1491_v17  ;;  %v1590_v28 = vadd.f32 %v1589_v24, %v1559_v19 }
 0x1e2   : > { %v1523_v30 = vadd.f32 %v1522_v26, %v1492_v21  ;;  %v1591_v32 = vadd.f32 %v1590_v28, %v1560_v23 }
 0x1e4   : > { %v1524_v34 = vadd.f32 %v1523_v30, %v1493_v25  ;;  %v1592_v36 = vadd.f32 %v1591_v32, %v1561_v27 }
 0x1e6   : > { %v1525_v38 = vadd.f32 %v1524_v34, %v1494_v29  ;;  %v1593_v40 = vadd.f32 %v1592_v36, %v1562_v31 }
 0x1e8   : > { %v1526_v42 = vadd.f32 %v1525_v38, %v1495_v33  ;;  %v1594_v44 = vadd.f32 %v1593_v40, %v1563_v35 }
 0x1ea   : > { %v1527_v46 = vadd.f32 %v1526_v42, %v1496_v37  ;;  %v1595_v48 = vadd.f32 %v1594_v44, %v1564_v39 }
 0x1ec   : > { %v1528_v50 = vadd.f32 %v1527_v46, %v1497_v41  ;;  %v1596_v52 = vadd.f32 %v1595_v48, %v1565_v43 }
 0x1ee   : > { %v1529_v54 = vadd.f32 %v1528_v50, %v1498_v45  ;;  %v1597_v56 = vadd.f32 %v1596_v52, %v1566_v47 }
 0x1f0   : > { %v1530_v57 = vadd.f32 %v1529_v54, %v1499_v49  ;;  %v1598_v59 = vadd.f32 %v1597_v56, %v1567_v51 }
 0x1f2   : > { %v1531_v60 = vadd.f32 %v1530_v57, %v1500_v53  ;;  %v1599_v61 = vadd.f32 %v1598_v59, %v1568_v55 }
 0x1f4   : > { %v1532_v62 = vrot.slane %v1531_v60, 4  ;;  %v1600_v63 = vadd.f32 %v1599_v61, %v1569_v58 }
 0x1f6   : > { %v1533_v0 = vadd.f32 %v1532_v62, %v1531_v60  ;;  %v1601_v1 = vrot.slane %v1600_v63, 4 }
 0x1f8   : > { %v1534_v2 = vrot.slane %v1533_v0, 2  ;;  %v1602_v3 = vadd.f32 %v1601_v1, %v1600_v63 }
 0x1fa   : > { %v1535_v4 = vadd.f32 %v1534_v2, %v1533_v0  ;;  %v1603_v5 = vrot.slane %v1602_v3, 2 }
 0x1fc   : > { %v1536_v6 = vrot.slane %v1535_v4, 1  ;;  %v1604_v7 = vadd.f32 %v1603_v5, %v1602_v3 }
 0x1fe   : > { %v1537_v8 = vadd.f32 %v1536_v6, %v1535_v4  ;;  %v1605_v9 = vrot.slane %v1604_v7, 1 }
 0x200   : > { %v1606_v10 = vadd.f32 %v1605_v9, %v1604_v7 }
 0x202   : > { %v1608_v11 = vsel %vm1607_vm0, %v1537_v8, %v1606_v10 }
 0x203   : > { %1609 = vst [vmem:[%s2545_s6] sm:$0x3] %v1608_v11 }
 0x204 PF: > { %s14_s18 = sadd.s32 1, %s2310_s18   ;;  %s2801_s12 = smov %s2290_s13 }
 0x205   : > { %p11_p1 = scmp.ge.s32.totalorder %s14_s18, 10   ;;  %s2802_s13 = smov %s2384_s25 }
 0x206   : > { %s2803_s14 = smov %s2302_s16  ;;  %s2804_s15 = smov %s2306_s17 }
 0x207   : > { %s2805_s16 = smov %s2808_s19  ;;  %s2806_s17 = smov %s2812_s20 }
 0x208   :  { %13 = sbr.rel (!%p11_p1) target bundleno = 4 (0x4), region = 109 }

// kernel: discriminator_forward.10
= control target key start
LH: loop header
LB: loop body
LE: loop exit
PB: predicated region body
PF: predicated region fallthrough
CT: control target
= control target key end

     0   :  { %s804_s12 = smov 0   ;;  %s952_s0 = inlined_call_operand.vmem [shape: f32[512,128], index: 0, kind: input, shape index: {}]   ;;  %s953_s1 = inlined_call_operand.vmem [shape: f32[1,128], index: 1, kind: input, shape index: {}]   ;;  %s954_s2 = inlined_call_operand.vmem [shape: f32[1,128], index: 2, kind: input, shape index: {}]   ;;  %s955_s3 = inlined_call_operand.vmem [shape: bf16[512,128], index: 3, kind: output, shape index: {}]  }
   0x1 LB: > { %s596_s13 = sadd.s32 4294967295, %s782_s12   ;;  %p600_p0 = scmp.ge.s32.totalorder %s782_s12, 1  ;;  %s782_s12 = sphi %s804_s12, %s13_s12  }
   0x2   : > { %p138_p1 = scmp.lt.s32.totalorder %s782_s12, 3 }
   0x4   : > { %p139_p2 = pnand %p600_p0, %p138_p1 }
   0x5   : > { %s601_s14 = sshll.u32 (!%p139_p2), %s596_s13, 5  ;;  %v818_v0 = vld [vmem:[%s953_s1] ss:$0 sm:$0xff] (!%p139_p2) }
   0x6   : > { %142 = sbr.rel (%p139_p2) target bundleno = 67 (0x43), region = 32  ;;  %p163_p3 = scmp.lt.s32.totalorder (!%p139_p2), %s601_s14, 63  ;;  %v828_v1 = vld [vmem:[%s954_s2] ss:$0 sm:$0xff] (!%p139_p2) }
   0xd   : > { %s957_s14 = smov (!%p163_p3, %s601_s14), 63 }
   0xe   : > { %s602_s15 = sshll.u32 %s957_s14, 3  ;;  %s604_s23 = sshll.u32 %s957_s14, 2 }
   0xf   : > { %s823_s20 = scalar_lea.vmem %s952_s0, %s602_s15  ;;  %s856_s26 = scalar_lea.vmem %s955_s3, %s604_s23 }
  0x10   : > { %v174_v2 = vld [vmem:[%s823_s20] sm:$0xff]  ;;  %v175_v3 = vld [vmem:[%s823_s20 + $0x8] sm:$0xff]  ;;  %v176_v4 = vld [vmem:[%s823_s20 + $0x10] sm:$0xff] }
  0x11   : > { %v213_v5 = vmul.f32 %v818_v0, %v174_v2  ;;  %v214_v6 = vmul.f32 %v818_v0, %v175_v3  ;;  %v177_v7 = vld [vmem:[%s823_s20 + $0x18] sm:$0xff]  ;;  %v215_v8 = vmul.f32 %v818_v0, %v176_v4  ;;  %v178_v9 = vld [vmem:[%s823_s20 + $0x20] sm:$0xff]  ;;  %v179_v10 = vld [vmem:[%s823_s20 + $0x28] sm:$0xff] }
  0x12   : > { %v216_v11 = vmul.f32 %v818_v0, %v177_v7  ;;  %v217_v12 = vmul.f32 %v818_v0, %v178_v9  ;;  %v218_v13 = vmul.f32 %v818_v0, %v179_v10  ;;  %v180_v14 = vld [vmem:[%s823_s20 + $0x30] sm:$0xff]  ;;  %v181_v15 = vld [vmem:[%s823_s20 + $0x38] sm:$0xff]  ;;  %v182_v30 = vld [vmem:[%s823_s20 + $0x40] sm:$0xff] }
  0x13   : > { %v252_v16 = vadd.f32 %v828_v1, %v213_v5  ;;  %v253_v17 = vadd.f32 %v828_v1, %v214_v6  ;;  %v254_v18 = vadd.f32 %v828_v1, %v215_v8  ;;  %v219_v19 = vmul.f32 %v818_v0, %v180_v14  ;;  %v183_v31 = vld [vmem:[%s823_s20 + $0x48] sm:$0xff]  ;;  %v184_v32 = vld [vmem:[%s823_s20 + $0x50] sm:$0xff]  ;;  %v185_v44 = vld [vmem:[%s823_s20 + $0x58] sm:$0xff] }
  0x14   : > { %v255_v20 = vadd.f32 %v828_v1, %v216_v11  ;;  %v256_v21 = vadd.f32 %v828_v1, %v217_v12  ;;  %v257_v22 = vadd.f32 %v828_v1, %v218_v13  ;;  %v220_v23 = vmul.f32 %v818_v0, %v181_v15  ;;  %v186_v46 = vld [vmem:[%s823_s20 + $0x60] sm:$0xff]  ;;  %v187_v56 = vld [vmem:[%s823_s20 + $0x68] sm:$0xff]  ;;  %v188_v60 = vld [vmem:[%s823_s20 + $0x70] sm:$0xff] }
  0x15   : > { %vm284_vm0 = vcmp.gt.f32.partialorder %v252_v16, 0.0  ;;  %vm285_vm1 = vcmp.gt.f32.partialorder %v253_v17, 0.0  ;;  %v316_v24 = vmul.f32 0.2, %v252_v16  ;;  %v317_v25 = vmul.f32 0.2, %v253_v17 }
  0x16   : > { %vm286_vm2 = vcmp.gt.f32.partialorder %v254_v18, 0.0  ;;  %vm287_vm3 = vcmp.gt.f32.partialorder %v255_v20, 0.0  ;;  %v318_v26 = vmul.f32 0.2, %v254_v18  ;;  %v319_v27 = vmul.f32 0.2, %v255_v20 }
  0x17   : > { %v348_v28 = vsel %vm284_vm0, %v252_v16, %v316_v24  ;;  %v349_v29 = vsel %vm285_vm1, %v253_v17, %v317_v25  ;;  %vm288_vm4 = vcmp.gt.f32.partialorder %v256_v21, 0.0  ;;  %vm289_vm5 = vcmp.gt.f32.partialorder %v257_v22, 0.0  ;;  %v189_v6 = vld [vmem:[%s823_s20 + $0x78] sm:$0xff]  ;;  %v190_v10 = vld [vmem:[%s823_s20 + $0x80] sm:$0xff] }
  0x18   : > { %v676_v33 = vpack.c.bf16 %v349_v29, %v348_v28  ;;  %v350_v34 = vsel %vm286_vm2, %v254_v18, %v318_v26  ;;  %v351_v35 = vsel %vm287_vm3, %v255_v20, %v319_v27  ;;  %v320_v36 = vmul.f32 0.2, %v256_v21  ;;  %v191_v18 = vld [vmem:[%s823_s20 + $0x88] sm:$0xff]  ;;  %v193_v26 = vld [vmem:[%s823_s20 + $0x98] sm:$0xff] }
  0x19   : > { %v681_v37 = vpack.c.bf16 %v351_v35, %v350_v34  ;;  %v321_v38 = vmul.f32 0.2, %v257_v22  ;;  %v258_v39 = vadd.f32 %v828_v1, %v219_v19  ;;  %v259_v40 = vadd.f32 %v828_v1, %v220_v23  ;;  %v192_v19 = vld [vmem:[%s823_s20 + $0x90] sm:$0xff] }
  0x1a   : > { %677 = vst [vmem:[%s856_s26] sm:$0xff] %v676_v33   ;;  %v352_v41 = vsel %vm288_vm4, %v256_v21, %v320_v36  ;;  %v221_v42 = vmul.f32 %v818_v0, %v182_v30  ;;  %v222_v43 = vmul.f32 %v818_v0, %v183_v31  ;;  %v223_v45 = vmul.f32 %v818_v0, %v184_v32  ;;  %v194_v31 = vld [vmem:[%s823_s20 + $0xa0] sm:$0xff]  ;;  %v195_v32 = vld [vmem:[%s823_s20 + $0xa8] sm:$0xff] }
  0x1b   : > { %753 = vst [vmem:[%s856_s26 + $0x8] sm:$0xff] %v681_v37   ;;  %v353_v47 = vsel %vm289_vm5, %v257_v22, %v321_v38  ;;  %vm290_vm6 = vcmp.gt.f32.partialorder %v258_v39, 0.0  ;;  %vm291_vm7 = vcmp.gt.f32.partialorder %v259_v40, 0.0  ;;  %v322_v48 = vmul.f32 0.2, %v258_v39 }
  0x1c   : > { %v686_v49 = vpack.c.bf16 %v353_v47, %v352_v41  ;;  %v323_v50 = vmul.f32 0.2, %v259_v40  ;;  %v260_v51 = vadd.f32 %v828_v1, %v221_v42  ;;  %v261_v52 = vadd.f32 %v828_v1, %v222_v43  ;;  %v196_v43 = vld [vmem:[%s823_s20 + $0xb0] sm:$0xff] }
  0x1d   : > { %v354_v53 = vsel %vm290_vm6, %v258_v39, %v322_v48  ;;  %v224_v54 = vmul.f32 %v818_v0, %v185_v44  ;;  %v262_v55 = vadd.f32 %v828_v1, %v223_v45  ;;  %v225_v57 = vmul.f32 %v818_v0, %v186_v46  ;;  %v197_v44 = vld [vmem:[%s823_s20 + $0xb8] sm:$0xff] }
  0x1e   : > { %754 = vst [vmem:[%s856_s26 + $0x10] sm:$0xff] %v686_v49   ;;  %v355_v58 = vsel %vm291_vm7, %v259_v40, %v323_v50  ;;  %vm292_vm8 = vcmp.gt.f32.partialorder %v260_v51, 0.0  ;;  %vm293_vm9 = vcmp.gt.f32.partialorder %v261_v52, 0.0  ;;  %v324_v59 = vmul.f32 0.2, %v260_v51 }
  0x1f   : > { %v691_v61 = vpack.c.bf16 %v355_v58, %v354_v53  ;;  %v325_v62 = vmul.f32 0.2, %v261_v52  ;;  %v263_v63 = vadd.f32 %v828_v1, %v224_v54  ;;  %vm294_vm10 = vcmp.gt.f32.partialorder %v262_v55, 0.0 }
  0x20   : > { %v356_v2 = vsel %vm292_vm8, %v260_v51, %v324_v59  ;;  %v326_v3 = vmul.f32 0.2, %v262_v55  ;;  %v226_v4 = vmul.f32 %v818_v0, %v187_v56  ;;  %v264_v5 = vadd.f32 %v828_v1, %v225_v57  ;;  %v199_v59 = vld [vmem:[%s823_s20 + $0xc8] sm:$0xff] }
  0x21   : > { %755 = vst [vmem:[%s856_s26 + $0x18] sm:$0xff] %v691_v61   ;;  %v357_v7 = vsel %vm293_vm9, %v261_v52, %v325_v62  ;;  %vm295_vm11 = vcmp.gt.f32.partialorder %v263_v63, 0.0  ;;  %v327_v8 = vmul.f32 0.2, %v263_v63  ;;  %v227_v9 = vmul.f32 %v818_v0, %v188_v60 }
  0x22   : > { %v696_v11 = vpack.c.bf16 %v357_v7, %v356_v2  ;;  %v358_v12 = vsel %vm294_vm10, %v262_v55, %v326_v3  ;;  %v265_v13 = vadd.f32 %v828_v1, %v226_v4  ;;  %vm296_vm12 = vcmp.gt.f32.partialorder %v264_v5, 0.0  ;;  %v198_v55 = vld [vmem:[%s823_s20 + $0xc0] sm:$0xff]  ;;  %v200_v4 = vld [vmem:[%s823_s20 + $0xd0] sm:$0xff] }
  0x23   : > { %v359_v14 = vsel %vm295_vm11, %v263_v63, %v327_v8  ;;  %v328_v15 = vmul.f32 0.2, %v264_v5  ;;  %v228_v16 = vmul.f32 %v818_v0, %v189_v6  ;;  %v266_v17 = vadd.f32 %v828_v1, %v227_v9  ;;  %v201_v9 = vld [vmem:[%s823_s20 + $0xd8] sm:$0xff] }
  0x24   : > { %756 = vst [vmem:[%s856_s26 + $0x20] sm:$0xff] %v696_v11   ;;  %v701_v20 = vpack.c.bf16 %v359_v14, %v358_v12  ;;  %vm297_vm13 = vcmp.gt.f32.partialorder %v265_v13, 0.0  ;;  %v329_v21 = vmul.f32 0.2, %v265_v13  ;;  %v229_v22 = vmul.f32 %v818_v0, %v190_v10  ;;  %v202_v10 = vld [vmem:[%s823_s20 + $0xe0] sm:$0xff]  ;;  %v203_v11 = vld [vmem:[%s823_s20 + $0xe8] sm:$0xff] }
  0x25   : > { %v360_v23 = vsel %vm296_vm12, %v264_v5, %v328_v15  ;;  %v267_v24 = vadd.f32 %v828_v1, %v228_v16  ;;  %vm298_vm14 = vcmp.gt.f32.partialorder %v266_v17, 0.0  ;;  %v330_v25 = vmul.f32 0.2, %v266_v17 }
  0x26   : > { %757 = vst [vmem:[%s856_s26 + $0x28] sm:$0xff] %v701_v20   ;;  %v361_v27 = vsel %vm297_vm13, %v265_v13, %v329_v21  ;;  %v230_v28 = vmul.f32 %v818_v0, %v191_v18  ;;  %v268_v29 = vadd.f32 %v828_v1, %v229_v22  ;;  %v231_v30 = vmul.f32 %v818_v0, %v192_v19  ;;  %v204_v22 = vld [vmem:[%s823_s20 + $0xf0] sm:$0xff] }
  0x27   : > { %v706_v33 = vpack.c.bf16 %v361_v27, %v360_v23  ;;  %vm299_vm15 = vcmp.gt.f32.partialorder %v267_v24, 0.0  ;;  %v331_v34 = vmul.f32 0.2, %v267_v24  ;;  %v362_v35 = vsel %vm298_vm14, %v266_v17, %v330_v25 }
  0x28   : > { %v269_v36 = vadd.f32 %v828_v1, %v230_v28  ;;  %vm300_vm0 = vcmp.gt.f32.partialorder %v268_v29, 0.0  ;;  %v332_v37 = vmul.f32 0.2, %v268_v29  ;;  %v232_v38 = vmul.f32 %v818_v0, %v193_v26 }
  0x29   : > { %758 = vst [vmem:[%s856_s26 + $0x30] sm:$0xff] %v706_v33   ;;  %v363_v39 = vsel %vm299_vm15, %v267_v24, %v331_v34  ;;  %v270_v40 = vadd.f32 %v828_v1, %v231_v30  ;;  %v233_v41 = vmul.f32 %v818_v0, %v194_v31  ;;  %v234_v42 = vmul.f32 %v818_v0, %v195_v32  ;;  %v205_v32 = vld [vmem:[%s823_s20 + $0xf8] sm:$0xff] }
  0x2a   : > { %v711_v45 = vpack.c.bf16 %v363_v39, %v362_v35  ;;  %vm301_vm1 = vcmp.gt.f32.partialorder %v269_v36, 0.0  ;;  %v333_v46 = vmul.f32 0.2, %v269_v36  ;;  %v364_v47 = vsel %vm300_vm0, %v268_v29, %v332_v37 }
  0x2b   : > { %v271_v48 = vadd.f32 %v828_v1, %v232_v38  ;;  %vm302_vm2 = vcmp.gt.f32.partialorder %v270_v40, 0.0  ;;  %v334_v49 = vmul.f32 0.2, %v270_v40  ;;  %v272_v50 = vadd.f32 %v828_v1, %v233_v41 }
  0x2c   : > { %759 = vst [vmem:[%s856_s26 + $0x38] sm:$0xff] %v711_v45   ;;  %v365_v51 = vsel %vm301_vm1, %v269_v36, %v333_v46  ;;  %v273_v52 = vadd.f32 %v828_v1, %v234_v42  ;;  %v235_v53 = vmul.f32 %v818_v0, %v196_v43  ;;  %v236_v54 = vmul.f32 %v818_v0, %v197_v44 }
  0x2d   : > { %v716_v56 = vpack.c.bf16 %v365_v51, %v364_v47  ;;  %vm303_vm3 = vcmp.gt.f32.partialorder %v271_v48, 0.0  ;;  %v335_v57 = vmul.f32 0.2, %v271_v48  ;;  %v366_v58 = vsel %vm302_vm2, %v270_v40, %v334_v49 }
  0x2e   : > { %vm304_vm4 = vcmp.gt.f32.partialorder %v272_v50, 0.0  ;;  %vm305_vm5 = vcmp.gt.f32.partialorder %v273_v52, 0.0  ;;  %v336_v60 = vmul.f32 0.2, %v272_v50  ;;  %v337_v61 = vmul.f32 0.2, %v273_v52 }
  0x2f   : > { %760 = vst [vmem:[%s856_s26 + $0x40] sm:$0xff] %v716_v56   ;;  %v367_v62 = vsel %vm303_vm3, %v271_v48, %v335_v57  ;;  %v274_v63 = vadd.f32 %v828_v1, %v235_v53  ;;  %v275_v2 = vadd.f32 %v828_v1, %v236_v54  ;;  %v237_v3 = vmul.f32 %v818_v0, %v198_v55 }
  0x30   : > { %v721_v5 = vpack.c.bf16 %v367_v62, %v366_v58  ;;  %v368_v6 = vsel %vm304_vm4, %v272_v50, %v336_v60  ;;  %v369_v7 = vsel %vm305_vm5, %v273_v52, %v337_v61  ;;  %v238_v8 = vmul.f32 %v818_v0, %v199_v59 }
  0x31   : > { %v726_v12 = vpack.c.bf16 %v369_v7, %v368_v6  ;;  %vm306_vm6 = vcmp.gt.f32.partialorder %v274_v63, 0.0  ;;  %vm307_vm7 = vcmp.gt.f32.partialorder %v275_v2, 0.0  ;;  %v338_v13 = vmul.f32 0.2, %v274_v63 }
  0x32   : > { %761 = vst [vmem:[%s856_s26 + $0x48] sm:$0xff] %v721_v5   ;;  %v339_v14 = vmul.f32 0.2, %v275_v2  ;;  %v276_v15 = vadd.f32 %v828_v1, %v237_v3  ;;  %v277_v16 = vadd.f32 %v828_v1, %v238_v8  ;;  %v239_v17 = vmul.f32 %v818_v0, %v200_v4 }
  0x33   : > { %762 = vst [vmem:[%s856_s26 + $0x50] sm:$0xff] %v726_v12   ;;  %v370_v18 = vsel %vm306_vm6, %v274_v63, %v338_v13  ;;  %v240_v19 = vmul.f32 %v818_v0, %v201_v9  ;;  %v241_v20 = vmul.f32 %v818_v0, %v202_v10  ;;  %v242_v21 = vmul.f32 %v818_v0, %v203_v11 }
  0x34   : > { %v371_v23 = vsel %vm307_vm7, %v275_v2, %v339_v14  ;;  %vm308_vm8 = vcmp.gt.f32.partialorder %v276_v15, 0.0  ;;  %vm309_vm9 = vcmp.gt.f32.partialorder %v277_v16, 0.0  ;;  %v340_v24 = vmul.f32 0.2, %v276_v15 }
  0x35   : > { %v731_v25 = vpack.c.bf16 %v371_v23, %v370_v18  ;;  %v341_v26 = vmul.f32 0.2, %v277_v16  ;;  %v278_v27 = vadd.f32 %v828_v1, %v239_v17  ;;  %v279_v28 = vadd.f32 %v828_v1, %v240_v19 }
  0x36   : > { %v372_v29 = vsel %vm308_vm8, %v276_v15, %v340_v24  ;;  %v280_v30 = vadd.f32 %v828_v1, %v241_v20  ;;  %v281_v31 = vadd.f32 %v828_v1, %v242_v21  ;;  %v243_v33 = vmul.f32 %v818_v0, %v204_v22 }
  0x37   : > { %763 = vst [vmem:[%s856_s26 + $0x58] sm:$0xff] %v731_v25   ;;  %v373_v34 = vsel %vm309_vm9, %v277_v16, %v341_v26  ;;  %vm310_vm10 = vcmp.gt.f32.partialorder %v278_v27, 0.0  ;;  %vm311_vm11 = vcmp.gt.f32.partialorder %v279_v28, 0.0  ;;  %v342_v35 = vmul.f32 0.2, %v278_v27 }
  0x38   : > { %v736_v36 = vpack.c.bf16 %v373_v34, %v372_v29  ;;  %v343_v37 = vmul.f32 0.2, %v279_v28  ;;  %vm312_vm12 = vcmp.gt.f32.partialorder %v280_v30, 0.0  ;;  %vm313_vm13 = vcmp.gt.f32.partialorder %v281_v31, 0.0 }
  0x39   : > { %v374_v38 = vsel %vm310_vm10, %v278_v27, %v342_v35  ;;  %v344_v39 = vmul.f32 0.2, %v280_v30  ;;  %v345_v40 = vmul.f32 0.2, %v281_v31  ;;  %v244_v41 = vmul.f32 %v818_v0, %v205_v32 }
  0x3a   : > { %764 = vst [vmem:[%s856_s26 + $0x60] sm:$0xff] %v736_v36   ;;  %v375_v42 = vsel %vm311_vm11, %v279_v28, %v343_v37  ;;  %v282_v43 = vadd.f32 %v828_v1, %v243_v33 }
  0x3b   : > { %v741_v44 = vpack.c.bf16 %v375_v42, %v374_v38  ;;  %v376_v45 = vsel %vm312_vm12, %v280_v30, %v344_v39  ;;  %v377_v46 = vsel %vm313_vm13, %v281_v31, %v345_v40  ;;  %v283_v47 = vadd.f32 %v828_v1, %v244_v41 }
  0x3c   : > { %v746_v48 = vpack.c.bf16 %v377_v46, %v376_v45  ;;  %vm314_vm14 = vcmp.gt.f32.partialorder %v282_v43, 0.0  ;;  %v346_v49 = vmul.f32 0.2, %v282_v43 }
  0x3d   : > { %765 = vst [vmem:[%s856_s26 + $0x68] sm:$0xff] %v741_v44   ;;  %vm315_vm15 = vcmp.gt.f32.partialorder %v283_v47, 0.0  ;;  %v347_v50 = vmul.f32 0.2, %v283_v47 }
  0x3e   : > { %766 = vst [vmem:[%s856_s26 + $0x70] sm:$0xff] %v746_v48   ;;  %v378_v51 = vsel %vm314_vm14, %v282_v43, %v346_v49 }
  0x3f   : > { %v379_v52 = vsel %vm315_vm15, %v283_v47, %v347_v50 }
  0x40   : > { %v751_v0 = vpack.c.bf16 %v379_v52, %v378_v51 }
  0x42   : > { %767 = vst [vmem:[%s856_s26 + $0x78] sm:$0xff] %v751_v0  }
  0x43 PF: > { %s13_s12 = sadd.s32 1, %s782_s12  }
  0x44   : > { %p10_p4 = scmp.ge.s32.totalorder %s13_s12, 4  }
  0x46   :  { %12 = sbr.rel (!%p10_p4) target bundleno = 1 (0x1), region = 62 }

// kernel: discriminator_forward.11
= control target key start
LH: loop header
LB: loop body
LE: loop exit
PB: predicated region body
PF: predicated region fallthrough
CT: control target
= control target key end

     0   :  { %s1601_s12 = smov 0   ;;  %s1603_s13 = smov 0   ;;  %s1999_s0 = inlined_call_operand.vmem [shape: bf16[128,2048], index: 0, kind: input, shape index: {}]   ;;  %s2000_s1 = inlined_call_operand.vmem [shape: bf16[2048,128], index: 1, kind: input, shape index: {}]   ;;  %s2001_s2 = inlined_call_operand.vmem [shape: f32[128,128], index: 2, kind: output, shape index: {0}]   ;;  %s2002_s3 = inlined_call_operand.vmem [shape: f32[1,2,128], index: 3, kind: output, shape index: {1}]  }
   0x1   :  { %s1605_s14 = smov 0   ;;  %s1607_s15 = smov 0  }
   0x2   :  { %s1609_s16 = smov 0  }
   0x3 LB: > { %s23_s17 = sadd.s32 1, %s1574_s15  ;;  %p42_p1 = scmp.ne.s32.totalorder %s1566_s13, %s1562_s12  ;;  %s1578_s16 = sphi %s1609_s16, %s14_s16   ;;  %s1574_s15 = sphi %s1607_s15, %s2006_s15   ;;  %s1570_s14 = sphi %s1605_s14, %s2005_s14   ;;  %s1566_s13 = sphi %s1603_s13, %s2004_s13   ;;  %s1562_s12 = sphi %s1601_s12, %s2003_s12  }
   0x4   : > { %p24_p0 = scmp.ge.s32.totalorder %s23_s17, 4  ;;  %p43_p2 = scmp.eq.s32.totalorder %s1578_s16, 0 }
   0x5   : > { %s35_s19 = sadd.s32 1, %s1566_s13  ;;  %p1211_p5 = scmp.ge.s32.totalorder %s1578_s16, 4 }
   0x6   : > { %s2008_s17 = smov (%p24_p0, %s23_s17), 0  ;;  %p44_p3 = por %p43_p2, %p42_p1 }
   0x7   : > { %s31_s18 = ssub.s32 %s1574_s15, %s2008_s17  ;;  %146 = sbr.rel (%p1211_p5) target bundleno = 34 (0x22), region = 16 }
   0x8   : > { %p33_p4 = scmp.eq.s32.totalorder %s31_s18, 0 }
   0xa   : > { %s1636_s20 = scalar_select %p33_p4, %s1566_s13, %s35_s19  }
   0xe   : > { %149 = sbr.rel (!%p44_p3) target bundleno = 34 (0x22), region = 20  ;;  %s151_s21 = sand.u32 (%p44_p3), 1, %s1566_s13  }
   0xf   : > { %s1290_s22 = sshll.u32 (%p44_p3), %s1574_s15, 4  ;;  %s1212_s23 = sshll.u32 (%p44_p3), %s151_s21, 8 }
  0x10   : > { %s1644_s26 = scalar_lea.vmem (%p44_p3), %s1999_s0, %s1290_s22  ;;  %s1649_s27 = scalar_lea.vmem (%p44_p3), [#allocation2], %s1212_s23 }
  0x11   : > { %v172_v0 = vld [vmem:[%s1644_s26] sm:$0xff] (%p44_p3)  ;;  %v174_v1 = vld [vmem:[%s1644_s26 + $0x8] sm:$0xff] (%p44_p3) }
  0x12   : > { %v176_v2 = vld [vmem:[%s1644_s26 + $0x40] sm:$0xff] (%p44_p3)  ;;  %173 = vst [vmem:[%s1649_s27] sm:$0xff] (%p44_p3), %v172_v0  ;;  %175 = vst [vmem:[%s1649_s27 + $0x8] sm:$0xff] (%p44_p3), %v174_v1  ;;  %v178_v3 = vld [vmem:[%s1644_s26 + $0x48] sm:$0xff] (%p44_p3) }
  0x13   : > { %177 = vst [vmem:[%s1649_s27 + $0x10] sm:$0xff] (%p44_p3), %v176_v2  ;;  %v180_v4 = vld [vmem:[%s1644_s26 + $0x80] sm:$0xff] (%p44_p3)  ;;  %v182_v5 = vld [vmem:[%s1644_s26 + $0x88] sm:$0xff] (%p44_p3)  ;;  %179 = vst [vmem:[%s1649_s27 + $0x18] sm:$0xff] (%p44_p3), %v178_v3 }
  0x14   : > { %181 = vst [vmem:[%s1649_s27 + $0x20] sm:$0xff] (%p44_p3), %v180_v4  ;;  %183 = vst [vmem:[%s1649_s27 + $0x28] sm:$0xff] (%p44_p3), %v182_v5  ;;  %v184_v6 = vld [vmem:[%s1644_s26 + $0xc0] sm:$0xff] (%p44_p3)  ;;  %v186_v7 = vld [vmem:[%s1644_s26 + $0xc8] sm:$0xff] (%p44_p3) }
  0x15   : > { %v188_v8 = vld [vmem:[%s1644_s26 + $0x100] sm:$0xff]  ;;  %185 = vst [vmem:[%s1649_s27 + $0x30] sm:$0xff] %v184_v6  ;;  %187 = vst [vmem:[%s1649_s27 + $0x38] sm:$0xff] %v186_v7  ;;  %v190_v9 = vld [vmem:[%s1644_s26 + $0x108] sm:$0xff] }
  0x16   : > { %189 = vst [vmem:[%s1649_s27 + $0x40] sm:$0xff] %v188_v8  ;;  %v192_v10 = vld [vmem:[%s1644_s26 + $0x140] sm:$0xff]  ;;  %v194_v11 = vld [vmem:[%s1644_s26 + $0x148] sm:$0xff]  ;;  %191 = vst [vmem:[%s1649_s27 + $0x48] sm:$0xff] %v190_v9 }
  0x17   : > { %193 = vst [vmem:[%s1649_s27 + $0x50] sm:$0xff] %v192_v10  ;;  %195 = vst [vmem:[%s1649_s27 + $0x58] sm:$0xff] %v194_v11  ;;  %v196_v12 = vld [vmem:[%s1644_s26 + $0x180] sm:$0xff]  ;;  %v198_v13 = vld [vmem:[%s1644_s26 + $0x188] sm:$0xff] }
  0x18   : > { %v200_v14 = vld [vmem:[%s1644_s26 + $0x1c0] sm:$0xff]  ;;  %197 = vst [vmem:[%s1649_s27 + $0x60] sm:$0xff] %v196_v12  ;;  %199 = vst [vmem:[%s1649_s27 + $0x68] sm:$0xff] %v198_v13  ;;  %v202_v15 = vld [vmem:[%s1644_s26 + $0x1c8] sm:$0xff] }
  0x19   : > { %201 = vst [vmem:[%s1649_s27 + $0x70] sm:$0xff] %v200_v14  ;;  %v204_v16 = vld [vmem:[%s1644_s26 + $0x200] sm:$0xff]  ;;  %v206_v17 = vld [vmem:[%s1644_s26 + $0x208] sm:$0xff]  ;;  %203 = vst [vmem:[%s1649_s27 + $0x78] sm:$0xff] %v202_v15 }
  0x1a   : > { %205 = vst [vmem:[%s1649_s27 + $0x80] sm:$0xff] %v204_v16  ;;  %207 = vst [vmem:[%s1649_s27 + $0x88] sm:$0xff] %v206_v17  ;;  %v208_v18 = vld [vmem:[%s1644_s26 + $0x240] sm:$0xff]  ;;  %v210_v19 = vld [vmem:[%s1644_s26 + $0x248] sm:$0xff] }
  0x1b   : > { %v212_v20 = vld [vmem:[%s1644_s26 + $0x280] sm:$0xff]  ;;  %209 = vst [vmem:[%s1649_s27 + $0x90] sm:$0xff] %v208_v18  ;;  %211 = vst [vmem:[%s1649_s27 + $0x98] sm:$0xff] %v210_v19  ;;  %v214_v21 = vld [vmem:[%s1644_s26 + $0x288] sm:$0xff] }
  0x1c   : > { %213 = vst [vmem:[%s1649_s27 + $0xa0] sm:$0xff] %v212_v20  ;;  %v216_v22 = vld [vmem:[%s1644_s26 + $0x2c0] sm:$0xff]  ;;  %v218_v23 = vld [vmem:[%s1644_s26 + $0x2c8] sm:$0xff]  ;;  %215 = vst [vmem:[%s1649_s27 + $0xa8] sm:$0xff] %v214_v21 }
  0x1d   : > { %217 = vst [vmem:[%s1649_s27 + $0xb0] sm:$0xff] %v216_v22  ;;  %219 = vst [vmem:[%s1649_s27 + $0xb8] sm:$0xff] %v218_v23  ;;  %v220_v24 = vld [vmem:[%s1644_s26 + $0x300] sm:$0xff]  ;;  %v222_v25 = vld [vmem:[%s1644_s26 + $0x308] sm:$0xff] }
  0x1e   : > { %v224_v26 = vld [vmem:[%s1644_s26 + $0x340] sm:$0xff]  ;;  %221 = vst [vmem:[%s1649_s27 + $0xc0] sm:$0xff] %v220_v24  ;;  %223 = vst [vmem:[%s1649_s27 + $0xc8] sm:$0xff] %v222_v25  ;;  %v226_v27 = vld [vmem:[%s1644_s26 + $0x348] sm:$0xff] }
  0x1f   : > { %225 = vst [vmem:[%s1649_s27 + $0xd0] sm:$0xff] %v224_v26  ;;  %v228_v28 = vld [vmem:[%s1644_s26 + $0x380] sm:$0xff]  ;;  %v230_v29 = vld [vmem:[%s1644_s26 + $0x388] sm:$0xff]  ;;  %227 = vst [vmem:[%s1649_s27 + $0xd8] sm:$0xff] %v226_v27 }
  0x20   : > { %229 = vst [vmem:[%s1649_s27 + $0xe0] sm:$0xff] %v228_v28  ;;  %231 = vst [vmem:[%s1649_s27 + $0xe8] sm:$0xff] %v230_v29  ;;  %v232_v30 = vld [vmem:[%s1644_s26 + $0x3c0] sm:$0xff]  ;;  %v234_v31 = vld [vmem:[%s1644_s26 + $0x3c8] sm:$0xff] }
  0x21   : > { %233 = vst [vmem:[%s1649_s27 + $0xf0] sm:$0xff] %v232_v30  ;;  %235 = vst [vmem:[%s1649_s27 + $0xf8] sm:$0xff] %v234_v31 }
  0x22 PF: > { %p1215_p6 = scmp.ge.s32.totalorder %s1578_s16, 1  ;;  %p249_p7 = scmp.lt.s32.totalorder %s1578_s16, 5 }
  0x24   : > { %p250_p8 = pnand %p1215_p6, %p249_p7 }
  0x25   : > { %s256_s28 = sand.u32 (!%p250_p8), 1, %s1562_s12   ;;  %s1217_s29 = sshll.u32 (!%p250_p8), %s1570_s14, 6 }
  0x26   : > { %253 = sbr.rel (%p250_p8) target bundleno = 393 (0x189), region = 47  ;;  %s1216_s30 = sshll.u32 (!%p250_p8), %s256_s28, 8 }
  0x27   : > { %p291_p9 = scmp.lt.s32.totalorder (!%p250_p8), %s1217_s29, 255  ;;  %s1721_s8 = scalar_lea.vmem (!%p250_p8), [#allocation2], %s1216_s30 }
  0x28   : > { %p1219_p10 = scmp.ne.s32.totalorder (!%p250_p8), %s1570_s14, 0 }
  0x2d   : > { %s2010_s29 = smov (!%p291_p9, %s1217_s29), 255  ;;  %310 = sbr.rel (%p1219_p10) target bundleno = 55 (0x37), region = 55 }
  0x2e   : > { %s1218_s4 = sshll.u32 %s2010_s29, 2  ;;  %v1580_v32 = vmov (!%p1219_p10), 0.0  }
  0x2f   : > { %s1719_s7 = scalar_lea.vmem %s2000_s1, %s1218_s4  ;;  %311 = vst [vmem:[%s2001_s2] sm:$0xff] (!%p1219_p10), %v1580_v32  ;;  %312 = vst [vmem:[%s2001_s2 + $0x8] sm:$0xff] (!%p1219_p10), %v1580_v32 }
  0x30   : > { %313 = vst [vmem:[%s2001_s2 + $0x10] sm:$0xff] (!%p1219_p10), %v1580_v32  ;;  %314 = vst [vmem:[%s2001_s2 + $0x18] sm:$0xff] (!%p1219_p10), %v1580_v32 }
  0x31   : > { %315 = vst [vmem:[%s2001_s2 + $0x20] sm:$0xff] (!%p1219_p10), %v1580_v32  ;;  %316 = vst [vmem:[%s2001_s2 + $0x28] sm:$0xff] (!%p1219_p10), %v1580_v32 }
  0x32   : > { %317 = vst [vmem:[%s2001_s2 + $0x30] sm:$0xff] (!%p1219_p10), %v1580_v32  ;;  %318 = vst [vmem:[%s2001_s2 + $0x38] sm:$0xff] (!%p1219_p10), %v1580_v32 }
  0x33   : > { %319 = vst [vmem:[%s2001_s2 + $0x40] sm:$0xff] (!%p1219_p10), %v1580_v32  ;;  %320 = vst [vmem:[%s2001_s2 + $0x48] sm:$0xff] (!%p1219_p10), %v1580_v32 }
  0x34   : > { %321 = vst [vmem:[%s2001_s2 + $0x50] sm:$0xff] %v1580_v32  ;;  %322 = vst [vmem:[%s2001_s2 + $0x58] sm:$0xff] %v1580_v32 }
  0x35   : > { %323 = vst [vmem:[%s2001_s2 + $0x60] sm:$0xff] %v1580_v32  ;;  %324 = vst [vmem:[%s2001_s2 + $0x68] sm:$0xff] %v1580_v32 }
  0x36   : > { %325 = vst [vmem:[%s2001_s2 + $0x70] sm:$0xff] %v1580_v32  ;;  %326 = vst [vmem:[%s2001_s2 + $0x78] sm:$0xff] %v1580_v32 }
  0x37 PF: > { %v1460_v33 = vld [vmem:[%s1719_s7 + $0x40] sm:$0xff]   ;;  %v1464_v37 = vld [vmem:[%s1719_s7 + $0x48] sm:$0xff]   ;;  %v1468_v41 = vld [vmem:[%s1719_s7 + $0x50] sm:$0xff]   ;;  %p1284_p11 = scmp.ne.s32.totalorder %s1570_s14, 3 }
  0x38   : > { %v1461_v34 = vld [vmem:[%s1719_s7 + $0xc0] sm:$0xff]   ;;  %1291 = vmatprep.subr.bf16.mxu0 %v1460_v33  ;;  %v1465_v38 = vld [vmem:[%s1719_s7 + $0xc8] sm:$0xff]   ;;  %v1469_v42 = vld [vmem:[%s1719_s7 + $0xd0] sm:$0xff]   ;;  %vm1095_vm0 = vcmask (!%p1284_p11), 1040384  }
  0x39   : > { %v1462_v35 = vld [vmem:[%s1719_s7] sm:$0xff]   ;;  %1355 = vmatprep.subr.bf16.mxu1 %v1461_v34  ;;  %v1466_v39 = vld [vmem:[%s1719_s7 + $0x8] sm:$0xff]   ;;  %v1470_v43 = vld [vmem:[%s1719_s7 + $0x10] sm:$0xff]  }
  0x3a   : > { %v1463_v36 = vld [vmem:[%s1719_s7 + $0x80] sm:$0xff]   ;;  %1292 = vmatpush3.bf16.msra.mxu0 %v1462_v35  ;;  %v1467_v40 = vld [vmem:[%s1719_s7 + $0x88] sm:$0xff]   ;;  %v1471_v44 = vld [vmem:[%s1719_s7 + $0x90] sm:$0xff]  }
  0x3b   : > { %1356 = vmatpush3.bf16.msra.mxu1 %v1463_v36  ;;  %1293 = vmatprep.subr.bf16.mxu0 %v1464_v37  ;;  %v1472_v45 = vld [vmem:[%s1719_s7 + $0x58] sm:$0xff]   ;;  %v1476_v49 = vld [vmem:[%s1719_s7 + $0x60] sm:$0xff]   ;;  %v1480_v53 = vld [vmem:[%s1719_s7 + $0x68] sm:$0xff]  }
  0x3c   : > { %1357 = vmatprep.subr.bf16.mxu1 %v1465_v38  ;;  %v1473_v46 = vld [vmem:[%s1719_s7 + $0xd8] sm:$0xff]   ;;  %v1477_v50 = vld [vmem:[%s1719_s7 + $0xe0] sm:$0xff]   ;;  %v1481_v54 = vld [vmem:[%s1719_s7 + $0xe8] sm:$0xff]  }
  0x3d   : > { %v1474_v47 = vld [vmem:[%s1719_s7 + $0x18] sm:$0xff]   ;;  %v1478_v51 = vld [vmem:[%s1719_s7 + $0x20] sm:$0xff]   ;;  %v1482_v55 = vld [vmem:[%s1719_s7 + $0x28] sm:$0xff]  }
  0x3e   : > { %1294 = vmatpush3.bf16.msra.mxu0 %v1466_v39  ;;  %v1475_v48 = vld [vmem:[%s1719_s7 + $0x98] sm:$0xff]   ;;  %v1479_v52 = vld [vmem:[%s1719_s7 + $0xa0] sm:$0xff]   ;;  %v1483_v56 = vld [vmem:[%s1719_s7 + $0xa8] sm:$0xff]  }
  0x3f   : > { %1358 = vmatpush3.bf16.msra.mxu1 %v1467_v40  ;;  %1295 = vmatprep.subr.bf16.mxu0 %v1468_v41  ;;  %v1484_v57 = vld [vmem:[%s1719_s7 + $0x70] sm:$0xff]   ;;  %v1488_v61 = vld [vmem:[%s1719_s7 + $0x78] sm:$0xff]  }
  0x40   : > { %1359 = vmatprep.subr.bf16.mxu1 %v1469_v42  ;;  %v1485_v58 = vld [vmem:[%s1719_s7 + $0xf0] sm:$0xff]   ;;  %v1489_v62 = vld [vmem:[%s1719_s7 + $0xf8] sm:$0xff]   ;;  %v327_v42 = vld [vmem:[%s2001_s2] sm:$0xff] }
  0x41   : > { %v1486_v59 = vld [vmem:[%s1719_s7 + $0x30] sm:$0xff]   ;;  %v1490_v63 = vld [vmem:[%s1719_s7 + $0x38] sm:$0xff]  }
  0x42   : > { %1296 = vmatpush3.bf16.msra.mxu0 %v1470_v43  ;;  %v1487_v60 = vld [vmem:[%s1719_s7 + $0xb0] sm:$0xff]   ;;  %v1491_v0 = vld [vmem:[%s1719_s7 + $0xb8] sm:$0xff]  }
  0x43   : > { %1360 = vmatpush3.bf16.msra.mxu1 %v1471_v44  ;;  %1297 = vmatprep.subr.bf16.mxu0 %v1472_v45  ;;  %v1492_v1 = vld [vmem:[%s1721_s8] ss:$16 sps:$4 sm:$0xff]   ;;  %v1494_v2 = vld [vmem:[%s1721_s8 + $0x4] ss:$16 sps:$4 sm:$0xff]   ;;  %v1495_v3 = vld [vmem:[%s1721_s8 + $0x8] ss:$16 sps:$4 sm:$0xff]  }
  0x44   : > { %1361 = vmatprep.subr.bf16.mxu1 %v1473_v46  ;;  %v1497_v4 = vld [vmem:[%s1721_s8 + $0xc] ss:$16 sps:$4 sm:$0xff]   ;;  %823 = vmatprep.mubr.bf16.mxu0 %v1494_v2  ;;  %v1498_v5 = vld [vmem:[%s1721_s8 + $0x24] ss:$16 sps:$4 sm:$0xff]   ;;  %v1502_v7 = vld [vmem:[%s1721_s8 + $0x20] ss:$16 sps:$4 sm:$0xff]  }
  0x45   : > { %920 = vmatprep.mubr.bf16.mxu1 %v1497_v4  ;;  %v1500_v6 = vld [vmem:[%s1721_s8 + $0x2c] ss:$16 sps:$4 sm:$0xff]   ;;  %v1503_v8 = vld [vmem:[%s1721_s8 + $0x28] ss:$16 sps:$4 sm:$0xff]   ;;  %v1504_v9 = vld [vmem:[%s1721_s8 + $0x44] ss:$16 sps:$4 sm:$0xff]  }
  0x46   : > { %1298 = vmatpush3.bf16.msra.mxu0 %v1474_v47  ;;  %v1506_v10 = vld [vmem:[%s1721_s8 + $0x4c] ss:$16 sps:$4 sm:$0xff]   ;;  %v1508_v11 = vld [vmem:[%s1721_s8 + $0x40] ss:$16 sps:$4 sm:$0xff]   ;;  %v1509_v12 = vld [vmem:[%s1721_s8 + $0x48] ss:$16 sps:$4 sm:$0xff]  }
  0x47   : > { %1362 = vmatpush3.bf16.msra.mxu1 %v1475_v48  ;;  %1299 = vmatprep.subr.bf16.mxu0 %v1476_v49  ;;  %v1510_v13 = vld [vmem:[%s1721_s8 + $0x64] ss:$16 sps:$4 sm:$0xff]   ;;  %v1512_v14 = vld [vmem:[%s1721_s8 + $0x6c] ss:$16 sps:$4 sm:$0xff]   ;;  %v1514_v15 = vld [vmem:[%s1721_s8 + $0x60] ss:$16 sps:$4 sm:$0xff]  }
  0x48   : > { %1363 = vmatprep.subr.bf16.mxu1 %v1477_v50  ;;  %v1515_v16 = vld [vmem:[%s1721_s8 + $0x68] ss:$16 sps:$4 sm:$0xff]   ;;  %v1516_v17 = vld [vmem:[%s1721_s8 + $0x84] ss:$16 sps:$4 sm:$0xff]   ;;  %v1518_v18 = vld [vmem:[%s1721_s8 + $0x8c] ss:$16 sps:$4 sm:$0xff]  }
  0x49   : > { %v1520_v19 = vld [vmem:[%s1721_s8 + $0x80] ss:$16 sps:$4 sm:$0xff]   ;;  %v1521_v20 = vld [vmem:[%s1721_s8 + $0x88] ss:$16 sps:$4 sm:$0xff]   ;;  %v1522_v21 = vld [vmem:[%s1721_s8 + $0xa4] ss:$16 sps:$4 sm:$0xff]  }
  0x4a   : > { %1300 = vmatpush3.bf16.msra.mxu0 %v1478_v51  ;;  %v1524_v22 = vld [vmem:[%s1721_s8 + $0xac] ss:$16 sps:$4 sm:$0xff]   ;;  %v1526_v23 = vld [vmem:[%s1721_s8 + $0xa0] ss:$16 sps:$4 sm:$0xff]   ;;  %v1527_v24 = vld [vmem:[%s1721_s8 + $0xa8] ss:$16 sps:$4 sm:$0xff]  }
  0x4b   : > { %1364 = vmatpush3.bf16.msra.mxu1 %v1479_v52  ;;  %1301 = vmatprep.subr.bf16.mxu0 %v1480_v53  ;;  %v1528_v25 = vld [vmem:[%s1721_s8 + $0xc4] ss:$16 sps:$4 sm:$0xff]   ;;  %v1530_v26 = vld [vmem:[%s1721_s8 + $0xcc] ss:$16 sps:$4 sm:$0xff]   ;;  %v1532_v27 = vld [vmem:[%s1721_s8 + $0xc0] ss:$16 sps:$4 sm:$0xff]  }
  0x4c   : > { %1365 = vmatprep.subr.bf16.mxu1 %v1481_v54  ;;  %v1533_v28 = vld [vmem:[%s1721_s8 + $0xc8] ss:$16 sps:$4 sm:$0xff]   ;;  %v1534_v29 = vld [vmem:[%s1721_s8 + $0xe4] ss:$16 sps:$4 sm:$0xff]   ;;  %v1536_v30 = vld [vmem:[%s1721_s8 + $0xec] ss:$16 sps:$4 sm:$0xff]  }
  0x4d   : > { %v1538_v31 = vld [vmem:[%s1721_s8 + $0xe0] ss:$16 sps:$4 sm:$0xff]   ;;  %v1539_v32 = vld [vmem:[%s1721_s8 + $0xe8] ss:$16 sps:$4 sm:$0xff]  }
  0x4e   : > { %1302 = vmatpush3.bf16.msra.mxu0 %v1482_v55  ;;  %v328_v47 = vld [vmem:[%s2001_s2 + $0x8] sm:$0xff] }
  0x4f   : > { %1366 = vmatpush3.bf16.msra.mxu1 %v1483_v56  ;;  %1303 = vmatprep.subr.bf16.mxu0 %v1484_v57 }
  0x50   : > { %1367 = vmatprep.subr.bf16.mxu1 %v1485_v58 }
  0x52   : > { %1304 = vmatpush3.bf16.msra.mxu0 %v1486_v59 }
  0x53   : > { %1368 = vmatpush3.bf16.msra.mxu1 %v1487_v60  ;;  %1305 = vmatprep.subr.bf16.mxu0 %v1488_v61  ;;  %v329_v60 = vld [vmem:[%s2001_s2 + $0x10] sm:$0xff] }
  0x54   : > { %1369 = vmatprep.subr.bf16.mxu1 %v1489_v62 }
  0x56   : > { %1306 = vmatpush3.bf16.msra.mxu0 %v1490_v63 }
  0x57   : > { %1370 = vmatpush3.bf16.msra.mxu1 %v1491_v0 }
  0x59   : > { %824 = vmatmul.mubr.bf16.vlgmr.msra.gmra.mrb[0].mxu0 %v1492_v1  ;;  %v330_v1 = vld [vmem:[%s2001_s2 + $0x18] sm:$0xff] }
  0x5a   : > { %921 = vmatmul.mubr.bf16.vlgmr.msra.gmra.mrb[0].mxu1 %v1495_v3  ;;  %831 = vmatprep.mubr.bf16.mxu0 %v1498_v5 }
  0x5b   : > { %928 = vmatprep.mubr.bf16.mxu1 %v1500_v6 }
  0x61   : > { %832 = vmatmul.mubr.bf16.gmra.mrb[4].mxu0 %v1502_v7 }
  0x62   : > { %929 = vmatmul.mubr.bf16.gmra.mrb[4].mxu1 %v1503_v8  ;;  %839 = vmatprep.mubr.bf16.mxu0 %v1504_v9 }
  0x63   : > { %936 = vmatprep.mubr.bf16.mxu1 %v1506_v10 }
  0x69   : > { %840 = vmatmul.mubr.bf16.gmra.mrb[8].mxu0 %v1508_v11 }
  0x6a   : > { %937 = vmatmul.mubr.bf16.gmra.mrb[8].mxu1 %v1509_v12  ;;  %847 = vmatprep.mubr.bf16.mxu0 %v1510_v13 }
  0x6b   : > { %944 = vmatprep.mubr.bf16.mxu1 %v1512_v14  ;;  %v331_v14 = vld [vmem:[%s2001_s2 + $0x20] sm:$0xff] }
  0x71   : > { %848 = vmatmul.mubr.bf16.gmra.mrb[12].mxu0 %v1514_v15 }
  0x72   : > { %945 = vmatmul.mubr.bf16.gmra.mrb[12].mxu1 %v1515_v16  ;;  %855 = vmatprep.mubr.bf16.mxu0 %v1516_v17 }
  0x73   : > { %952 = vmatprep.mubr.bf16.mxu1 %v1518_v18 }
  0x79   : > { %856 = vmatmul.mubr.bf16.gmra.mrb[16].mxu0 %v1520_v19  ;;  %v332_v19 = vld [vmem:[%s2001_s2 + $0x28] sm:$0xff] }
  0x7a   : > { %953 = vmatmul.mubr.bf16.gmra.mrb[16].mxu1 %v1521_v20  ;;  %863 = vmatprep.mubr.bf16.mxu0 %v1522_v21 }
  0x7b   : > { %960 = vmatprep.mubr.bf16.mxu1 %v1524_v22 }
  0x81   : > { %864 = vmatmul.mubr.bf16.gmra.mrb[20].mxu0 %v1526_v23 }
  0x82   : > { %961 = vmatmul.mubr.bf16.gmra.mrb[20].mxu1 %v1527_v24  ;;  %871 = vmatprep.mubr.bf16.mxu0 %v1528_v25 }
  0x83   : > { %968 = vmatprep.mubr.bf16.mxu1 %v1530_v26 }
  0x89   : > { %872 = vmatmul.mubr.bf16.gmra.mrb[24].mxu0 %v1532_v27 }
  0x8a   : > { %969 = vmatmul.mubr.bf16.gmra.mrb[24].mxu1 %v1533_v28  ;;  %879 = vmatprep.mubr.bf16.mxu0 %v1534_v29 }
  0x8b   : > { %976 = vmatprep.mubr.bf16.mxu1 %v1536_v30 }
  0x91   : > { %880 = vmatmul.mubr.bf16.gmra.mrb[28].mxu0 %v1538_v31 }
  0x92   : > { %977 = vmatmul.mubr.bf16.gmra.mrb[28].mxu1 %v1539_v32  ;;  %v333_v32 = vld [vmem:[%s2001_s2 + $0x30] sm:$0xff] }
 0x12c   : > { %v1307_v33 = vpop.f32.mrb[0].mxu0 }
 0x12d   : > { %v1371_v34 = vpop.f32.mrb[0].mxu1  ;;  %v1308_v35 = vpop.f32.mrb[1].mxu0 }
 0x12e   : > { %v1309_v36 = vadd.f32 %v1308_v35, %v1307_v33  ;;  %v1372_v37 = vpop.f32.mrb[1].mxu1  ;;  %v1310_v38 = vpop.f32.mrb[2].mxu0 }
 0x12f   : > { %v1373_v39 = vadd.f32 %v1372_v37, %v1371_v34  ;;  %v1374_v40 = vpop.f32.mrb[2].mxu1  ;;  %v1311_v41 = vpop.f32.mrb[3].mxu0  ;;  %v334_v37 = vld [vmem:[%s2001_s2 + $0x38] sm:$0xff] }
 0x130   : > { %v1312_v43 = vadd.f32 %v1311_v41, %v1310_v38  ;;  %v1375_v44 = vpop.f32.mrb[3].mxu1 }
 0x131   : > { %v923_v45 = vadd.f32 %v1373_v39, %v1309_v36  ;;  %v1376_v46 = vadd.f32 %v1375_v44, %v1374_v40 }
 0x133   : > { %v985_v48 = vadd.f32 %v923_v45, %v327_v42  ;;  %v926_v49 = vadd.f32 %v1376_v46, %v1312_v43 }
 0x134   : > { %v1313_v50 = vpop.f32.mrb[4].mxu0 }
 0x135   : > { %1001 = vst [vmem:[%s2001_s2] sm:$0xff] %v985_v48  ;;  %v986_v51 = vadd.f32 %v926_v49, %v328_v47  ;;  %v1377_v52 = vpop.f32.mrb[4].mxu1  ;;  %v1314_v53 = vpop.f32.mrb[5].mxu0 }
 0x136   : > { %v1315_v54 = vadd.f32 %v1314_v53, %v1313_v50  ;;  %v1378_v55 = vpop.f32.mrb[5].mxu1  ;;  %v1316_v56 = vpop.f32.mrb[6].mxu0  ;;  %v335_v50 = vld [vmem:[%s2001_s2 + $0x40] sm:$0xff] }
 0x137   : > { %1002 = vst [vmem:[%s2001_s2 + $0x8] sm:$0xff] %v986_v51  ;;  %v1379_v57 = vadd.f32 %v1378_v55, %v1377_v52  ;;  %v1380_v58 = vpop.f32.mrb[6].mxu1  ;;  %v1317_v59 = vpop.f32.mrb[7].mxu0  ;;  %v336_v55 = vld [vmem:[%s2001_s2 + $0x48] sm:$0xff] }
 0x138   : > { %v1318_v61 = vadd.f32 %v1317_v59, %v1316_v56  ;;  %v1381_v62 = vpop.f32.mrb[7].mxu1 }
 0x139   : > { %v931_v63 = vadd.f32 %v1379_v57, %v1315_v54  ;;  %v1382_v0 = vadd.f32 %v1381_v62, %v1380_v58 }
 0x13b   : > { %v987_v2 = vadd.f32 %v931_v63, %v329_v60  ;;  %v934_v3 = vadd.f32 %v1382_v0, %v1318_v61 }
 0x13c   : > { %v1319_v4 = vpop.f32.mrb[8].mxu0 }
 0x13d   : > { %1003 = vst [vmem:[%s2001_s2 + $0x10] sm:$0xff] %v987_v2  ;;  %v988_v5 = vadd.f32 %v934_v3, %v330_v1  ;;  %v1383_v6 = vpop.f32.mrb[8].mxu1  ;;  %v1320_v7 = vpop.f32.mrb[9].mxu0 }
 0x13e   : > { %v1321_v8 = vadd.f32 %v1320_v7, %v1319_v4  ;;  %v1384_v9 = vpop.f32.mrb[9].mxu1  ;;  %v1322_v10 = vpop.f32.mrb[10].mxu0  ;;  %v337_v4 = vld [vmem:[%s2001_s2 + $0x50] sm:$0xff] }
 0x13f   : > { %1004 = vst [vmem:[%s2001_s2 + $0x18] sm:$0xff] %v988_v5  ;;  %v1385_v11 = vadd.f32 %v1384_v9, %v1383_v6  ;;  %v1386_v12 = vpop.f32.mrb[10].mxu1  ;;  %v1323_v13 = vpop.f32.mrb[11].mxu0  ;;  %v338_v9 = vld [vmem:[%s2001_s2 + $0x58] sm:$0xff] }
 0x140   : > { %v1324_v15 = vadd.f32 %v1323_v13, %v1322_v10  ;;  %v1387_v16 = vpop.f32.mrb[11].mxu1 }
 0x141   : > { %v939_v17 = vadd.f32 %v1385_v11, %v1321_v8  ;;  %v1388_v18 = vadd.f32 %v1387_v16, %v1386_v12 }
 0x143   : > { %v989_v20 = vadd.f32 %v939_v17, %v331_v14  ;;  %v942_v21 = vadd.f32 %v1388_v18, %v1324_v15 }
 0x144   : > { %v1325_v22 = vpop.f32.mrb[12].mxu0 }
 0x145   : > { %1005 = vst [vmem:[%s2001_s2 + $0x20] sm:$0xff] %v989_v20  ;;  %v990_v23 = vadd.f32 %v942_v21, %v332_v19  ;;  %v1389_v24 = vpop.f32.mrb[12].mxu1  ;;  %v1326_v25 = vpop.f32.mrb[13].mxu0 }
 0x146   : > { %v1327_v26 = vadd.f32 %v1326_v25, %v1325_v22  ;;  %v1390_v27 = vpop.f32.mrb[13].mxu1  ;;  %v1328_v28 = vpop.f32.mrb[14].mxu0  ;;  %v339_v22 = vld [vmem:[%s2001_s2 + $0x60] sm:$0xff] }
 0x147   : > { %1006 = vst [vmem:[%s2001_s2 + $0x28] sm:$0xff] %v990_v23  ;;  %v1391_v29 = vadd.f32 %v1390_v27, %v1389_v24  ;;  %v1392_v30 = vpop.f32.mrb[14].mxu1  ;;  %v1329_v31 = vpop.f32.mrb[15].mxu0  ;;  %v340_v27 = vld [vmem:[%s2001_s2 + $0x68] sm:$0xff] }
 0x148   : > { %v1330_v33 = vadd.f32 %v1329_v31, %v1328_v28  ;;  %v1393_v34 = vpop.f32.mrb[15].mxu1 }
 0x149   : > { %v947_v35 = vadd.f32 %v1391_v29, %v1327_v26  ;;  %v1394_v36 = vadd.f32 %v1393_v34, %v1392_v30 }
 0x14b   : > { %v991_v38 = vadd.f32 %v947_v35, %v333_v32  ;;  %v950_v39 = vadd.f32 %v1394_v36, %v1330_v33 }
 0x14c   : > { %v1331_v40 = vpop.f32.mrb[16].mxu0 }
 0x14d   : > { %1007 = vst [vmem:[%s2001_s2 + $0x30] sm:$0xff] %v991_v38  ;;  %v992_v41 = vadd.f32 %v950_v39, %v334_v37  ;;  %v1395_v42 = vpop.f32.mrb[16].mxu1  ;;  %v1332_v43 = vpop.f32.mrb[17].mxu0 }
 0x14e   : > { %v1333_v44 = vadd.f32 %v1332_v43, %v1331_v40  ;;  %v1396_v45 = vpop.f32.mrb[17].mxu1  ;;  %v1334_v46 = vpop.f32.mrb[18].mxu0  ;;  %v341_v40 = vld [vmem:[%s2001_s2 + $0x70] sm:$0xff] }
 0x14f   : > { %1008 = vst [vmem:[%s2001_s2 + $0x38] sm:$0xff] %v992_v41  ;;  %v1397_v47 = vadd.f32 %v1396_v45, %v1395_v42  ;;  %v1398_v48 = vpop.f32.mrb[18].mxu1  ;;  %v1335_v49 = vpop.f32.mrb[19].mxu0  ;;  %v342_v45 = vld [vmem:[%s2001_s2 + $0x78] sm:$0xff] }
 0x150   : > { %v1336_v51 = vadd.f32 %v1335_v49, %v1334_v46  ;;  %v1399_v52 = vpop.f32.mrb[19].mxu1  ;;  %v1021_v49 = vld [vmem:[%s2001_s2] sm:$0xff] (!%p1284_p11) }
 0x151   : > { %v955_v53 = vadd.f32 %v1397_v47, %v1333_v44  ;;  %v1400_v54 = vadd.f32 %v1399_v52, %v1398_v48  ;;  %v1024_v52 = vld [vmem:[%s2001_s2 + $0x18] sm:$0xff] (!%p1284_p11) }
 0x153   : > { %v993_v56 = vadd.f32 %v955_v53, %v335_v50  ;;  %v958_v57 = vadd.f32 %v1400_v54, %v1336_v51  ;;  %v1022_v50 = vld [vmem:[%s2001_s2 + $0x8] sm:$0xff] (!%p1284_p11)  ;;  %v1023_v51 = vld [vmem:[%s2001_s2 + $0x10] sm:$0xff] (!%p1284_p11)  ;;  %v1058_v54 = vmul.f32 (!%p1284_p11), %v1021_v49, %v1021_v49 }
 0x154   : > { %v1337_v58 = vpop.f32.mrb[20].mxu0  ;;  %v1037_v53 = vadd.f32 (!%p1284_p11), %v1022_v50, %v1021_v49 }
 0x155   : > { %1009 = vst [vmem:[%s2001_s2 + $0x40] sm:$0xff] %v993_v56  ;;  %v994_v59 = vadd.f32 %v958_v57, %v336_v55  ;;  %v1401_v60 = vpop.f32.mrb[20].mxu1  ;;  %v1338_v61 = vpop.f32.mrb[21].mxu0  ;;  %v1059_v55 = vmul.f32 (!%p1284_p11), %v1022_v50, %v1022_v50  ;;  %v1060_v56 = vmul.f32 (!%p1284_p11), %v1023_v51, %v1023_v51  ;;  %v1025_v57 = vld [vmem:[%s2001_s2 + $0x20] sm:$0xff] (!%p1284_p11) }
 0x156   : > { %v1339_v62 = vadd.f32 %v1338_v61, %v1337_v58  ;;  %v1402_v63 = vpop.f32.mrb[21].mxu1  ;;  %v1340_v0 = vpop.f32.mrb[22].mxu0  ;;  %v1038_v58 = vadd.f32 (!%p1284_p11), %v1037_v53, %v1023_v51  ;;  %v1026_v61 = vld [vmem:[%s2001_s2 + $0x28] sm:$0xff] (!%p1284_p11) }
 0x157   : > { %1010 = vst [vmem:[%s2001_s2 + $0x48] sm:$0xff] %v994_v59  ;;  %v1403_v1 = vadd.f32 %v1402_v63, %v1401_v60  ;;  %v1404_v2 = vpop.f32.mrb[22].mxu1  ;;  %v1341_v3 = vpop.f32.mrb[23].mxu0  ;;  %v1061_v59 = vmul.f32 (!%p1284_p11), %v1024_v52, %v1024_v52  ;;  %v1074_v60 = vadd.f32 (!%p1284_p11), %v1059_v55, %v1058_v54  ;;  %v1062_v63 = vmul.f32 (!%p1284_p11), %v1025_v57, %v1025_v57 }
 0x158   : > { %v1342_v5 = vadd.f32 %v1341_v3, %v1340_v0  ;;  %v1405_v6 = vpop.f32.mrb[23].mxu1  ;;  %v1063_v3 = vmul.f32 (!%p1284_p11), %v1026_v61, %v1026_v61 }
 0x159   : > { %v963_v7 = vadd.f32 %v1403_v1, %v1339_v62  ;;  %v1406_v8 = vadd.f32 %v1405_v6, %v1404_v2  ;;  %v1039_v62 = vadd.f32 (!%p1284_p11), %v1038_v58, %v1024_v52  ;;  %v1075_v0 = vadd.f32 (!%p1284_p11), %v1074_v60, %v1060_v56  ;;  %v1027_v1 = vld [vmem:[%s2001_s2 + $0x30] sm:$0xff] (!%p1284_p11) }
 0x15b   : > { %v995_v10 = vadd.f32 %v963_v7, %v337_v4  ;;  %v966_v11 = vadd.f32 %v1406_v8, %v1342_v5  ;;  %v1040_v2 = vadd.f32 (!%p1284_p11), %v1039_v62, %v1025_v57  ;;  %v1076_v4 = vadd.f32 (!%p1284_p11), %v1075_v0, %v1061_v59  ;;  %v1028_v5 = vld [vmem:[%s2001_s2 + $0x38] sm:$0xff] (!%p1284_p11) }
 0x15c   : > { %v1343_v12 = vpop.f32.mrb[24].mxu0  ;;  %v1064_v7 = vmul.f32 (!%p1284_p11), %v1027_v1, %v1027_v1 }
 0x15d   : > { %1011 = vst [vmem:[%s2001_s2 + $0x50] sm:$0xff] %v995_v10  ;;  %v996_v13 = vadd.f32 %v966_v11, %v338_v9  ;;  %v1407_v14 = vpop.f32.mrb[24].mxu1  ;;  %v1344_v15 = vpop.f32.mrb[25].mxu0  ;;  %v1041_v6 = vadd.f32 (!%p1284_p11), %v1040_v2, %v1026_v61  ;;  %v1077_v8 = vadd.f32 (!%p1284_p11), %v1076_v4, %v1062_v63  ;;  %v1029_v9 = vld [vmem:[%s2001_s2 + $0x40] sm:$0xff] (!%p1284_p11)  ;;  %v1065_v11 = vmul.f32 (!%p1284_p11), %v1028_v5, %v1028_v5 }
 0x15e   : > { %v1345_v16 = vadd.f32 %v1344_v15, %v1343_v12  ;;  %v1408_v17 = vpop.f32.mrb[25].mxu1  ;;  %v1346_v18 = vpop.f32.mrb[26].mxu0  ;;  %v1066_v15 = vmul.f32 (!%p1284_p11), %v1029_v9, %v1029_v9 }
 0x15f   : > { %1012 = vst [vmem:[%s2001_s2 + $0x58] sm:$0xff] %v996_v13  ;;  %v1409_v19 = vadd.f32 %v1408_v17, %v1407_v14  ;;  %v1410_v20 = vpop.f32.mrb[26].mxu1  ;;  %v1347_v21 = vpop.f32.mrb[27].mxu0  ;;  %v1042_v10 = vadd.f32 (!%p1284_p11), %v1041_v6, %v1027_v1  ;;  %v1078_v12 = vadd.f32 (!%p1284_p11), %v1077_v8, %v1063_v3  ;;  %v1030_v13 = vld [vmem:[%s2001_s2 + $0x48] sm:$0xff] (!%p1284_p11) }
 0x160   : > { %v1348_v23 = vadd.f32 %v1347_v21, %v1346_v18  ;;  %v1411_v24 = vpop.f32.mrb[27].mxu1 }
 0x161   : > { %v971_v25 = vadd.f32 %v1409_v19, %v1345_v16  ;;  %v1412_v26 = vadd.f32 %v1411_v24, %v1410_v20  ;;  %v1043_v14 = vadd.f32 (!%p1284_p11), %v1042_v10, %v1028_v5  ;;  %v1079_v16 = vadd.f32 (!%p1284_p11), %v1078_v12, %v1064_v7 }
 0x162   : > { %v1067_v19 = vmul.f32 (!%p1284_p11), %v1030_v13, %v1030_v13 }
 0x163   : > { %v997_v28 = vadd.f32 %v971_v25, %v339_v22  ;;  %v974_v29 = vadd.f32 %v1412_v26, %v1348_v23  ;;  %v1044_v18 = vadd.f32 (!%p1284_p11), %v1043_v14, %v1029_v9  ;;  %v1080_v20 = vadd.f32 (!%p1284_p11), %v1079_v16, %v1065_v11 }
 0x164   : > { %v1349_v30 = vpop.f32.mrb[28].mxu0  ;;  %v1031_v17 = vld [vmem:[%s2001_s2 + $0x50] sm:$0xff] (!%p1284_p11) }
 0x165   : > { %1013 = vst [vmem:[%s2001_s2 + $0x60] sm:$0xff] %v997_v28  ;;  %v998_v31 = vadd.f32 %v974_v29, %v340_v27  ;;  %v1413_v32 = vpop.f32.mrb[28].mxu1  ;;  %v1350_v33 = vpop.f32.mrb[29].mxu0  ;;  %v1045_v22 = vadd.f32 (!%p1284_p11), %v1044_v18, %v1030_v13  ;;  %v1068_v23 = vmul.f32 (!%p1284_p11), %v1031_v17, %v1031_v17  ;;  %v1081_v24 = vadd.f32 (!%p1284_p11), %v1080_v20, %v1066_v15 }
 0x166   : > { %v1351_v34 = vadd.f32 %v1350_v33, %v1349_v30  ;;  %v1414_v35 = vpop.f32.mrb[29].mxu1  ;;  %v1352_v36 = vpop.f32.mrb[30].mxu0  ;;  %v1032_v21 = vld [vmem:[%s2001_s2 + $0x58] sm:$0xff] (!%p1284_p11) }
 0x167   : > { %1014 = vst [vmem:[%s2001_s2 + $0x68] sm:$0xff] %v998_v31  ;;  %v1415_v37 = vadd.f32 %v1414_v35, %v1413_v32  ;;  %v1416_v38 = vpop.f32.mrb[30].mxu1  ;;  %v1353_v39 = vpop.f32.mrb[31].mxu0  ;;  %v1046_v26 = vadd.f32 (!%p1284_p11), %v1045_v22, %v1031_v17  ;;  %v1069_v27 = vmul.f32 (!%p1284_p11), %v1032_v21, %v1032_v21  ;;  %v1082_v28 = vadd.f32 (!%p1284_p11), %v1081_v24, %v1067_v19 }
 0x168   : > { %v1354_v41 = vadd.f32 %v1353_v39, %v1352_v36  ;;  %v1417_v42 = vpop.f32.mrb[31].mxu1 }
 0x169   : > { %v979_v43 = vadd.f32 %v1415_v37, %v1351_v34  ;;  %v1418_v44 = vadd.f32 %v1417_v42, %v1416_v38  ;;  %1020 = sbr.rel (%p1284_p11) target bundleno = 393 (0x189), region = 59  ;;  %v1047_v30 = vadd.f32 (!%p1284_p11), %v1046_v26, %v1032_v21  ;;  %v1083_v32 = vadd.f32 (!%p1284_p11), %v1082_v28, %v1068_v23 }
 0x16b   : > { %v999_v46 = vadd.f32 %v979_v43, %v341_v40  ;;  %v982_v47 = vadd.f32 %v1418_v44, %v1354_v41  ;;  %v1084_v36 = vadd.f32 (!%p1284_p11), %v1083_v32, %v1069_v27 }
 0x16c   : > { %v1033_v25 = vld [vmem:[%s2001_s2 + $0x60] sm:$0xff] (!%p1284_p11) }
 0x16d   : > { %1015 = vst [vmem:[%s2001_s2 + $0x70] sm:$0xff] %v999_v46  ;;  %v1000_v48 = vadd.f32 %v982_v47, %v342_v45  ;;  %v1070_v31 = vmul.f32 (!%p1284_p11), %v1033_v25, %v1033_v25  ;;  %v1048_v34 = vadd.f32 (!%p1284_p11), %v1047_v30, %v1033_v25 }
 0x16e   : > { %v1034_v29 = vld [vmem:[%s2001_s2 + $0x68] sm:$0xff] (!%p1284_p11) }
 0x16f   : > { %1016 = vst [vmem:[%s2001_s2 + $0x78] sm:$0xff] %v1000_v48  ;;  %v1071_v35 = vmul.f32 (!%p1284_p11), %v1034_v29, %v1034_v29  ;;  %v1049_v38 = vadd.f32 (!%p1284_p11), %v1048_v34, %v1034_v29  ;;  %v1085_v40 = vadd.f32 (!%p1284_p11), %v1084_v36, %v1070_v31 }
 0x171   : > { %v1086_v43 = vadd.f32 %v1085_v40, %v1071_v35 }
 0x174   : > { %v1035_v33 = vld [vmem:[%s2001_s2 + $0x70] sm:$0xff] }
 0x175   : > { %v1072_v39 = vmul.f32 %v1035_v33, %v1035_v33  ;;  %v1050_v41 = vadd.f32 %v1049_v38, %v1035_v33 }
 0x176   : > { %v1036_v37 = vld [vmem:[%s2001_s2 + $0x78] sm:$0xff] }
 0x177   : > { %v1073_v42 = vmul.f32 %v1036_v37, %v1036_v37  ;;  %v1051_v44 = vadd.f32 %v1050_v41, %v1036_v37  ;;  %v1087_v45 = vadd.f32 %v1086_v43, %v1072_v39 }
 0x179   : > { %v1052_v46 = vrot.slane %v1051_v44, 4  ;;  %v1088_v47 = vadd.f32 %v1087_v45, %v1073_v42 }
 0x17b   : > { %v1053_v48 = vadd.f32 %v1052_v46, %v1051_v44  ;;  %v1089_v49 = vrot.slane %v1088_v47, 4 }
 0x17d   : > { %v1054_v50 = vrot.slane %v1053_v48, 2  ;;  %v1090_v51 = vadd.f32 %v1089_v49, %v1088_v47 }
 0x17f   : > { %v1055_v52 = vadd.f32 %v1054_v50, %v1053_v48  ;;  %v1091_v53 = vrot.slane %v1090_v51, 2 }
 0x181   : > { %v1056_v54 = vrot.slane %v1055_v52, 1  ;;  %v1092_v55 = vadd.f32 %v1091_v53, %v1090_v51 }
 0x183   : > { %v1057_v56 = vadd.f32 %v1056_v54, %v1055_v52  ;;  %v1093_v57 = vrot.slane %v1092_v55, 1 }
 0x185   : > { %v1094_v58 = vadd.f32 %v1093_v57, %v1092_v55 }
 0x187   : > { %v1096_v59 = vsel %vm1095_vm0, %v1057_v56, %v1094_v58 }
 0x188   : > { %1097 = vst [vmem:[%s2002_s3] sm:$0x3] %v1096_v59 }
 0x189 PF: > { %s14_s16 = sadd.s32 1, %s1578_s16   ;;  %s2003_s12 = smov %s1566_s13 }
 0x18a   : > { %p11_p12 = scmp.ge.s32.totalorder %s14_s16, 6   ;;  %s2004_s13 = smov %s1636_s20 }
 0x18b   : > { %s2005_s14 = smov %s1574_s15  ;;  %s2006_s15 = smov %s2008_s17 }
 0x18c   :  { %13 = sbr.rel (!%p11_p12) target bundleno = 3 (0x3), region = 109 }

// kernel: discriminator_forward.12
= control target key start
LH: loop header
LB: loop body
LE: loop exit
PB: predicated region body
PF: predicated region fallthrough
CT: control target
= control target key end

     0   :  { %s423_s0 = inlined_call_operand.vmem [shape: f32[128,128], index: 0, kind: input, shape index: {}]   ;;  %s424_s1 = inlined_call_operand.vmem [shape: f32[1,128], index: 1, kind: input, shape index: {}]   ;;  %s425_s2 = inlined_call_operand.vmem [shape: f32[1,128], index: 2, kind: input, shape index: {}]   ;;  %s426_s3 = inlined_call_operand.vmem [shape: bf16[128,128], index: 3, kind: output, shape index: {}]  }
   0x1   :  { %v14_v0 = vld [vmem:[%s423_s0] sm:$0xff]  ;;  %v15_v1 = vld [vmem:[%s423_s0 + $0x8] sm:$0xff]  ;;  %v16_v6 = vld [vmem:[%s423_s0 + $0x10] sm:$0xff] }
   0x2   :  { %v318_v2 = vld [vmem:[%s424_s1] ss:$0 sm:$0xff]  ;;  %v17_v7 = vld [vmem:[%s423_s0 + $0x18] sm:$0xff]  ;;  %v19_v11 = vld [vmem:[%s423_s0 + $0x28] sm:$0xff] }
   0x3   :  { %v37_v3 = vmul.f32 %v318_v2, %v14_v0  ;;  %v38_v4 = vmul.f32 %v318_v2, %v15_v1  ;;  %v325_v5 = vld [vmem:[%s425_s2] ss:$0 sm:$0xff]  ;;  %v39_v8 = vmul.f32 %v318_v2, %v16_v6  ;;  %v40_v9 = vmul.f32 %v318_v2, %v17_v7  ;;  %v20_v12 = vld [vmem:[%s423_s0 + $0x30] sm:$0xff]  ;;  %v21_v17 = vld [vmem:[%s423_s0 + $0x38] sm:$0xff] }
   0x4   :  { %v18_v10 = vld [vmem:[%s423_s0 + $0x20] sm:$0xff]  ;;  %v42_v16 = vmul.f32 %v318_v2, %v19_v11  ;;  %v43_v20 = vmul.f32 %v318_v2, %v20_v12  ;;  %v44_v21 = vmul.f32 %v318_v2, %v21_v17  ;;  %v23_v35 = vld [vmem:[%s423_s0 + $0x48] sm:$0xff]  ;;  %v24_v36 = vld [vmem:[%s423_s0 + $0x50] sm:$0xff] }
   0x5   :  { %v60_v13 = vadd.f32 %v325_v5, %v37_v3  ;;  %v61_v14 = vadd.f32 %v325_v5, %v38_v4  ;;  %v41_v15 = vmul.f32 %v318_v2, %v18_v10  ;;  %v62_v18 = vadd.f32 %v325_v5, %v39_v8  ;;  %v22_v34 = vld [vmem:[%s423_s0 + $0x40] sm:$0xff]  ;;  %v25_v42 = vld [vmem:[%s423_s0 + $0x58] sm:$0xff]  ;;  %v27_v48 = vld [vmem:[%s423_s0 + $0x68] sm:$0xff] }
   0x6   :  { %v63_v19 = vadd.f32 %v325_v5, %v40_v9  ;;  %v65_v29 = vadd.f32 %v325_v5, %v42_v16  ;;  %v66_v33 = vadd.f32 %v325_v5, %v43_v20  ;;  %v67_v40 = vadd.f32 %v325_v5, %v44_v21  ;;  %v26_v47 = vld [vmem:[%s423_s0 + $0x60] sm:$0xff]  ;;  %v28_v60 = vld [vmem:[%s423_s0 + $0x70] sm:$0xff]  ;;  %v29_v7 = vld [vmem:[%s423_s0 + $0x78] sm:$0xff] }
   0x7   :  { %vm76_vm0 = vcmp.gt.f32.partialorder %v60_v13, 0.0  ;;  %vm77_vm1 = vcmp.gt.f32.partialorder %v61_v14, 0.0  ;;  %v92_v22 = vmul.f32 0.2, %v60_v13  ;;  %v93_v23 = vmul.f32 0.2, %v61_v14 }
   0x8   :  { %vm78_vm2 = vcmp.gt.f32.partialorder %v62_v18, 0.0  ;;  %vm79_vm3 = vcmp.gt.f32.partialorder %v63_v19, 0.0  ;;  %v94_v24 = vmul.f32 0.2, %v62_v18  ;;  %v95_v25 = vmul.f32 0.2, %v63_v19 }
   0x9   :  { %v108_v26 = vsel %vm76_vm0, %v60_v13, %v92_v22  ;;  %v109_v27 = vsel %vm77_vm1, %v61_v14, %v93_v23  ;;  %v64_v28 = vadd.f32 %v325_v5, %v41_v15  ;;  %vm81_vm5 = vcmp.gt.f32.partialorder %v65_v29, 0.0 }
   0xa   :  { %v245_v30 = vpack.c.bf16 %v109_v27, %v108_v26  ;;  %v110_v31 = vsel %vm78_vm2, %v62_v18, %v94_v24  ;;  %v111_v32 = vsel %vm79_vm3, %v63_v19, %v95_v25  ;;  %v97_v39 = vmul.f32 0.2, %v65_v29 }
   0xb   :  { %v250_v37 = vpack.c.bf16 %v111_v32, %v110_v31  ;;  %vm80_vm4 = vcmp.gt.f32.partialorder %v64_v28, 0.0  ;;  %v96_v38 = vmul.f32 0.2, %v64_v28  ;;  %vm82_vm6 = vcmp.gt.f32.partialorder %v66_v33, 0.0 }
   0xc   :  { %246 = vst [vmem:[%s426_s3] sm:$0xff] %v245_v30   ;;  %v98_v41 = vmul.f32 0.2, %v66_v33  ;;  %v45_v44 = vmul.f32 %v318_v2, %v22_v34  ;;  %v46_v45 = vmul.f32 %v318_v2, %v23_v35  ;;  %v47_v46 = vmul.f32 %v318_v2, %v24_v36 }
   0xd   :  { %282 = vst [vmem:[%s426_s3 + $0x8] sm:$0xff] %v250_v37   ;;  %v112_v43 = vsel %vm80_vm4, %v64_v28, %v96_v38  ;;  %v113_v49 = vsel %vm81_vm5, %v65_v29, %v97_v39  ;;  %vm83_vm7 = vcmp.gt.f32.partialorder %v67_v40, 0.0  ;;  %v99_v50 = vmul.f32 0.2, %v67_v40 }
   0xe   :  { %v114_v51 = vsel %vm82_vm6, %v66_v33, %v98_v41  ;;  %v255_v52 = vpack.c.bf16 %v113_v49, %v112_v43  ;;  %v68_v53 = vadd.f32 %v325_v5, %v45_v44  ;;  %v69_v54 = vadd.f32 %v325_v5, %v46_v45 }
   0xf   :  { %v48_v55 = vmul.f32 %v318_v2, %v25_v42  ;;  %v115_v56 = vsel %vm83_vm7, %v67_v40, %v99_v50  ;;  %v70_v57 = vadd.f32 %v325_v5, %v47_v46  ;;  %v49_v58 = vmul.f32 %v318_v2, %v26_v47 }
  0x10   :  { %v50_v59 = vmul.f32 %v318_v2, %v27_v48  ;;  %283 = vst [vmem:[%s426_s3 + $0x10] sm:$0xff] %v255_v52   ;;  %v260_v61 = vpack.c.bf16 %v115_v56, %v114_v51  ;;  %vm84_vm8 = vcmp.gt.f32.partialorder %v68_v53, 0.0  ;;  %vm85_vm9 = vcmp.gt.f32.partialorder %v69_v54, 0.0 }
  0x11   :  { %v100_v62 = vmul.f32 0.2, %v68_v53  ;;  %v101_v63 = vmul.f32 0.2, %v69_v54  ;;  %v71_v0 = vadd.f32 %v325_v5, %v48_v55  ;;  %vm86_vm10 = vcmp.gt.f32.partialorder %v70_v57, 0.0 }
  0x12   :  { %v102_v1 = vmul.f32 0.2, %v70_v57  ;;  %284 = vst [vmem:[%s426_s3 + $0x18] sm:$0xff] %v260_v61   ;;  %v72_v4 = vadd.f32 %v325_v5, %v49_v58  ;;  %v73_v6 = vadd.f32 %v325_v5, %v50_v59  ;;  %v51_v8 = vmul.f32 %v318_v2, %v28_v60 }
  0x13   :  { %v116_v3 = vsel %vm84_vm8, %v68_v53, %v100_v62  ;;  %v117_v9 = vsel %vm85_vm9, %v69_v54, %v101_v63  ;;  %vm87_vm11 = vcmp.gt.f32.partialorder %v71_v0, 0.0  ;;  %v103_v10 = vmul.f32 0.2, %v71_v0 }
  0x14   :  { %v118_v11 = vsel %vm86_vm10, %v70_v57, %v102_v1  ;;  %v265_v12 = vpack.c.bf16 %v117_v9, %v116_v3  ;;  %vm88_vm12 = vcmp.gt.f32.partialorder %v72_v4, 0.0  ;;  %vm89_vm13 = vcmp.gt.f32.partialorder %v73_v6, 0.0 }
  0x15   :  { %v104_v13 = vmul.f32 0.2, %v72_v4  ;;  %v119_v14 = vsel %vm87_vm11, %v71_v0, %v103_v10  ;;  %v105_v15 = vmul.f32 0.2, %v73_v6  ;;  %v52_v16 = vmul.f32 %v318_v2, %v29_v7 }
  0x16   :  { %v74_v17 = vadd.f32 %v325_v5, %v51_v8  ;;  %285 = vst [vmem:[%s426_s3 + $0x20] sm:$0xff] %v265_v12   ;;  %v270_v18 = vpack.c.bf16 %v119_v14, %v118_v11 }
  0x17   :  { %v120_v19 = vsel %vm88_vm12, %v72_v4, %v104_v13  ;;  %v121_v20 = vsel %vm89_vm13, %v73_v6, %v105_v15  ;;  %v75_v21 = vadd.f32 %v325_v5, %v52_v16 }
  0x18   :  { %vm90_vm14 = vcmp.gt.f32.partialorder %v74_v17, 0.0  ;;  %v106_v22 = vmul.f32 0.2, %v74_v17  ;;  %286 = vst [vmem:[%s426_s3 + $0x28] sm:$0xff] %v270_v18   ;;  %v275_v23 = vpack.c.bf16 %v121_v20, %v120_v19 }
  0x19   :  { %vm91_vm15 = vcmp.gt.f32.partialorder %v75_v21, 0.0  ;;  %v107_v2 = vmul.f32 0.2, %v75_v21 }
  0x1a   :  { %v122_v24 = vsel %vm90_vm14, %v74_v17, %v106_v22  ;;  %287 = vst [vmem:[%s426_s3 + $0x30] sm:$0xff] %v275_v23  }
  0x1b   :  { %v123_v25 = vsel %vm91_vm15, %v75_v21, %v107_v2 }
  0x1c   :  { %v280_v26 = vpack.c.bf16 %v123_v25, %v122_v24 }
  0x1e   :  { %288 = vst [vmem:[%s426_s3 + $0x38] sm:$0xff] %v280_v26  }

// kernel: discriminator_forward.13
= control target key start
LH: loop header
LB: loop body
LE: loop exit
PB: predicated region body
PF: predicated region fallthrough
CT: control target
= control target key end

     0   :  { %s1085_s12 = smov 0   ;;  %s1087_s13 = smov 0   ;;  %s1247_s0 = inlined_call_operand.vmem [shape: bf16[32,2048], index: 0, kind: input, shape index: {}]   ;;  %s1248_s1 = inlined_call_operand.vmem [shape: bf16[2048,128], index: 1, kind: input, shape index: {}]   ;;  %s1249_s2 = inlined_call_operand.vmem [shape: f32[32,128], index: 2, kind: output, shape index: {0}]   ;;  %s1250_s3 = inlined_call_operand.vmem [shape: f32[1,2,128], index: 3, kind: output, shape index: {1}]  }
   0x1   :  { %s1089_s14 = smov 0   ;;  %s1091_s15 = smov 0  }
   0x2   :  { %s1093_s16 = smov 0  }
   0x3 LB: > { %s23_s17 = sadd.s32 1, %s1058_s15  ;;  %p42_p1 = scmp.ne.s32.totalorder %s1050_s13, %s1046_s12  ;;  %s1062_s16 = sphi %s1093_s16, %s14_s16   ;;  %s1058_s15 = sphi %s1091_s15, %s1254_s15   ;;  %s1054_s14 = sphi %s1089_s14, %s1253_s14   ;;  %s1050_s13 = sphi %s1087_s13, %s1252_s13   ;;  %s1046_s12 = sphi %s1085_s12, %s1251_s12  }
   0x4   : > { %p24_p0 = scmp.ge.s32.totalorder %s23_s17, 4  ;;  %p43_p2 = scmp.eq.s32.totalorder %s1062_s16, 0 }
   0x5   : > { %s35_s19 = sadd.s32 1, %s1050_s13  ;;  %p827_p5 = scmp.ge.s32.totalorder %s1062_s16, 4 }
   0x6   : > { %s1256_s17 = smov (%p24_p0, %s23_s17), 0  ;;  %p44_p3 = por %p43_p2, %p42_p1 }
   0x7   : > { %s31_s18 = ssub.s32 %s1058_s15, %s1256_s17  ;;  %146 = sbr.rel (%p827_p5) target bundleno = 22 (0x16), region = 16 }
   0x8   : > { %p33_p4 = scmp.eq.s32.totalorder %s31_s18, 0 }
   0xa   : > { %s1120_s20 = scalar_select %p33_p4, %s1050_s13, %s35_s19  }
   0xe   : > { %149 = sbr.rel (!%p44_p3) target bundleno = 22 (0x16), region = 20  ;;  %s151_s21 = sand.u32 (%p44_p3), 1, %s1050_s13  }
   0xf   : > { %s882_s22 = sshll.u32 (%p44_p3), %s1058_s15, 4  ;;  %s828_s23 = sshll.u32 (%p44_p3), %s151_s21, 6 }
  0x10   : > { %s159_s26 = scalar_lea.vmem (%p44_p3), %s1247_s0, %s882_s22  ;;  %s153_s27 = scalar_lea.vmem (%p44_p3), [#allocation2], %s828_s23 }
  0x11   : > { %v172_v0 = vld [vmem:[%s159_s26] sm:$0xff] (%p44_p3)  ;;  %v174_v1 = vld [vmem:[%s159_s26 + $0x8] sm:$0xff] (%p44_p3) }
  0x12   : > { %v176_v2 = vld [vmem:[%s159_s26 + $0x40] sm:$0xff] (%p44_p3)  ;;  %173 = vst [vmem:[%s153_s27] sm:$0xff] (%p44_p3), %v172_v0  ;;  %175 = vst [vmem:[%s153_s27 + $0x8] sm:$0xff] (%p44_p3), %v174_v1  ;;  %v178_v3 = vld [vmem:[%s159_s26 + $0x48] sm:$0xff] (%p44_p3) }
  0x13   : > { %177 = vst [vmem:[%s153_s27 + $0x10] sm:$0xff] (%p44_p3), %v176_v2  ;;  %v180_v4 = vld [vmem:[%s159_s26 + $0x80] sm:$0xff] (%p44_p3)  ;;  %v182_v5 = vld [vmem:[%s159_s26 + $0x88] sm:$0xff] (%p44_p3)  ;;  %179 = vst [vmem:[%s153_s27 + $0x18] sm:$0xff] (%p44_p3), %v178_v3 }
  0x14   : > { %181 = vst [vmem:[%s153_s27 + $0x20] sm:$0xff] (%p44_p3), %v180_v4  ;;  %183 = vst [vmem:[%s153_s27 + $0x28] sm:$0xff] (%p44_p3), %v182_v5  ;;  %v184_v6 = vld [vmem:[%s159_s26 + $0xc0] sm:$0xff] (%p44_p3)  ;;  %v186_v7 = vld [vmem:[%s159_s26 + $0xc8] sm:$0xff] (%p44_p3) }
  0x15   : > { %185 = vst [vmem:[%s153_s27 + $0x30] sm:$0xff] %v184_v6  ;;  %187 = vst [vmem:[%s153_s27 + $0x38] sm:$0xff] %v186_v7 }
  0x16 PF: > { %p831_p6 = scmp.ge.s32.totalorder %s1062_s16, 1  ;;  %p201_p7 = scmp.lt.s32.totalorder %s1062_s16, 5 }
  0x18   : > { %p202_p8 = pnand %p831_p6, %p201_p7 }
  0x19   : > { %s208_s28 = sand.u32 (!%p202_p8), 1, %s1046_s12   ;;  %s833_s29 = sshll.u32 (!%p202_p8), %s1054_s14, 6 }
  0x1a   : > { %205 = sbr.rel (%p202_p8) target bundleno = 330 (0x14a), region = 47  ;;  %s832_s30 = sshll.u32 (!%p202_p8), %s208_s28, 6 }
  0x1b   : > { %p243_p9 = scmp.lt.s32.totalorder (!%p202_p8), %s833_s29, 255  ;;  %s1137_s8 = scalar_lea.vmem (!%p202_p8), [#allocation2], %s832_s30 }
  0x1c   : > { %p835_p10 = scmp.ne.s32.totalorder (!%p202_p8), %s1054_s14, 0 }
  0x21   : > { %s1258_s29 = smov (!%p243_p9, %s833_s29), 255  ;;  %262 = sbr.rel (%p835_p10) target bundleno = 40 (0x28), region = 55 }
  0x22   : > { %s834_s4 = sshll.u32 %s1258_s29, 2  ;;  %v1064_v8 = vmov (!%p835_p10), 0.0  }
  0x23   : > { %s1135_s7 = scalar_lea.vmem %s1248_s1, %s834_s4  ;;  %263 = vst [vmem:[%s1249_s2] sm:$0xff] (!%p835_p10), %v1064_v8  ;;  %264 = vst [vmem:[%s1249_s2 + $0x8] sm:$0xff] (!%p835_p10), %v1064_v8 }
  0x24   : > { %265 = vst [vmem:[%s1249_s2 + $0x10] sm:$0xff] (!%p835_p10), %v1064_v8  ;;  %266 = vst [vmem:[%s1249_s2 + $0x18] sm:$0xff] (!%p835_p10), %v1064_v8 }
  0x28 PF: > { %v980_v9 = vld [vmem:[%s1135_s7 + $0x40] sm:$0xff]   ;;  %v984_v13 = vld [vmem:[%s1135_s7 + $0x48] sm:$0xff]   ;;  %v988_v17 = vld [vmem:[%s1135_s7 + $0x50] sm:$0xff]   ;;  %p876_p11 = scmp.ne.s32.totalorder %s1054_s14, 3 }
  0x29   : > { %v981_v10 = vld [vmem:[%s1135_s7 + $0xc0] sm:$0xff]   ;;  %883 = vmatprep.subr.bf16.mxu0 %v980_v9  ;;  %v985_v14 = vld [vmem:[%s1135_s7 + $0xc8] sm:$0xff]   ;;  %v989_v18 = vld [vmem:[%s1135_s7 + $0xd0] sm:$0xff]   ;;  %vm711_vm0 = vcmask (!%p876_p11), 1040384  }
  0x2a   : > { %v982_v11 = vld [vmem:[%s1135_s7] sm:$0xff]   ;;  %911 = vmatprep.subr.bf16.mxu1 %v981_v10  ;;  %v986_v15 = vld [vmem:[%s1135_s7 + $0x8] sm:$0xff]   ;;  %v990_v19 = vld [vmem:[%s1135_s7 + $0x10] sm:$0xff]  }
  0x2b   : > { %v983_v12 = vld [vmem:[%s1135_s7 + $0x80] sm:$0xff]   ;;  %884 = vmatpush3.bf16.msra.mxu0 %v982_v11  ;;  %v987_v16 = vld [vmem:[%s1135_s7 + $0x88] sm:$0xff]   ;;  %v991_v20 = vld [vmem:[%s1135_s7 + $0x90] sm:$0xff]  }
  0x2c   : > { %912 = vmatpush3.bf16.msra.mxu1 %v983_v12  ;;  %885 = vmatprep.subr.bf16.mxu0 %v984_v13  ;;  %v992_v21 = vld [vmem:[%s1135_s7 + $0x58] sm:$0xff]   ;;  %v996_v25 = vld [vmem:[%s1135_s7 + $0x60] sm:$0xff]   ;;  %v1000_v29 = vld [vmem:[%s1135_s7 + $0x68] sm:$0xff]  }
  0x2d   : > { %913 = vmatprep.subr.bf16.mxu1 %v985_v14  ;;  %v993_v22 = vld [vmem:[%s1135_s7 + $0xd8] sm:$0xff]   ;;  %v997_v26 = vld [vmem:[%s1135_s7 + $0xe0] sm:$0xff]   ;;  %v1001_v30 = vld [vmem:[%s1135_s7 + $0xe8] sm:$0xff]  }
  0x2e   : > { %v994_v23 = vld [vmem:[%s1135_s7 + $0x18] sm:$0xff]   ;;  %v998_v27 = vld [vmem:[%s1135_s7 + $0x20] sm:$0xff]   ;;  %v1002_v31 = vld [vmem:[%s1135_s7 + $0x28] sm:$0xff]  }
  0x2f   : > { %886 = vmatpush3.bf16.msra.mxu0 %v986_v15  ;;  %v995_v24 = vld [vmem:[%s1135_s7 + $0x98] sm:$0xff]   ;;  %v999_v28 = vld [vmem:[%s1135_s7 + $0xa0] sm:$0xff]   ;;  %v1003_v32 = vld [vmem:[%s1135_s7 + $0xa8] sm:$0xff]  }
  0x30   : > { %914 = vmatpush3.bf16.msra.mxu1 %v987_v16  ;;  %887 = vmatprep.subr.bf16.mxu0 %v988_v17  ;;  %v1004_v33 = vld [vmem:[%s1135_s7 + $0x70] sm:$0xff]   ;;  %v1008_v37 = vld [vmem:[%s1135_s7 + $0x78] sm:$0xff]   ;;  %v267_v58 = vld [vmem:[%s1249_s2] sm:$0xff] }
  0x31   : > { %915 = vmatprep.subr.bf16.mxu1 %v989_v18  ;;  %v1005_v34 = vld [vmem:[%s1135_s7 + $0xf0] sm:$0xff]   ;;  %v1009_v38 = vld [vmem:[%s1135_s7 + $0xf8] sm:$0xff]   ;;  %v268_v63 = vld [vmem:[%s1249_s2 + $0x8] sm:$0xff] }
  0x32   : > { %v1006_v35 = vld [vmem:[%s1135_s7 + $0x30] sm:$0xff]   ;;  %v1010_v39 = vld [vmem:[%s1135_s7 + $0x38] sm:$0xff]  }
  0x33   : > { %888 = vmatpush3.bf16.msra.mxu0 %v990_v19  ;;  %v1007_v36 = vld [vmem:[%s1135_s7 + $0xb0] sm:$0xff]   ;;  %v1011_v40 = vld [vmem:[%s1135_s7 + $0xb8] sm:$0xff]  }
  0x34   : > { %916 = vmatpush3.bf16.msra.mxu1 %v991_v20  ;;  %889 = vmatprep.subr.bf16.mxu0 %v992_v21  ;;  %v1012_v41 = vld [vmem:[%s1137_s8] ss:$16 sps:$4 sm:$0xff]   ;;  %v1014_v42 = vld [vmem:[%s1137_s8 + $0x4] ss:$16 sps:$4 sm:$0xff]   ;;  %v1015_v43 = vld [vmem:[%s1137_s8 + $0x8] ss:$16 sps:$4 sm:$0xff]  }
  0x35   : > { %917 = vmatprep.subr.bf16.mxu1 %v993_v22  ;;  %v1017_v44 = vld [vmem:[%s1137_s8 + $0xc] ss:$16 sps:$4 sm:$0xff]   ;;  %607 = vmatprep.mubr.bf16.mxu0 %v1014_v42  ;;  %v1018_v45 = vld [vmem:[%s1137_s8 + $0x24] ss:$16 sps:$4 sm:$0xff]   ;;  %v1022_v47 = vld [vmem:[%s1137_s8 + $0x20] ss:$16 sps:$4 sm:$0xff]  }
  0x36   : > { %656 = vmatprep.mubr.bf16.mxu1 %v1017_v44  ;;  %v1020_v46 = vld [vmem:[%s1137_s8 + $0x2c] ss:$16 sps:$4 sm:$0xff]   ;;  %v1023_v48 = vld [vmem:[%s1137_s8 + $0x28] ss:$16 sps:$4 sm:$0xff]   ;;  %v269_v12 = vld [vmem:[%s1249_s2 + $0x10] sm:$0xff] }
  0x37   : > { %890 = vmatpush3.bf16.msra.mxu0 %v994_v23  ;;  %v270_v17 = vld [vmem:[%s1249_s2 + $0x18] sm:$0xff] }
  0x38   : > { %918 = vmatpush3.bf16.msra.mxu1 %v995_v24  ;;  %891 = vmatprep.subr.bf16.mxu0 %v996_v25 }
  0x39   : > { %919 = vmatprep.subr.bf16.mxu1 %v997_v26 }
  0x3b   : > { %892 = vmatpush3.bf16.msra.mxu0 %v998_v27 }
  0x3c   : > { %920 = vmatpush3.bf16.msra.mxu1 %v999_v28  ;;  %893 = vmatprep.subr.bf16.mxu0 %v1000_v29 }
  0x3d   : > { %921 = vmatprep.subr.bf16.mxu1 %v1001_v30 }
  0x3f   : > { %894 = vmatpush3.bf16.msra.mxu0 %v1002_v31 }
  0x40   : > { %922 = vmatpush3.bf16.msra.mxu1 %v1003_v32  ;;  %895 = vmatprep.subr.bf16.mxu0 %v1004_v33 }
  0x41   : > { %923 = vmatprep.subr.bf16.mxu1 %v1005_v34 }
  0x43   : > { %896 = vmatpush3.bf16.msra.mxu0 %v1006_v35 }
  0x44   : > { %924 = vmatpush3.bf16.msra.mxu1 %v1007_v36  ;;  %897 = vmatprep.subr.bf16.mxu0 %v1008_v37 }
  0x45   : > { %925 = vmatprep.subr.bf16.mxu1 %v1009_v38 }
  0x47   : > { %898 = vmatpush3.bf16.msra.mxu0 %v1010_v39 }
  0x48   : > { %926 = vmatpush3.bf16.msra.mxu1 %v1011_v40 }
  0x4a   : > { %608 = vmatmul.mubr.bf16.vlgmr.msra.gmra.mrb[0].mxu0 %v1012_v41 }
  0x4b   : > { %657 = vmatmul.mubr.bf16.vlgmr.msra.gmra.mrb[0].mxu1 %v1015_v43  ;;  %615 = vmatprep.mubr.bf16.mxu0 %v1018_v45 }
  0x4c   : > { %664 = vmatprep.mubr.bf16.mxu1 %v1020_v46 }
  0x52   : > { %616 = vmatmul.mubr.bf16.gmra.mrb[4].mxu0 %v1022_v47 }
  0x53   : > { %665 = vmatmul.mubr.bf16.gmra.mrb[4].mxu1 %v1023_v48 }
 0x11d   : > { %v899_v49 = vpop.f32.mrb[0].mxu0 }
 0x11e   : > { %v927_v50 = vpop.f32.mrb[0].mxu1  ;;  %v900_v51 = vpop.f32.mrb[1].mxu0 }
 0x11f   : > { %v901_v52 = vadd.f32 %v900_v51, %v899_v49  ;;  %v928_v53 = vpop.f32.mrb[1].mxu1  ;;  %v902_v54 = vpop.f32.mrb[2].mxu0 }
 0x120   : > { %v929_v55 = vadd.f32 %v928_v53, %v927_v50  ;;  %v930_v56 = vpop.f32.mrb[2].mxu1  ;;  %v903_v57 = vpop.f32.mrb[3].mxu0 }
 0x121   : > { %v904_v59 = vadd.f32 %v903_v57, %v902_v54  ;;  %v931_v60 = vpop.f32.mrb[3].mxu1 }
 0x122   : > { %v659_v61 = vadd.f32 %v929_v55, %v901_v52  ;;  %v932_v62 = vadd.f32 %v931_v60, %v930_v56 }
 0x124   : > { %v673_v0 = vadd.f32 %v659_v61, %v267_v58  ;;  %v662_v1 = vadd.f32 %v932_v62, %v904_v59 }
 0x125   : > { %v905_v2 = vpop.f32.mrb[4].mxu0 }
 0x126   : > { %677 = vst [vmem:[%s1249_s2] sm:$0xff] %v673_v0  ;;  %v674_v3 = vadd.f32 %v662_v1, %v268_v63  ;;  %v933_v4 = vpop.f32.mrb[4].mxu1  ;;  %v906_v5 = vpop.f32.mrb[5].mxu0 }
 0x127   : > { %v907_v6 = vadd.f32 %v906_v5, %v905_v2  ;;  %v934_v7 = vpop.f32.mrb[5].mxu1  ;;  %v908_v8 = vpop.f32.mrb[6].mxu0 }
 0x128   : > { %678 = vst [vmem:[%s1249_s2 + $0x8] sm:$0xff] %v674_v3  ;;  %v935_v9 = vadd.f32 %v934_v7, %v933_v4  ;;  %v936_v10 = vpop.f32.mrb[6].mxu1  ;;  %v909_v11 = vpop.f32.mrb[7].mxu0 }
 0x129   : > { %v910_v13 = vadd.f32 %v909_v11, %v908_v8  ;;  %v937_v14 = vpop.f32.mrb[7].mxu1 }
 0x12a   : > { %v667_v15 = vadd.f32 %v935_v9, %v907_v6  ;;  %v938_v16 = vadd.f32 %v937_v14, %v936_v10  ;;  %684 = sbr.rel (%p876_p11) target bundleno = 330 (0x14a), region = 59 }
 0x12c   : > { %v675_v18 = vadd.f32 %v667_v15, %v269_v12  ;;  %v670_v19 = vadd.f32 %v938_v16, %v910_v13 }
 0x12d   : > { %v685_v21 = vld [vmem:[%s1249_s2] sm:$0xff] (!%p876_p11) }
 0x12e   : > { %679 = vst [vmem:[%s1249_s2 + $0x10] sm:$0xff] %v675_v18  ;;  %v676_v20 = vadd.f32 %v670_v19, %v270_v17  ;;  %v698_v26 = vmul.f32 (!%p876_p11), %v685_v21, %v685_v21 }
 0x12f   : > { %v686_v22 = vld [vmem:[%s1249_s2 + $0x8] sm:$0xff] (!%p876_p11) }
 0x130   : > { %680 = vst [vmem:[%s1249_s2 + $0x18] sm:$0xff] %v676_v20  ;;  %v689_v25 = vadd.f32 (!%p876_p11), %v686_v22, %v685_v21  ;;  %v699_v27 = vmul.f32 (!%p876_p11), %v686_v22, %v686_v22 }
 0x132   : > { %v702_v31 = vadd.f32 %v699_v27, %v698_v26 }
 0x135   : > { %v687_v23 = vld [vmem:[%s1249_s2 + $0x10] sm:$0xff] }
 0x136   : > { %v700_v28 = vmul.f32 %v687_v23, %v687_v23  ;;  %v690_v29 = vadd.f32 %v689_v25, %v687_v23 }
 0x137   : > { %v688_v24 = vld [vmem:[%s1249_s2 + $0x18] sm:$0xff] }
 0x138   : > { %v701_v30 = vmul.f32 %v688_v24, %v688_v24  ;;  %v691_v32 = vadd.f32 %v690_v29, %v688_v24  ;;  %v703_v33 = vadd.f32 %v702_v31, %v700_v28 }
 0x13a   : > { %v692_v34 = vrot.slane %v691_v32, 4  ;;  %v704_v35 = vadd.f32 %v703_v33, %v701_v30 }
 0x13c   : > { %v693_v36 = vadd.f32 %v692_v34, %v691_v32  ;;  %v705_v37 = vrot.slane %v704_v35, 4 }
 0x13e   : > { %v694_v38 = vrot.slane %v693_v36, 2  ;;  %v706_v39 = vadd.f32 %v705_v37, %v704_v35 }
 0x140   : > { %v695_v40 = vadd.f32 %v694_v38, %v693_v36  ;;  %v707_v41 = vrot.slane %v706_v39, 2 }
 0x142   : > { %v696_v42 = vrot.slane %v695_v40, 1  ;;  %v708_v43 = vadd.f32 %v707_v41, %v706_v39 }
 0x144   : > { %v697_v44 = vadd.f32 %v696_v42, %v695_v40  ;;  %v709_v45 = vrot.slane %v708_v43, 1 }
 0x146   : > { %v710_v46 = vadd.f32 %v709_v45, %v708_v43 }
 0x148   : > { %v712_v47 = vsel %vm711_vm0, %v697_v44, %v710_v46 }
 0x149   : > { %713 = vst [vmem:[%s1250_s3] sm:$0x3] %v712_v47 }
 0x14a PF: > { %s14_s16 = sadd.s32 1, %s1062_s16   ;;  %s1251_s12 = smov %s1050_s13 }
 0x14b   : > { %p11_p12 = scmp.ge.s32.totalorder %s14_s16, 6   ;;  %s1252_s13 = smov %s1120_s20 }
 0x14c   : > { %s1253_s14 = smov %s1058_s15  ;;  %s1254_s15 = smov %s1256_s17 }
 0x14d   :  { %13 = sbr.rel (!%p11_p12) target bundleno = 3 (0x3), region = 109 }

// kernel: discriminator_forward.14
= control target key start
LH: loop header
LB: loop body
LE: loop exit
PB: predicated region body
PF: predicated region fallthrough
CT: control target
= control target key end

     0   :  { %s141_s0 = inlined_call_operand.vmem [shape: f32[32,128], index: 0, kind: input, shape index: {}]   ;;  %s142_s1 = inlined_call_operand.vmem [shape: f32[1,128], index: 1, kind: input, shape index: {}]   ;;  %s143_s2 = inlined_call_operand.vmem [shape: f32[1,128], index: 2, kind: input, shape index: {}]   ;;  %s144_s3 = inlined_call_operand.vmem [shape: bf16[32,128], index: 3, kind: output, shape index: {}]  }
   0x1   :  { %v14_v0 = vld [vmem:[%s141_s0] sm:$0xff]  ;;  %v15_v1 = vld [vmem:[%s141_s0 + $0x8] sm:$0xff]  ;;  %v16_v6 = vld [vmem:[%s141_s0 + $0x10] sm:$0xff] }
   0x2   :  { %v76_v2 = vld [vmem:[%s142_s1] ss:$0 sm:$0xff]  ;;  %v17_v7 = vld [vmem:[%s141_s0 + $0x18] sm:$0xff] }
   0x3   :  { %v25_v3 = vmul.f32 %v76_v2, %v14_v0  ;;  %v26_v4 = vmul.f32 %v76_v2, %v15_v1  ;;  %v77_v5 = vld [vmem:[%s143_s2] ss:$0 sm:$0xff]  ;;  %v27_v8 = vmul.f32 %v76_v2, %v16_v6  ;;  %v28_v9 = vmul.f32 %v76_v2, %v17_v7 }
   0x5   :  { %v36_v10 = vadd.f32 %v77_v5, %v25_v3  ;;  %v37_v11 = vadd.f32 %v77_v5, %v26_v4  ;;  %v38_v12 = vadd.f32 %v77_v5, %v27_v8  ;;  %v39_v13 = vadd.f32 %v77_v5, %v28_v9 }
   0x7   :  { %vm40_vm0 = vcmp.gt.f32.partialorder %v36_v10, 0.0  ;;  %vm41_vm1 = vcmp.gt.f32.partialorder %v37_v11, 0.0  ;;  %v44_v14 = vmul.f32 0.2, %v36_v10  ;;  %v45_v15 = vmul.f32 0.2, %v37_v11 }
   0x8   :  { %vm42_vm2 = vcmp.gt.f32.partialorder %v38_v12, 0.0  ;;  %vm43_vm3 = vcmp.gt.f32.partialorder %v39_v13, 0.0  ;;  %v46_v16 = vmul.f32 0.2, %v38_v12  ;;  %v47_v17 = vmul.f32 0.2, %v39_v13 }
   0x9   :  { %v48_v18 = vsel %vm40_vm0, %v36_v10, %v44_v14  ;;  %v49_v19 = vsel %vm41_vm1, %v37_v11, %v45_v15 }
   0xa   :  { %v89_v20 = vpack.c.bf16 %v49_v19, %v48_v18  ;;  %v50_v21 = vsel %vm42_vm2, %v38_v12, %v46_v16  ;;  %v51_v22 = vsel %vm43_vm3, %v39_v13, %v47_v17 }
   0xb   :  { %v94_v23 = vpack.c.bf16 %v51_v22, %v50_v21 }
   0xc   :  { %90 = vst [vmem:[%s144_s3] sm:$0xff] %v89_v20  }
   0xd   :  { %96 = vst [vmem:[%s144_s3 + $0x8] sm:$0xff] %v94_v23  }

// kernel: discriminator_forward.15
= control target key start
LH: loop header
LB: loop body
LE: loop exit
PB: predicated region body
PF: predicated region fallthrough
CT: control target
= control target key end

     0   :  { %s839_s9 = smov 0   ;;  %s841_s10 = smov 0   ;;  %s919_s0 = inlined_call_operand.vmem [shape: bf16[8,2048], index: 0, kind: input, shape index: {}]   ;;  %s920_s1 = inlined_call_operand.vmem [shape: bf16[2048,128], index: 1, kind: input, shape index: {}]   ;;  %s921_s2 = inlined_call_operand.vmem [shape: f32[8,128], index: 2, kind: output, shape index: {}]  }
   0x1   :  { %s843_s11 = smov 0  }
   0x2 LB: > { %s21_s12 = sadd.s32 1, %s817_s10  ;;  %p644_p0 = scmp.ge.s32.totalorder %s821_s11, 1  ;;  %s821_s11 = sphi %s843_s11, %s12_s11   ;;  %s817_s10 = sphi %s841_s10, %s923_s10   ;;  %s813_s9 = sphi %s839_s9, %s922_s9  }
   0x3   : > { %p22_p1 = scmp.ge.s32.totalorder %s21_s12, 4  ;;  %p142_p2 = scmp.lt.s32.totalorder %s821_s11, 5 }
   0x5   : > { %s925_s12 = smov (%p22_p1, %s21_s12), 0  ;;  %p143_p3 = pnand %p644_p0, %p142_p2 }
   0x6   : > { %s645_s13 = sshll.u32 (!%p143_p3), %s813_s9, 2  ;;  %s647_s14 = sshll.u32 (!%p143_p3), %s813_s9, 6 }
   0x7   : > { %146 = sbr.rel (%p143_p3) target bundleno = 315 (0x13b), region = 28  ;;  %p175_p4 = scmp.lt.s32.totalorder (!%p143_p3), %s645_s13, 15 }
   0x8   : > { %p183_p5 = scmp.lt.s32.totalorder (!%p143_p3), %s647_s14, 255  ;;  %p649_p6 = scmp.ne.s32.totalorder (!%p143_p3), %s813_s9, 0 }
   0xe   : > { %s927_s13 = smov (!%p175_p4, %s645_s13), 15  ;;  %s929_s14 = smov (!%p183_p5, %s647_s14), 255 }
   0xf   : > { %s646_s15 = sshll.u32 %s927_s13, 2  ;;  %s648_s19 = sshll.u32 %s929_s14, 2  ;;  %v823_v0 = vmov (!%p649_p6), 0.0  }
  0x10   : > { %s864_s18 = scalar_lea.vmem %s919_s0, %s646_s15  ;;  %s869_s22 = scalar_lea.vmem %s920_s1, %s648_s19  ;;  %197 = vst [vmem:[#allocation2] sm:$0xff] (!%p649_p6), %v823_v0 }
  0x11   : > { %196 = sbr.rel (%p649_p6) target bundleno = 24 (0x18), region = 32 }
  0x18 PF: > { %v759_v1 = vld [vmem:[%s869_s22 + $0x40] sm:$0xff]   ;;  %v763_v5 = vld [vmem:[%s869_s22 + $0x48] sm:$0xff]   ;;  %v767_v9 = vld [vmem:[%s869_s22 + $0x50] sm:$0xff]   ;;  %p686_p7 = scmp.ne.s32.totalorder %s813_s9, 3 }
  0x19   : > { %v760_v2 = vld [vmem:[%s869_s22 + $0xc0] sm:$0xff]   ;;  %690 = vmatprep.subr.bf16.mxu0 %v759_v1  ;;  %v764_v6 = vld [vmem:[%s869_s22 + $0xc8] sm:$0xff]   ;;  %v768_v10 = vld [vmem:[%s869_s22 + $0xd0] sm:$0xff]  }
  0x1a   : > { %v761_v3 = vld [vmem:[%s869_s22] sm:$0xff]   ;;  %712 = vmatprep.subr.bf16.mxu1 %v760_v2  ;;  %v765_v7 = vld [vmem:[%s869_s22 + $0x8] sm:$0xff]   ;;  %v769_v11 = vld [vmem:[%s869_s22 + $0x10] sm:$0xff]  }
  0x1b   : > { %v762_v4 = vld [vmem:[%s869_s22 + $0x80] sm:$0xff]   ;;  %691 = vmatpush3.bf16.msra.mxu0 %v761_v3  ;;  %v766_v8 = vld [vmem:[%s869_s22 + $0x88] sm:$0xff]   ;;  %v770_v12 = vld [vmem:[%s869_s22 + $0x90] sm:$0xff]  }
  0x1c   : > { %713 = vmatpush3.bf16.msra.mxu1 %v762_v4  ;;  %692 = vmatprep.subr.bf16.mxu0 %v763_v5  ;;  %v771_v13 = vld [vmem:[%s869_s22 + $0x58] sm:$0xff]   ;;  %v775_v17 = vld [vmem:[%s869_s22 + $0x60] sm:$0xff]   ;;  %v779_v21 = vld [vmem:[%s869_s22 + $0x68] sm:$0xff]  }
  0x1d   : > { %714 = vmatprep.subr.bf16.mxu1 %v764_v6  ;;  %v772_v14 = vld [vmem:[%s869_s22 + $0xd8] sm:$0xff]   ;;  %v776_v18 = vld [vmem:[%s869_s22 + $0xe0] sm:$0xff]   ;;  %v780_v22 = vld [vmem:[%s869_s22 + $0xe8] sm:$0xff]  }
  0x1e   : > { %v773_v15 = vld [vmem:[%s869_s22 + $0x18] sm:$0xff]   ;;  %v777_v19 = vld [vmem:[%s869_s22 + $0x20] sm:$0xff]   ;;  %v781_v23 = vld [vmem:[%s869_s22 + $0x28] sm:$0xff]  }
  0x1f   : > { %693 = vmatpush3.bf16.msra.mxu0 %v765_v7  ;;  %v774_v16 = vld [vmem:[%s869_s22 + $0x98] sm:$0xff]   ;;  %v778_v20 = vld [vmem:[%s869_s22 + $0xa0] sm:$0xff]   ;;  %v782_v24 = vld [vmem:[%s869_s22 + $0xa8] sm:$0xff]  }
  0x20   : > { %715 = vmatpush3.bf16.msra.mxu1 %v766_v8  ;;  %694 = vmatprep.subr.bf16.mxu0 %v767_v9  ;;  %v783_v25 = vld [vmem:[%s869_s22 + $0x70] sm:$0xff]   ;;  %v787_v29 = vld [vmem:[%s869_s22 + $0x78] sm:$0xff]   ;;  %v199_v33 = vld [vmem:[%s864_s18] sm:$0xff] }
  0x21   : > { %716 = vmatprep.subr.bf16.mxu1 %v768_v10  ;;  %v784_v26 = vld [vmem:[%s869_s22 + $0xf0] sm:$0xff]   ;;  %v788_v30 = vld [vmem:[%s869_s22 + $0xf8] sm:$0xff]   ;;  %v200_v34 = vld [vmem:[%s864_s18 + $0x8] sm:$0xff]  ;;  %v650_v35 = vcombine.low %v199_v33, %v199_v33  ;;  %v651_v36 = vcombine.high %v199_v33, %v199_v33 }
  0x22   : > { %v785_v27 = vld [vmem:[%s869_s22 + $0x30] sm:$0xff]   ;;  %v789_v31 = vld [vmem:[%s869_s22 + $0x38] sm:$0xff]   ;;  %v652_v37 = vcombine.low %v200_v34, %v200_v34  ;;  %v653_v38 = vcombine.high %v200_v34, %v200_v34  ;;  %v198_v47 = vld [vmem:[#allocation2] sm:$0xff] }
  0x23   : > { %695 = vmatpush3.bf16.msra.mxu0 %v769_v11  ;;  %v786_v28 = vld [vmem:[%s869_s22 + $0xb0] sm:$0xff]   ;;  %v790_v32 = vld [vmem:[%s869_s22 + $0xb8] sm:$0xff]   ;;  %503 = vmatprep.mubr.bf16.mxu0 %v651_v36 }
  0x24   : > { %717 = vmatpush3.bf16.msra.mxu1 %v770_v12  ;;  %696 = vmatprep.subr.bf16.mxu0 %v771_v13 }
  0x25   : > { %718 = vmatprep.subr.bf16.mxu1 %v772_v14  ;;  %543 = vmatprep.mubr.bf16.mxu1 %v653_v38 }
  0x27   : > { %697 = vmatpush3.bf16.msra.mxu0 %v773_v15 }
  0x28   : > { %719 = vmatpush3.bf16.msra.mxu1 %v774_v16  ;;  %698 = vmatprep.subr.bf16.mxu0 %v775_v17 }
  0x29   : > { %720 = vmatprep.subr.bf16.mxu1 %v776_v18 }
  0x2b   : > { %699 = vmatpush3.bf16.msra.mxu0 %v777_v19 }
  0x2c   : > { %721 = vmatpush3.bf16.msra.mxu1 %v778_v20  ;;  %700 = vmatprep.subr.bf16.mxu0 %v779_v21 }
  0x2d   : > { %722 = vmatprep.subr.bf16.mxu1 %v780_v22 }
  0x2f   : > { %701 = vmatpush3.bf16.msra.mxu0 %v781_v23 }
  0x30   : > { %723 = vmatpush3.bf16.msra.mxu1 %v782_v24  ;;  %702 = vmatprep.subr.bf16.mxu0 %v783_v25 }
  0x31   : > { %724 = vmatprep.subr.bf16.mxu1 %v784_v26 }
  0x33   : > { %703 = vmatpush3.bf16.msra.mxu0 %v785_v27 }
  0x34   : > { %725 = vmatpush3.bf16.msra.mxu1 %v786_v28  ;;  %704 = vmatprep.subr.bf16.mxu0 %v787_v29 }
  0x35   : > { %726 = vmatprep.subr.bf16.mxu1 %v788_v30 }
  0x37   : > { %705 = vmatpush3.bf16.msra.mxu0 %v789_v31 }
  0x38   : > { %727 = vmatpush3.bf16.msra.mxu1 %v790_v32 }
  0x3a   : > { %504 = vmatmul.mubr.bf16.vlgmr.msra.gmra.mrb[0].mxu0 %v650_v35 }
  0x3b   : > { %544 = vmatmul.mubr.bf16.vlgmr.msra.gmra.mrb[0].mxu1 %v652_v37 }
 0x10d   : > { %v706_v39 = vpop.f32.mrb[0].mxu0 }
 0x10e   : > { %v728_v40 = vpop.f32.mrb[0].mxu1  ;;  %v707_v41 = vpop.f32.mrb[1].mxu0 }
 0x10f   : > { %v729_v42 = vpop.f32.mrb[1].mxu1  ;;  %v708_v43 = vadd.f32 %v707_v41, %v706_v39  ;;  %v709_v45 = vpop.f32.mrb[2].mxu0 }
 0x110   : > { %v730_v44 = vadd.f32 %v729_v42, %v728_v40  ;;  %v731_v46 = vpop.f32.mrb[2].mxu1  ;;  %v710_v48 = vpop.f32.mrb[3].mxu0  ;;  %556 = sbr.rel (%p686_p7) target bundleno = 315 (0x13b), region = 36 }
 0x111   : > { %v732_v49 = vpop.f32.mrb[3].mxu1 }
 0x112   : > { %v546_v50 = vadd.f32 %v730_v44, %v708_v43 }
 0x114   : > { %v551_v51 = vadd.f32 %v546_v50, %v198_v47 }
 0x116   : > { %552 = vst [vmem:[#allocation2] sm:$0xff] %v551_v51 }
 0x11d   : > { %v557_v52 = vld [vmem:[#allocation2] sm:$0xff] }
 0x11e   : > { %v558_v53 = vsub.f32 0.0, %v557_v52 }
 0x120   : > { %v559_v54 = vmul.f32 1.442695, %v558_v53 }
 0x122   : > { %795 = vpow2.f32 %v559_v54 }
 0x12c   : > { %v796_v55 = vpop.eup %795 }
 0x12d   : > { %v561_v56 = vadd.f32 1.0, %v796_v55 }
 0x12f   : > { %797 = vrcp.f32 %v561_v56 }
 0x139   : > { %v798_v57 = vpop.eup %797 }
 0x13a   : > { %563 = vst [vmem:[%s921_s2] sm:$0xff] %v798_v57 }
 0x13b PF: > { %s12_s11 = sadd.s32 1, %s821_s11   ;;  %s922_s9 = smov %s817_s10 }
 0x13c   : > { %p9_p8 = scmp.ge.s32.totalorder %s12_s11, 6   ;;  %s923_s10 = smov %s925_s12 }
 0x13e   :  { %11 = sbr.rel (!%p9_p8) target bundleno = 2 (0x2), region = 69 }

</bundles_post_ra>
